<compile_context>
chip_gen: v7x
topology: tpu7x:2x2x1
jax: 0.10.0
libtpu: 0.0.40
codegen_flags: <defaults>
</compile_context>

<pallas_src>
import math

import jax
import jax.numpy as jnp
from jax.experimental import pallas as pl
from jax.experimental.pallas import tpu as pltpu


_LAYER_DIMS = (512, 256, 128, 64, 32, 1)
_INV_SQRT2 = 0.7071067811865476


def _round_up(n, m):
    return ((n + m - 1) // m) * m


def _vmem_capacity_bytes():
    """Physical VMEM of the current chip; conservative fallback = v7x 64 MiB."""
    try:
        info = pltpu.get_tpu_info()
        cap = getattr(info, "vmem_capacity_bytes", None)
        if cap:
            return int(cap)
    except Exception:
        pass
    return 64 << 20


def _gelu(x, approximate):
    if approximate:
        # tanh form lowers to the EUP slot (otherwise idle) instead of a long
        # erf polynomial on the VALU; diverges from PyTorch's exact GELU by
        # ~1e-3 per activation.
        return jax.nn.gelu(x, approximate=True)
    # PyTorch nn.GELU() default: exact erf-based GELU (done in f32).
    return 0.5 * x * (1.0 + jax.lax.erf(x * _INV_SQRT2))


def _make_mlp_kernel(approximate_gelu):
    def _mlp_kernel(x_ref, w1, b1, w2, b2, w3, b3, w4, b4, w5, b5, w6, b6,
                    out_ref, acc_ref):
        # Grid: (batch_tiles, k_tiles).  k tiles the flattened-image feature
        # axis of layer 1 (a single step when w1 is fully resident); layers
        # 2..6 + sigmoid only run on the last k step.
        k = pl.program_id(1)

        @pl.when(k == 0)
        def _init():
            acc_ref[...] = jnp.zeros_like(acc_ref)

        # Layer-1 partial product: (bt, kt) @ (kt, 512) on the MXU with bf16
        # operands and a resident f32 accumulator.  x streams from HBM as f32
        # (no separate wrapper transpose/cast pass); the bf16 cast happens
        # here on the VPU, hidden under the DMA/MXU-bound step.
        acc_ref[...] += jnp.dot(x_ref[...].astype(jnp.bfloat16), w1[...],
                                preferred_element_type=jnp.float32)

        @pl.when(k == pl.num_programs(1) - 1)
        def _finish():
            def linear(h, w_ref, b_ref):
                # bf16 operands on the MXU, f32 accumulation + bias.
                return jnp.dot(h.astype(w_ref.dtype), w_ref[...],
                               preferred_element_type=jnp.float32) + b_ref[...]

            h = _gelu(acc_ref[...] + b1[...], approximate_gelu)   # (bt, 512)
            h = _gelu(linear(h, w2, b2), approximate_gelu)        # (bt, 256)
            h = _gelu(linear(h, w3, b3), approximate_gelu)        # (bt, 128)
            h = _gelu(linear(h, w4, b4), approximate_gelu)        # (bt, 64)
            h = _gelu(linear(h, w5, b5), approximate_gelu)        # (bt, 32)
            logits = linear(h, w6, b6)                            # (bt, 1)
            out_ref[...] = jax.nn.sigmoid(logits).astype(out_ref.dtype)

    return _mlp_kernel


def discriminator1_forward(image, params, *, batch_tile=512, k_tile=2048,
                           w1_resident_budget=24 << 20,
                           approximate_gelu=False):
    """image: (B, C, H, W) float32.  params: list of (W(out,in), b(out,)).

    Returns (B, 1) probabilities, matching Discriminator1.forward.
    """
    assert batch_tile % 128 == 0, "batch_tile must be a multiple of 128"
    assert k_tile % 128 == 0, "k_tile must be a multiple of 128"

    B = image.shape[0]
    F = int(math.prod(image.shape[1:]))
    x = image.reshape(B, F)                      # same as image.reshape(B, -1)
    if x.dtype != jnp.float32:
        x = x.astype(jnp.float32)

    # Batch tile: big for DMA efficiency, but split ~in half across B so the
    # "parallel" axis has >=2 tiles (both v7x TensorCores busy) whenever the
    # batch allows; always a multiple of 128 so the MXU M dim stays full.
    bt = min(batch_tile, _round_up(max(-(-B // 2), 1), 128))
    B_pad = _round_up(B, bt)

    # Layer-1 feature (K) tiling.  If the whole w1 plus the matching full-F
    # double-buffered x block fit a modest VMEM budget, keep w1 resident
    # (constant block index => fetched from HBM exactly once); otherwise tile
    # K and accumulate in f32 scratch.
    F_full = _round_up(F, 128)
    resident_bytes = F_full * (2 * bt * 4 + 2 * _LAYER_DIMS[0] * 2)
    if resident_bytes <= w1_resident_budget:
        F_pad, kt = F_full, F_full
    else:
        F_pad, kt = _round_up(F, k_tile), k_tile

    # Zero-padding is harmless for the matmul; skipped entirely when aligned.
    if B_pad != B or F_pad != F:
        x = jnp.pad(x, ((0, B_pad - B), (0, F_pad - F)))

    # Host-side weight prep (tiny vs. the x stream): transpose the static
    # weights once to (in, out) bf16 for the MXU; biases are f32 rows (1,out).
    ws, bs = [], []
    for idx, (w, b) in enumerate(params):
        wt = w.T.astype(jnp.bfloat16)
        if idx == 0 and F_pad != F:
            wt = jnp.pad(wt, ((0, F_pad - F), (0, 0)))
        ws.append(wt)
        bs.append(b.reshape(1, -1).astype(jnp.float32))

    grid = (B_pad // bt, F_pad // kt)

    def resident(shape):
        return pl.BlockSpec(shape, lambda i, k: (0, 0))

    in_specs = [
        pl.BlockSpec((bt, kt), lambda i, k: (i, k)),               # x block
        pl.BlockSpec((kt, _LAYER_DIMS[0]), lambda i, k: (k, 0)),   # w1t block
        resident(bs[0].shape),                                     # b1
    ]
    inputs = [x, ws[0], bs[0]]
    for wt, b in zip(ws[1:], bs[1:]):
        in_specs.append(resident(wt.shape))
        inputs.append(wt)
        in_specs.append(resident(b.shape))
        inputs.append(b)

    # Explicit VMEM budget: double-buffered streamed blocks + resident tail
    # weights/biases + f32 accumulator + finish-phase f32/bf16 activation
    # chain + slack, clamped under the chip's physical VMEM (64 MiB on v7x,
    # 128 MiB on v5e/v6e — no hard 48 MiB cap on the bigger parts).
    x_block_bytes = 2 * bt * kt * 4
    w1_block_bytes = 2 * kt * _LAYER_DIMS[0] * 2
    tail_weight_bytes = 2 * sum(int(w.size) for w in ws[1:]) * 2
    bias_bytes = 2 * sum(int(b.size) for b in bs) * 4
    out_bytes = 2 * bt * 4
    acc_bytes = bt * _LAYER_DIMS[0] * 4
    finish_tmp_bytes = bt * sum(_LAYER_DIMS) * 6   # f32 acts + bf16 MXU copies
    needed = (x_block_bytes + w1_block_bytes + tail_weight_bytes + bias_bytes
              + out_bytes + acc_bytes + finish_tmp_bytes + (8 << 20))
    vmem_cap = _vmem_capacity_bytes()
    vmem_bytes = int(min(max(needed, 16 << 20), vmem_cap - (4 << 20)))

    out = pl.pallas_call(
        _make_mlp_kernel(approximate_gelu),
        out_shape=jax.ShapeDtypeStruct((B_pad, 1), jnp.float32),
        grid_spec=pltpu.PrefetchScalarGridSpec(
            num_scalar_prefetch=0,
            grid=grid,
            in_specs=in_specs,
            out_specs=pl.BlockSpec((bt, 1), lambda i, k: (i, 0)),
            scratch_shapes=[pltpu.VMEM((bt, _LAYER_DIMS[0]), jnp.float32)],
        ),
        compiler_params=pltpu.CompilerParams(
            dimension_semantics=("parallel", "arbitrary"),
            vmem_limit_bytes=vmem_bytes,
        ),
    )(*inputs)

    return out[:B]


def init_params(key, in_features):
    """PyTorch nn.Linear-style init; weights (out, in), biases (out,)."""
    dims = (in_features,) + _LAYER_DIMS
    params = []
    for fan_in, fan_out in zip(dims[:-1], dims[1:]):
        key, kw, kb = jax.random.split(key, 3)
        bound = 1.0 / math.sqrt(fan_in)
        w = jax.random.uniform(kw, (fan_out, fan_in), jnp.float32, -bound, bound)
        b = jax.random.uniform(kb, (fan_out,), jnp.float32, -bound, bound)
        params.append((w, b))
    return params


def _reference_forward(image, params):
    B = image.shape[0]
    h = image.reshape(B, -1).astype(jnp.float32)
    for i, (w, b) in enumerate(params):
        h = h @ w.T + b
        if i < len(params) - 1:
            h = jax.nn.gelu(h, approximate=False)   # exact erf GELU
    return jax.nn.sigmoid(h)


if __name__ == "__main__":
    key = jax.random.PRNGKey(0)
    k_img, k_param = jax.random.split(key)

    # Module-consistent small shapes: image_size = (4, 16, 16) -> 1024 features.
    B, C, H, W = 2, 4, 16, 16
    image = jax.random.normal(k_img, (B, C, H, W), jnp.float32)
    params = init_params(k_param, C * H * W)

    ref = _reference_forward(image, params)

    # Path 1: w1 fully VMEM-resident (single K step) — the default for small F.
    out = jax.block_until_ready(discriminator1_forward(image, params))
    assert out.shape == (B, 1), out.shape
    # bf16 MXU operands vs f32 reference -> loosened tolerance.
    assert jnp.allclose(out, ref, atol=2e-2, rtol=2e-2), (out, ref)

    # Path 2: force K-tiling (2 k steps) to exercise the accumulator path.
    out_kt = jax.block_until_ready(
        discriminator1_forward(image, params, k_tile=512, w1_resident_budget=0))
    assert out_kt.shape == (B, 1), out_kt.shape
    assert jnp.allclose(out_kt, ref, atol=2e-2, rtol=2e-2), (out_kt, ref)

    print("KERNEL_OK")
</pallas_src>

<mosaic_0001>
module attributes {stable_mosaic.version = 11 : i64} {
  func.func @_mlp_kernel(%arg0: i32, %arg1: i32, %arg2: memref<128x1024xf32, #tpu.memory_space<vmem>>, %arg3: memref<1024x512xbf16, #tpu.memory_space<vmem>>, %arg4: memref<1x512xf32, #tpu.memory_space<vmem>>, %arg5: memref<512x256xbf16, #tpu.memory_space<vmem>>, %arg6: memref<1x256xf32, #tpu.memory_space<vmem>>, %arg7: memref<256x128xbf16, #tpu.memory_space<vmem>>, %arg8: memref<1x128xf32, #tpu.memory_space<vmem>>, %arg9: memref<128x64xbf16, #tpu.memory_space<vmem>>, %arg10: memref<1x64xf32, #tpu.memory_space<vmem>>, %arg11: memref<64x32xbf16, #tpu.memory_space<vmem>>, %arg12: memref<1x32xf32, #tpu.memory_space<vmem>>, %arg13: memref<32x1xbf16, #tpu.memory_space<vmem>>, %arg14: memref<1x1xf32, #tpu.memory_space<vmem>>, %arg15: memref<128x1xf32, #tpu.memory_space<vmem>>, %arg16: memref<128x512xf32, #tpu.memory_space<vmem>>) attributes {dimension_semantics = [#tpu.dimension_semantics<parallel>, #tpu.dimension_semantics<arbitrary>], iteration_bounds = array<i64: 1, 1>, scalar_prefetch = 0 : i64, scratch_operands = 1 : i64, tpu.core_type = #tpu.core_type<tc>, window_params = [{transform_indices = @transform_0, window_bounds = array<i64: 128, 1024>}, {transform_indices = @transform_1, window_bounds = array<i64: 1024, 512>}, {pipeline_mode = #tpu.pipeline_mode<synchronous>, transform_indices = @transform_2, window_bounds = array<i64: 1, 512>}, {pipeline_mode = #tpu.pipeline_mode<synchronous>, transform_indices = @transform_3, window_bounds = array<i64: 512, 256>}, {pipeline_mode = #tpu.pipeline_mode<synchronous>, transform_indices = @transform_4, window_bounds = array<i64: 1, 256>}, {pipeline_mode = #tpu.pipeline_mode<synchronous>, transform_indices = @transform_5, window_bounds = array<i64: 256, 128>}, {pipeline_mode = #tpu.pipeline_mode<synchronous>, transform_indices = @transform_6, window_bounds = array<i64: 1, 128>}, {pipeline_mode = #tpu.pipeline_mode<synchronous>, transform_indices = @transform_7, window_bounds = array<i64: 128, 64>}, {pipeline_mode = #tpu.pipeline_mode<synchronous>, transform_indices = @transform_8, window_bounds = array<i64: 1, 64>}, {pipeline_mode = #tpu.pipeline_mode<synchronous>, transform_indices = @transform_9, window_bounds = array<i64: 64, 32>}, {pipeline_mode = #tpu.pipeline_mode<synchronous>, transform_indices = @transform_10, window_bounds = array<i64: 1, 32>}, {pipeline_mode = #tpu.pipeline_mode<synchronous>, transform_indices = @transform_11, window_bounds = array<i64: 32, 1>}, {pipeline_mode = #tpu.pipeline_mode<synchronous>, transform_indices = @transform_12, window_bounds = array<i64: 1, 1>}, {transform_indices = @transform_13, window_bounds = array<i64: 128, 1>}]} {
    %c0_i32 = arith.constant 0 : i32
    %0 = arith.cmpi eq, %arg1, %c0_i32 : i32
    %1 = arith.extui %0 : i1 to i32
    %c0_i32_0 = arith.constant 0 : i32
    %2 = arith.cmpi ne, %1, %c0_i32_0 : i32
    scf.if %2 {
      %cst_10 = arith.constant 0.000000e+00 : f32
      %13 = vector.broadcast %cst_10 : f32 to vector<128x512xf32>
      %c0_11 = arith.constant 0 : index
      %c0_12 = arith.constant 0 : index
      %14 = vector.load %arg16[%c0_11, %c0_12] : memref<128x512xf32, #tpu.memory_space<vmem>>, vector<128x512xf32>
      tpu.vector_store %arg16[%c0_11, %c0_12], %13 {strides = array<i32>} : memref<128x512xf32, #tpu.memory_space<vmem>>, vector<128x512xf32>,
    } else {
    }
    %c0 = arith.constant 0 : index
    %c0_1 = arith.constant 0 : index
    %3 = vector.load %arg16[%c0, %c0_1] : memref<128x512xf32, #tpu.memory_space<vmem>>, vector<128x512xf32>
    %c0_2 = arith.constant 0 : index
    %c0_3 = arith.constant 0 : index
    %4 = vector.load %arg2[%c0_2, %c0_3] : memref<128x1024xf32, #tpu.memory_space<vmem>>, vector<128x1024xf32>
    %5 = arith.truncf %4 : vector<128x1024xf32> to vector<128x1024xbf16>
    %c0_4 = arith.constant 0 : index
    %c0_5 = arith.constant 0 : index
    %6 = vector.load %arg3[%c0_4, %c0_5] : memref<1024x512xbf16, #tpu.memory_space<vmem>>, vector<1024x512xbf16>
    %cst = arith.constant dense<0.000000e+00> : vector<128x512xf32>
    %7 = tpu.matmul %5, %6, %cst {dimension_numbers = #tpu.dot_dimension_numbers<[1], [0], [0], [1], [0, 0, 1, 1], [], []>} : vector<128x1024xbf16>, vector<1024x512xbf16>, vector<128x512xf32> -> vector<128x512xf32>
    %8 = arith.addf %3, %7 : vector<128x512xf32>
    %c0_6 = arith.constant 0 : index
    %c0_7 = arith.constant 0 : index
    %9 = vector.load %arg16[%c0_6, %c0_7] : memref<128x512xf32, #tpu.memory_space<vmem>>, vector<128x512xf32>
    tpu.vector_store %arg16[%c0_6, %c0_7], %8 {strides = array<i32>} : memref<128x512xf32, #tpu.memory_space<vmem>>, vector<128x512xf32>,
    %c0_i32_8 = arith.constant 0 : i32
    %10 = arith.cmpi eq, %arg1, %c0_i32_8 : i32
    %11 = arith.extui %10 : i1 to i32
    %c0_i32_9 = arith.constant 0 : i32
    %12 = arith.cmpi ne, %11, %c0_i32_9 : i32
    scf.if %12 {
      %c0_10 = arith.constant 0 : index
      %c0_11 = arith.constant 0 : index
      %13 = vector.load %arg16[%c0_10, %c0_11] : memref<128x512xf32, #tpu.memory_space<vmem>>, vector<128x512xf32>
      %c0_12 = arith.constant 0 : index
      %c0_13 = arith.constant 0 : index
      %14 = vector.load %arg4[%c0_12, %c0_13] : memref<1x512xf32, #tpu.memory_space<vmem>>, vector<1x512xf32>
      %15 = vector.broadcast %14 : vector<1x512xf32> to vector<128x512xf32>
      %16 = arith.addf %13, %15 : vector<128x512xf32>
      %cst_14 = arith.constant 5.000000e-01 : f32
      %17 = vector.broadcast %cst_14 : f32 to vector<128x512xf32>
      %18 = arith.mulf %17, %16 : vector<128x512xf32>
      %cst_15 = arith.constant 0.707106769 : f32
      %19 = vector.broadcast %cst_15 : f32 to vector<128x512xf32>
      %20 = arith.mulf %16, %19 : vector<128x512xf32>
      %21 = math.erf %20 : vector<128x512xf32>
      %cst_16 = arith.constant 1.000000e+00 : f32
      %22 = vector.broadcast %cst_16 : f32 to vector<128x512xf32>
      %23 = arith.addf %22, %21 : vector<128x512xf32>
      %24 = arith.mulf %18, %23 : vector<128x512xf32>
      %25 = arith.truncf %24 : vector<128x512xf32> to vector<128x512xbf16>
      %c0_17 = arith.constant 0 : index
      %c0_18 = arith.constant 0 : index
      %26 = vector.load %arg5[%c0_17, %c0_18] : memref<512x256xbf16, #tpu.memory_space<vmem>>, vector<512x256xbf16>
      %cst_19 = arith.constant dense<0.000000e+00> : vector<128x256xf32>
      %27 = tpu.matmul %25, %26, %cst_19 {dimension_numbers = #tpu.dot_dimension_numbers<[1], [0], [0], [1], [0, 0, 1, 1], [], []>} : vector<128x512xbf16>, vector<512x256xbf16>, vector<128x256xf32> -> vector<128x256xf32>
      %c0_20 = arith.constant 0 : index
      %c0_21 = arith.constant 0 : index
      %28 = vector.load %arg6[%c0_20, %c0_21] : memref<1x256xf32, #tpu.memory_space<vmem>>, vector<1x256xf32>
      %29 = vector.broadcast %28 : vector<1x256xf32> to vector<128x256xf32>
      %30 = arith.addf %27, %29 : vector<128x256xf32>
      %cst_22 = arith.constant 5.000000e-01 : f32
      %31 = vector.broadcast %cst_22 : f32 to vector<128x256xf32>
      %32 = arith.mulf %31, %30 : vector<128x256xf32>
      %cst_23 = arith.constant 0.707106769 : f32
      %33 = vector.broadcast %cst_23 : f32 to vector<128x256xf32>
      %34 = arith.mulf %30, %33 : vector<128x256xf32>
      %35 = math.erf %34 : vector<128x256xf32>
      %cst_24 = arith.constant 1.000000e+00 : f32
      %36 = vector.broadcast %cst_24 : f32 to vector<128x256xf32>
      %37 = arith.addf %36, %35 : vector<128x256xf32>
      %38 = arith.mulf %32, %37 : vector<128x256xf32>
      %39 = arith.truncf %38 : vector<128x256xf32> to vector<128x256xbf16>
      %c0_25 = arith.constant 0 : index
      %c0_26 = arith.constant 0 : index
      %40 = vector.load %arg7[%c0_25, %c0_26] : memref<256x128xbf16, #tpu.memory_space<vmem>>, vector<256x128xbf16>
      %cst_27 = arith.constant dense<0.000000e+00> : vector<128x128xf32>
      %41 = tpu.matmul %39, %40, %cst_27 {dimension_numbers = #tpu.dot_dimension_numbers<[1], [0], [0], [1], [0, 0, 1, 1], [], []>} : vector<128x256xbf16>, vector<256x128xbf16>, vector<128x128xf32> -> vector<128x128xf32>
      %c0_28 = arith.constant 0 : index
      %c0_29 = arith.constant 0 : index
      %42 = vector.load %arg8[%c0_28, %c0_29] : memref<1x128xf32, #tpu.memory_space<vmem>>, vector<1x128xf32>
      %43 = vector.broadcast %42 : vector<1x128xf32> to vector<128x128xf32>
      %44 = arith.addf %41, %43 : vector<128x128xf32>
      %cst_30 = arith.constant 5.000000e-01 : f32
      %45 = vector.broadcast %cst_30 : f32 to vector<128x128xf32>
      %46 = arith.mulf %45, %44 : vector<128x128xf32>
      %cst_31 = arith.constant 0.707106769 : f32
      %47 = vector.broadcast %cst_31 : f32 to vector<128x128xf32>
      %48 = arith.mulf %44, %47 : vector<128x128xf32>
      %49 = math.erf %48 : vector<128x128xf32>
      %cst_32 = arith.constant 1.000000e+00 : f32
      %50 = vector.broadcast %cst_32 : f32 to vector<128x128xf32>
      %51 = arith.addf %50, %49 : vector<128x128xf32>
      %52 = arith.mulf %46, %51 : vector<128x128xf32>
      %53 = arith.truncf %52 : vector<128x128xf32> to vector<128x128xbf16>
      %c0_33 = arith.constant 0 : index
      %c0_34 = arith.constant 0 : index
      %54 = vector.load %arg9[%c0_33, %c0_34] : memref<128x64xbf16, #tpu.memory_space<vmem>>, vector<128x64xbf16>
      %cst_35 = arith.constant dense<0.000000e+00> : vector<128x64xf32>
      %55 = tpu.matmul %53, %54, %cst_35 {dimension_numbers = #tpu.dot_dimension_numbers<[1], [0], [0], [1], [0, 0, 1, 1], [], []>} : vector<128x128xbf16>, vector<128x64xbf16>, vector<128x64xf32> -> vector<128x64xf32>
      %c0_36 = arith.constant 0 : index
      %c0_37 = arith.constant 0 : index
      %56 = vector.load %arg10[%c0_36, %c0_37] : memref<1x64xf32, #tpu.memory_space<vmem>>, vector<1x64xf32>
      %57 = vector.broadcast %56 : vector<1x64xf32> to vector<128x64xf32>
      %58 = arith.addf %55, %57 : vector<128x64xf32>
      %cst_38 = arith.constant 5.000000e-01 : f32
      %59 = vector.broadcast %cst_38 : f32 to vector<128x64xf32>
      %60 = arith.mulf %59, %58 : vector<128x64xf32>
      %cst_39 = arith.constant 0.707106769 : f32
      %61 = vector.broadcast %cst_39 : f32 to vector<128x64xf32>
      %62 = arith.mulf %58, %61 : vector<128x64xf32>
      %63 = math.erf %62 : vector<128x64xf32>
      %cst_40 = arith.constant 1.000000e+00 : f32
      %64 = vector.broadcast %cst_40 : f32 to vector<128x64xf32>
      %65 = arith.addf %64, %63 : vector<128x64xf32>
      %66 = arith.mulf %60, %65 : vector<128x64xf32>
      %67 = arith.truncf %66 : vector<128x64xf32> to vector<128x64xbf16>
      %c0_41 = arith.constant 0 : index
      %c0_42 = arith.constant 0 : index
      %68 = vector.load %arg11[%c0_41, %c0_42] : memref<64x32xbf16, #tpu.memory_space<vmem>>, vector<64x32xbf16>
      %cst_43 = arith.constant dense<0.000000e+00> : vector<128x32xf32>
      %69 = tpu.matmul %67, %68, %cst_43 {dimension_numbers = #tpu.dot_dimension_numbers<[1], [0], [0], [1], [0, 0, 1, 1], [], []>} : vector<128x64xbf16>, vector<64x32xbf16>, vector<128x32xf32> -> vector<128x32xf32>
      %c0_44 = arith.constant 0 : index
      %c0_45 = arith.constant 0 : index
      %70 = vector.load %arg12[%c0_44, %c0_45] : memref<1x32xf32, #tpu.memory_space<vmem>>, vector<1x32xf32>
      %71 = vector.broadcast %70 : vector<1x32xf32> to vector<128x32xf32>
      %72 = arith.addf %69, %71 : vector<128x32xf32>
      %cst_46 = arith.constant 5.000000e-01 : f32
      %73 = vector.broadcast %cst_46 : f32 to vector<128x32xf32>
      %74 = arith.mulf %73, %72 : vector<128x32xf32>
      %cst_47 = arith.constant 0.707106769 : f32
      %75 = vector.broadcast %cst_47 : f32 to vector<128x32xf32>
      %76 = arith.mulf %72, %75 : vector<128x32xf32>
      %77 = math.erf %76 : vector<128x32xf32>
      %cst_48 = arith.constant 1.000000e+00 : f32
      %78 = vector.broadcast %cst_48 : f32 to vector<128x32xf32>
      %79 = arith.addf %78, %77 : vector<128x32xf32>
      %80 = arith.mulf %74, %79 : vector<128x32xf32>
      %81 = arith.truncf %80 : vector<128x32xf32> to vector<128x32xbf16>
      %c0_49 = arith.constant 0 : index
      %c0_50 = arith.constant 0 : index
      %82 = vector.load %arg13[%c0_49, %c0_50] : memref<32x1xbf16, #tpu.memory_space<vmem>>, vector<32x1xbf16>
      %cst_51 = arith.constant dense<0.000000e+00> : vector<128x1xf32>
      %83 = tpu.matmul %81, %82, %cst_51 {dimension_numbers = #tpu.dot_dimension_numbers<[1], [0], [0], [1], [0, 0, 1, 1], [], []>} : vector<128x32xbf16>, vector<32x1xbf16>, vector<128x1xf32> -> vector<128x1xf32>
      %c0_52 = arith.constant 0 : index
      %c0_53 = arith.constant 0 : index
      %84 = vector.load %arg14[%c0_52, %c0_53] : memref<1x1xf32, #tpu.memory_space<vmem>>, vector<1x1xf32>
      %85 = vector.broadcast %84 : vector<1x1xf32> to vector<128x1xf32>
      %86 = arith.addf %83, %85 : vector<128x1xf32>
      %87 = arith.negf %86 : vector<128x1xf32>
      %88 = math.exp %87 : vector<128x1xf32>
      %cst_54 = arith.constant 1.000000e+00 : f32
      %89 = vector.broadcast %cst_54 : f32 to vector<128x1xf32>
      %90 = arith.addf %89, %88 : vector<128x1xf32>
      %91 = arith.divf %89, %90 : vector<128x1xf32>
      %c0_55 = arith.constant 0 : index
      %c0_56 = arith.constant 0 : index
      %92 = vector.load %arg15[%c0_55, %c0_56] : memref<128x1xf32, #tpu.memory_space<vmem>>, vector<128x1xf32>
      tpu.vector_store %arg15[%c0_55, %c0_56], %91 {strides = array<i32>} : memref<128x1xf32, #tpu.memory_space<vmem>>, vector<128x1xf32>,
    } else {
    }
    return
  }
  func.func @transform_0(%arg0: i32, %arg1: i32) -> (i32, i32) {
    %c0_i32 = arith.constant 0 : i32
    return %arg0, %arg1 : i32, i32
  }
  func.func @transform_1(%arg0: i32, %arg1: i32) -> (i32, i32) {
    %c0_i32 = arith.constant 0 : i32
    %c0_i32_0 = arith.constant 0 : i32
    return %arg1, %c0_i32 : i32, i32
  }
  func.func @transform_2(%arg0: i32, %arg1: i32) -> (i32, i32) {
    %c0_i32 = arith.constant 0 : i32
    %c0_i32_0 = arith.constant 0 : i32
    %c0_i32_1 = arith.constant 0 : i32
    return %c0_i32, %c0_i32_0 : i32, i32
  }
  func.func @transform_3(%arg0: i32, %arg1: i32) -> (i32, i32) {
    %c0_i32 = arith.constant 0 : i32
    %c0_i32_0 = arith.constant 0 : i32
    %c0_i32_1 = arith.constant 0 : i32
    return %c0_i32, %c0_i32_0 : i32, i32
  }
  func.func @transform_4(%arg0: i32, %arg1: i32) -> (i32, i32) {
    %c0_i32 = arith.constant 0 : i32
    %c0_i32_0 = arith.constant 0 : i32
    %c0_i32_1 = arith.constant 0 : i32
    return %c0_i32, %c0_i32_0 : i32, i32
  }
  func.func @transform_5(%arg0: i32, %arg1: i32) -> (i32, i32) {
    %c0_i32 = arith.constant 0 : i32
    %c0_i32_0 = arith.constant 0 : i32
    %c0_i32_1 = arith.constant 0 : i32
    return %c0_i32, %c0_i32_0 : i32, i32
  }
  func.func @transform_6(%arg0: i32, %arg1: i32) -> (i32, i32) {
    %c0_i32 = arith.constant 0 : i32
    %c0_i32_0 = arith.constant 0 : i32
    %c0_i32_1 = arith.constant 0 : i32
    return %c0_i32, %c0_i32_0 : i32, i32
  }
  func.func @transform_7(%arg0: i32, %arg1: i32) -> (i32, i32) {
    %c0_i32 = arith.constant 0 : i32
    %c0_i32_0 = arith.constant 0 : i32
    %c0_i32_1 = arith.constant 0 : i32
    return %c0_i32, %c0_i32_0 : i32, i32
  }
  func.func @transform_8(%arg0: i32, %arg1: i32) -> (i32, i32) {
    %c0_i32 = arith.constant 0 : i32
    %c0_i32_0 = arith.constant 0 : i32
    %c0_i32_1 = arith.constant 0 : i32
    return %c0_i32, %c0_i32_0 : i32, i32
  }
  func.func @transform_9(%arg0: i32, %arg1: i32) -> (i32, i32) {
    %c0_i32 = arith.constant 0 : i32
    %c0_i32_0 = arith.constant 0 : i32
    %c0_i32_1 = arith.constant 0 : i32
    return %c0_i32, %c0_i32_0 : i32, i32
  }
  func.func @transform_10(%arg0: i32, %arg1: i32) -> (i32, i32) {
    %c0_i32 = arith.constant 0 : i32
    %c0_i32_0 = arith.constant 0 : i32
    %c0_i32_1 = arith.constant 0 : i32
    return %c0_i32, %c0_i32_0 : i32, i32
  }
  func.func @transform_11(%arg0: i32, %arg1: i32) -> (i32, i32) {
    %c0_i32 = arith.constant 0 : i32
    %c0_i32_0 = arith.constant 0 : i32
    %c0_i32_1 = arith.constant 0 : i32
    return %c0_i32, %c0_i32_0 : i32, i32
  }
  func.func @transform_12(%arg0: i32, %arg1: i32) -> (i32, i32) {
    %c0_i32 = arith.constant 0 : i32
    %c0_i32_0 = arith.constant 0 : i32
    %c0_i32_1 = arith.constant 0 : i32
    return %c0_i32, %c0_i32_0 : i32, i32
  }
  func.func @transform_13(%arg0: i32, %arg1: i32) -> (i32, i32) {
    %c0_i32 = arith.constant 0 : i32
    %c0_i32_0 = arith.constant 0 : i32
    return %arg0, %c0_i32 : i32, i32
  }
}

</mosaic_0001>

<bundles_post_ra>
// kernel: tpu_custom_call.1
= control target key start
LH: loop header
LB: loop body
LE: loop exit
PB: predicated region body
PF: predicated region fallthrough
CT: control target
= control target key end

     0   :  { %s8196_s0 = inlined_call_operand.hbm [shape: f32[128,1024], index: 0, kind: input, shape index: {}]   ;;  %s8197_s1 = inlined_call_operand.hbm [shape: bf16[1024,512], index: 1, kind: input, shape index: {}]   ;;  %s8198_s2 = inlined_call_operand.vmem [shape: f32[1,512], index: 2, kind: input, shape index: {}]   ;;  %s8199_s3 = inlined_call_operand.hbm [shape: bf16[512,256], index: 3, kind: input, shape index: {}]   ;;  %s8200_s4 = inlined_call_operand.vmem [shape: f32[1,256], index: 4, kind: input, shape index: {}]   ;;  %s8201_s5 = inlined_call_operand.vmem [shape: bf16[256,128], index: 5, kind: input, shape index: {}]   ;;  %s8202_s6 = inlined_call_operand.vmem [shape: f32[1,128], index: 6, kind: input, shape index: {}]   ;;  %s8203_s7 = inlined_call_operand.vmem [shape: bf16[128,64], index: 7, kind: input, shape index: {}]   ;;  %s8204_s8 = inlined_call_operand.vmem [shape: f32[1,64], index: 8, kind: input, shape index: {}]   ;;  %s8205_s9 = inlined_call_operand.vmem [shape: bf16[64,32], index: 9, kind: input, shape index: {}]   ;;  %s8206_s10 = inlined_call_operand.vmem [shape: f32[1,32], index: 10, kind: input, shape index: {}]   ;;  %s8207_s11 = inlined_call_operand.vmem [shape: bf16[32,1], index: 11, kind: input, shape index: {}]   ;;  %s8208_s12 = inlined_call_operand.<no memory space> [shape: f32[1,1], index: 12, kind: input, shape index: {}]   ;;  %s8209_s13 = inlined_call_operand.vmem [shape: f32[128,1], index: 13, kind: output, shape index: {}]  }
   0x1   :  { %v18_v0 = vstv %s8208_s12 }
   0x2   :  { %19 = vst [vmem:[#allocation3] sm:$0x1] %v18_v0 }
   0x3   :  { %20 = vsyncpa [#allocation5], 0 }
   0x4   :  { %21 = vsyncpa [#allocation7], 0  ;;  %s7137_s27 = smov [#allocation6]   ;;  %s7067_s14 = scalar_lea.hbm %s8197_s1, 32768 }
   0x5   :  { %s39_s28 = sshll.u32 %s7137_s27, 4  ;;  %p7068_p0 = scmp.ne.s32.totalorder %s8197_s1, %s7067_s14  ;;  %s40_s28 = int_to_ptr.vmem [resolvable:$true] %s39_s28 }
   0x6   :  { %p7071_p1 = scmp.lt.u32.totalorder %s7067_s14, %s8197_s1 }
   0x8   :  { %p7073_p2 = pnand %p7071_p1, %p7068_p0 }
   0xa   :  { %7076 = shalt.err (!%p7073_p2)
}
   0xb   :  { %s7077_s12 = scalar_lea.vmem %s40_s28, 32768  ;;  %p7082_p4 = scmp.lt.s32.totalorder %s40_s28, %s40_s28 }
   0xc   :  { %p7078_p3 = scmp.ne.s32.totalorder %s40_s28, %s7077_s12  ;;  %p7083_p5 = scmp.lt.s32.totalorder %s7077_s12, %s7077_s12 }
   0xe   :  { %p7084_p6 = por %p7083_p5, %p7082_p4 }
  0x10   :  { %p7085_p7 = pnand %p7084_p6, %p7078_p3 }
  0x12   :  { %7088 = shalt.err (!%p7085_p7)
}
  0x13   :  { %s7138_s19 = smov 256   ;;  %s7139_s20 = smov 16  }
  0x14   :  { %45 = dma.hbm_to_vmem [thread:$0]  %s8197_s1, 32768, %s40_s28, [#allocation7], %s7138_s19, %s7138_s19, %s7139_s20  }
  0x15   :  { %s7140_s23 = smov [#allocation4]   ;;  %s7089_s27 = scalar_lea.hbm %s8196_s0, 16384 }
  0x16   :  { %s27_s24 = sshll.u32 %s7140_s23, 4  ;;  %p7090_p8 = scmp.ne.s32.totalorder %s8196_s0, %s7089_s27  ;;  %s28_s24 = int_to_ptr.vmem [resolvable:$true] %s27_s24 }
  0x17   :  { %p7093_p9 = scmp.lt.u32.totalorder %s7089_s27, %s8196_s0 }
  0x19   :  { %p7095_p10 = pnand %p7093_p9, %p7090_p8 }
  0x1b   :  { %7098 = shalt.err (!%p7095_p10)
}
  0x1c   :  { %s7099_s16 = scalar_lea.vmem %s28_s24, 16384  ;;  %p7104_p12 = scmp.lt.s32.totalorder %s28_s24, %s28_s24 }
  0x1d   :  { %p7100_p11 = scmp.ne.s32.totalorder %s28_s24, %s7099_s16  ;;  %p7105_p13 = scmp.lt.s32.totalorder %s7099_s16, %s7099_s16 }
  0x1f   :  { %p7106_p0 = por %p7105_p13, %p7104_p12 }
  0x21   :  { %p7107_p1 = pnand %p7106_p0, %p7100_p11 }
  0x23   :  { %7110 = shalt.err (!%p7107_p1)
}
  0x24   :  { %s7141_s1 = smov 1024   ;;  %s7142_s28 = smov 64  }
  0x25   :  { %33 = dma.hbm_to_vmem [thread:$0]  %s8196_s0, 16384, %s28_s24, [#allocation5], %s7141_s1, %s7141_s1, %s7142_s28  }
  0x26   :  { %s7143_s12 = smov [#allocation8]   ;;  %s7111_s22 = scalar_lea.hbm %s8199_s3, 8192 }
  0x27   :  { %s53_s19 = sshll.u32 %s7143_s12, 4  ;;  %p7112_p2 = scmp.ne.s32.totalorder %s8199_s3, %s7111_s22  ;;  %s54_s19 = int_to_ptr.vmem [resolvable:$true] %s53_s19 }
  0x28   :  { %p7115_p3 = scmp.lt.u32.totalorder %s7111_s22, %s8199_s3 }
  0x2a   :  { %p7117_p4 = pnand %p7115_p3, %p7112_p2 }
  0x2c   :  { %7120 = shalt.err (!%p7117_p4)
}
  0x2d   :  { %s7121_s29 = scalar_lea.vmem %s54_s19, 8192  ;;  %p7126_p6 = scmp.lt.s32.totalorder %s54_s19, %s54_s19 }
  0x2e   :  { %p7122_p5 = scmp.ne.s32.totalorder %s54_s19, %s7121_s29  ;;  %p7127_p7 = scmp.lt.s32.totalorder %s7121_s29, %s7121_s29 }
  0x30   :  { %p7128_p8 = por %p7127_p7, %p7126_p6 }
  0x32   :  { %p7129_p9 = pnand %p7128_p8, %p7122_p5 }
  0x34   :  { %7132 = shalt.err (!%p7129_p9)
}
  0x35   :  { %s7144_s0 = smov 128   ;;  %s7145_s24 = smov 8  }
  0x36   :  { %59 = dma.hbm_to_vmem [thread:$0]  %s8199_s3, 8192, %s54_s19, [#allocation7], %s7144_s0, %s7144_s0, %s7145_s24  }
  0x37   :  { %7133 = dma.done.wait [#allocation5], 16384  }
  0x38   :  { %7134 = vsyncadd [#allocation5], 4294950912 }
  0x39   :  { %7135 = dma.done.wait [#allocation7], 40960  }
  0x3a   :  { %7136 = vsyncadd [#allocation7], 4294926336  ;;  %v6205_v1 = vld [vmem:[#allocation6 + $0x4] ss:$16 sps:$4 sm:$0xff]   ;;  %v6207_v2 = vld [vmem:[#allocation6 + $0xc] ss:$16 sps:$4 sm:$0xff]  }
  0x3b   :  { %1948 = vmatprep.subr.bf16.mxu0 %v6205_v1  ;;  %v6209_v3 = vld [vmem:[#allocation6] ss:$16 sps:$4 sm:$0xff]   ;;  %v6210_v4 = vld [vmem:[#allocation6 + $0x8] ss:$16 sps:$4 sm:$0xff]   ;;  %2400 = vmatprep.subr.bf16.mxu1 %v6207_v2  ;;  %v6211_v5 = vld [vmem:[#allocation6 + $0x24] ss:$16 sps:$4 sm:$0xff]  }
  0x3c   :  { %1949 = vmatpush1.bf16.msra.mxu0 %v6209_v3  ;;  %2401 = vmatpush1.bf16.msra.mxu1 %v6210_v4  ;;  %v6213_v6 = vld [vmem:[#allocation6 + $0x2c] ss:$16 sps:$4 sm:$0xff]   ;;  %v6215_v7 = vld [vmem:[#allocation6 + $0x20] ss:$16 sps:$4 sm:$0xff]   ;;  %v6216_v8 = vld [vmem:[#allocation6 + $0x28] ss:$16 sps:$4 sm:$0xff]  }
  0x3d   :  { %1950 = vmatprep.subr.bf16.mxu0 %v6211_v5  ;;  %2402 = vmatprep.subr.bf16.mxu1 %v6213_v6  ;;  %v6217_v9 = vld [vmem:[#allocation6 + $0x44] ss:$16 sps:$4 sm:$0xff]   ;;  %v6219_v10 = vld [vmem:[#allocation6 + $0x4c] ss:$16 sps:$4 sm:$0xff]   ;;  %v6221_v11 = vld [vmem:[#allocation6 + $0x40] ss:$16 sps:$4 sm:$0xff]  }
  0x3e   :  { %v6222_v12 = vld [vmem:[#allocation6 + $0x48] ss:$16 sps:$4 sm:$0xff]   ;;  %v6223_v13 = vld [vmem:[#allocation6 + $0x64] ss:$16 sps:$4 sm:$0xff]   ;;  %v6225_v14 = vld [vmem:[#allocation6 + $0x6c] ss:$16 sps:$4 sm:$0xff]  }
  0x3f   :  { %v6227_v15 = vld [vmem:[#allocation6 + $0x60] ss:$16 sps:$4 sm:$0xff]   ;;  %v6228_v16 = vld [vmem:[#allocation6 + $0x68] ss:$16 sps:$4 sm:$0xff]   ;;  %v6229_v17 = vld [vmem:[#allocation6 + $0x84] ss:$16 sps:$4 sm:$0xff]  }
  0x40   :  { %1951 = vmatpush1.bf16.msra.mxu0 %v6215_v7  ;;  %2403 = vmatpush1.bf16.msra.mxu1 %v6216_v8  ;;  %v6231_v18 = vld [vmem:[#allocation6 + $0x8c] ss:$16 sps:$4 sm:$0xff]   ;;  %v6233_v19 = vld [vmem:[#allocation6 + $0x80] ss:$16 sps:$4 sm:$0xff]   ;;  %v6234_v20 = vld [vmem:[#allocation6 + $0x88] ss:$16 sps:$4 sm:$0xff]  }
  0x41   :  { %1952 = vmatprep.subr.bf16.mxu0 %v6217_v9  ;;  %2404 = vmatprep.subr.bf16.mxu1 %v6219_v10  ;;  %v6235_v21 = vld [vmem:[#allocation6 + $0xa4] ss:$16 sps:$4 sm:$0xff]   ;;  %v6237_v22 = vld [vmem:[#allocation6 + $0xac] ss:$16 sps:$4 sm:$0xff]   ;;  %v6239_v23 = vld [vmem:[#allocation6 + $0xa0] ss:$16 sps:$4 sm:$0xff]  }
  0x42   :  { %v6240_v24 = vld [vmem:[#allocation6 + $0xa8] ss:$16 sps:$4 sm:$0xff]   ;;  %v6241_v25 = vld [vmem:[#allocation6 + $0xc4] ss:$16 sps:$4 sm:$0xff]   ;;  %v6243_v26 = vld [vmem:[#allocation6 + $0xcc] ss:$16 sps:$4 sm:$0xff]  }
  0x43   :  { %v6245_v27 = vld [vmem:[#allocation6 + $0xc0] ss:$16 sps:$4 sm:$0xff]   ;;  %v6246_v28 = vld [vmem:[#allocation6 + $0xc8] ss:$16 sps:$4 sm:$0xff]   ;;  %v6247_v29 = vld [vmem:[#allocation6 + $0xe4] ss:$16 sps:$4 sm:$0xff]  }
  0x44   :  { %1953 = vmatpush1.bf16.msra.mxu0 %v6221_v11  ;;  %2405 = vmatpush1.bf16.msra.mxu1 %v6222_v12  ;;  %v6249_v30 = vld [vmem:[#allocation6 + $0xec] ss:$16 sps:$4 sm:$0xff]   ;;  %v6251_v31 = vld [vmem:[#allocation6 + $0xe0] ss:$16 sps:$4 sm:$0xff]   ;;  %v6252_v32 = vld [vmem:[#allocation6 + $0xe8] ss:$16 sps:$4 sm:$0xff]  }
  0x45   :  { %1954 = vmatprep.subr.bf16.mxu0 %v6223_v13  ;;  %2406 = vmatprep.subr.bf16.mxu1 %v6225_v14  ;;  %v6253_v33 = vld [vmem:[#allocation6 + $0x104] ss:$16 sps:$4 sm:$0xff]   ;;  %v6255_v34 = vld [vmem:[#allocation6 + $0x10c] ss:$16 sps:$4 sm:$0xff]   ;;  %v6257_v35 = vld [vmem:[#allocation6 + $0x100] ss:$16 sps:$4 sm:$0xff]  }
  0x46   :  { %v6258_v36 = vld [vmem:[#allocation6 + $0x108] ss:$16 sps:$4 sm:$0xff]   ;;  %v6259_v37 = vld [vmem:[#allocation6 + $0x124] ss:$16 sps:$4 sm:$0xff]   ;;  %v6261_v38 = vld [vmem:[#allocation6 + $0x12c] ss:$16 sps:$4 sm:$0xff]  }
  0x47   :  { %v6263_v39 = vld [vmem:[#allocation6 + $0x120] ss:$16 sps:$4 sm:$0xff]   ;;  %v6264_v40 = vld [vmem:[#allocation6 + $0x128] ss:$16 sps:$4 sm:$0xff]   ;;  %v6265_v41 = vld [vmem:[#allocation6 + $0x144] ss:$16 sps:$4 sm:$0xff]  }
  0x48   :  { %1955 = vmatpush1.bf16.msra.mxu0 %v6227_v15  ;;  %2407 = vmatpush1.bf16.msra.mxu1 %v6228_v16  ;;  %v6267_v42 = vld [vmem:[#allocation6 + $0x14c] ss:$16 sps:$4 sm:$0xff]   ;;  %v6269_v43 = vld [vmem:[#allocation6 + $0x140] ss:$16 sps:$4 sm:$0xff]   ;;  %v6270_v44 = vld [vmem:[#allocation6 + $0x148] ss:$16 sps:$4 sm:$0xff]  }
  0x49   :  { %1956 = vmatprep.subr.bf16.mxu0 %v6229_v17  ;;  %2408 = vmatprep.subr.bf16.mxu1 %v6231_v18  ;;  %v6271_v45 = vld [vmem:[#allocation6 + $0x164] ss:$16 sps:$4 sm:$0xff]   ;;  %v6273_v46 = vld [vmem:[#allocation6 + $0x16c] ss:$16 sps:$4 sm:$0xff]   ;;  %v6275_v48 = vld [vmem:[#allocation6 + $0x160] ss:$16 sps:$4 sm:$0xff]  }
  0x4a   :  { %v221_v47 = vld [vmem:[#allocation4 + $0x8] sm:$0xff]  ;;  %v6277_v51 = vld [vmem:[#allocation6 + $0x184] ss:$16 sps:$4 sm:$0xff]   ;;  %v6281_v54 = vld [vmem:[#allocation6 + $0x180] ss:$16 sps:$4 sm:$0xff]   ;;  %vm4898_vm0 = vcmask 523264  }
  0x4b   :  { %v6276_v49 = vld [vmem:[#allocation6 + $0x168] ss:$16 sps:$4 sm:$0xff]   ;;  %v6279_v53 = vld [vmem:[#allocation6 + $0x18c] ss:$16 sps:$4 sm:$0xff]   ;;  %v6283_v56 = vld [vmem:[#allocation6 + $0x1a4] ss:$16 sps:$4 sm:$0xff]  }
  0x4c   :  { %1957 = vmatpush1.bf16.msra.mxu0 %v6233_v19  ;;  %2409 = vmatpush1.bf16.msra.mxu1 %v6234_v20  ;;  %v229_v50 = vld [vmem:[#allocation4 + $0x48] sm:$0xff]  ;;  %v6287_v58 = vld [vmem:[#allocation6 + $0x1a0] ss:$16 sps:$4 sm:$0xff]   ;;  %v6289_v60 = vld [vmem:[#allocation6 + $0x1c4] ss:$16 sps:$4 sm:$0xff]   ;;  %vm5131_vm1 = vcmask 261120  }
  0x4d   :  { %1958 = vmatprep.subr.bf16.mxu0 %v6235_v21  ;;  %2410 = vmatprep.subr.bf16.mxu1 %v6237_v22  ;;  %v349_v52 = vpack.c.bf16 %v229_v50, %v221_v47  ;;  %v6282_v55 = vld [vmem:[#allocation6 + $0x188] ss:$16 sps:$4 sm:$0xff]   ;;  %v6285_v57 = vld [vmem:[#allocation6 + $0x1ac] ss:$16 sps:$4 sm:$0xff]   ;;  %v6293_v62 = vld [vmem:[#allocation6 + $0x1c0] ss:$16 sps:$4 sm:$0xff]  }
  0x4e   :  { %v6288_v59 = vld [vmem:[#allocation6 + $0x1a8] ss:$16 sps:$4 sm:$0xff]   ;;  %v6291_v61 = vld [vmem:[#allocation6 + $0x1cc] ss:$16 sps:$4 sm:$0xff]   ;;  %v6295_v0 = vld [vmem:[#allocation6 + $0x1e4] ss:$16 sps:$4 sm:$0xff]  }
  0x4f   :  { %1980 = vmatprep.mubr.bf16.mxu0 %v349_v52  ;;  %2432 = vmatprep.mubr.bf16.mxu1 %v349_v52  ;;  %v6294_v63 = vld [vmem:[#allocation6 + $0x1c8] ss:$16 sps:$4 sm:$0xff]   ;;  %v6297_v1 = vld [vmem:[#allocation6 + $0x1ec] ss:$16 sps:$4 sm:$0xff]   ;;  %v6299_v2 = vld [vmem:[#allocation6 + $0x1e0] ss:$16 sps:$4 sm:$0xff]  }
  0x50   :  { %1959 = vmatpush1.bf16.msra.mxu0 %v6239_v23  ;;  %2411 = vmatpush1.bf16.msra.mxu1 %v6240_v24  ;;  %v6300_v3 = vld [vmem:[#allocation6 + $0x1e8] ss:$16 sps:$4 sm:$0xff]   ;;  %v220_v4 = vld [vmem:[#allocation4] sm:$0xff]  ;;  %v6306_v7 = vld [vmem:[#allocation6 + $0x20c] ss:$16 sps:$4 sm:$0xff]   ;;  %vm5349_vm2 = vcmask 7168  }
  0x51   :  { %1960 = vmatprep.subr.bf16.mxu0 %v6241_v25  ;;  %2412 = vmatprep.subr.bf16.mxu1 %v6243_v26  ;;  %v228_v5 = vld [vmem:[#allocation4 + $0x40] sm:$0xff]  ;;  %v6304_v10 = vld [vmem:[#allocation6 + $0x208] ss:$16 sps:$4 sm:$0xff]   ;;  %v6312_v14 = vld [vmem:[#allocation6 + $0x22c] ss:$16 sps:$4 sm:$0xff]  }
  0x52   :  { %v6303_v6 = vld [vmem:[#allocation6 + $0x204] ss:$16 sps:$4 sm:$0xff]   ;;  %v6301_v8 = vld [vmem:[#allocation6 + $0x200] ss:$16 sps:$4 sm:$0xff]   ;;  %v348_v9 = vpack.c.bf16 %v228_v5, %v220_v4  ;;  %v237_v11 = vld [vmem:[#allocation4 + $0x88] sm:$0xff] }
  0x53   :  { %v245_v12 = vld [vmem:[#allocation4 + $0xc8] sm:$0xff]  ;;  %v6309_v13 = vld [vmem:[#allocation6 + $0x224] ss:$16 sps:$4 sm:$0xff]   ;;  %v6307_v15 = vld [vmem:[#allocation6 + $0x220] ss:$16 sps:$4 sm:$0xff]  }
  0x54   :  { %1961 = vmatpush1.bf16.msra.mxu0 %v6245_v27  ;;  %2413 = vmatpush1.bf16.msra.mxu1 %v6246_v28  ;;  %v357_v16 = vpack.c.bf16 %v245_v12, %v237_v11  ;;  %v6310_v17 = vld [vmem:[#allocation6 + $0x228] ss:$16 sps:$4 sm:$0xff]   ;;  %v236_v18 = vld [vmem:[#allocation4 + $0x80] sm:$0xff]  ;;  %v6318_v21 = vld [vmem:[#allocation6 + $0x24c] ss:$16 sps:$4 sm:$0xff]  }
  0x55   :  { %1962 = vmatprep.subr.bf16.mxu0 %v6247_v29  ;;  %2414 = vmatprep.subr.bf16.mxu1 %v6249_v30  ;;  %v244_v19 = vld [vmem:[#allocation4 + $0xc0] sm:$0xff]  ;;  %v6316_v23 = vld [vmem:[#allocation6 + $0x248] ss:$16 sps:$4 sm:$0xff]   ;;  %v6324_v28 = vld [vmem:[#allocation6 + $0x26c] ss:$16 sps:$4 sm:$0xff]  }
  0x56   :  { %v6315_v20 = vld [vmem:[#allocation6 + $0x244] ss:$16 sps:$4 sm:$0xff]   ;;  %v6313_v22 = vld [vmem:[#allocation6 + $0x240] ss:$16 sps:$4 sm:$0xff]   ;;  %v356_v24 = vpack.c.bf16 %v244_v19, %v236_v18  ;;  %v253_v25 = vld [vmem:[#allocation4 + $0x108] sm:$0xff] }
  0x57   :  { %v261_v26 = vld [vmem:[#allocation4 + $0x148] sm:$0xff]  ;;  %v6321_v27 = vld [vmem:[#allocation6 + $0x264] ss:$16 sps:$4 sm:$0xff]   ;;  %v6319_v30 = vld [vmem:[#allocation6 + $0x260] ss:$16 sps:$4 sm:$0xff]  }
  0x58   :  { %1963 = vmatpush1.bf16.msra.mxu0 %v6251_v31  ;;  %2415 = vmatpush1.bf16.msra.mxu1 %v6252_v32  ;;  %v365_v29 = vpack.c.bf16 %v261_v26, %v253_v25  ;;  %v6322_v31 = vld [vmem:[#allocation6 + $0x268] ss:$16 sps:$4 sm:$0xff]   ;;  %v252_v32 = vld [vmem:[#allocation4 + $0x100] sm:$0xff] }
  0x59   :  { %1964 = vmatprep.subr.bf16.mxu0 %v6253_v33  ;;  %2416 = vmatprep.subr.bf16.mxu1 %v6255_v34  ;;  %v260_v33 = vld [vmem:[#allocation4 + $0x140] sm:$0xff]  ;;  %v285_v52 = vld [vmem:[#allocation4 + $0x208] sm:$0xff] }
  0x5a   :  { %v6327_v34 = vld [vmem:[#allocation6 + $0x284] ss:$16 sps:$4 sm:$0xff]   ;;  %v6337_v50 = vld [vmem:[#allocation6 + $0x2c0] ss:$16 sps:$4 sm:$0xff]   ;;  %v6352_v4 = vld [vmem:[#allocation6 + $0x308] ss:$16 sps:$4 sm:$0xff]  }
  0x5b   :  { %v276_v47 = vld [vmem:[#allocation4 + $0x1c0] sm:$0xff]  ;;  %v325_v18 = vld [vmem:[#allocation4 + $0x348] sm:$0xff] }
  0x5c   :  { %1965 = vmatpush1.bf16.msra.mxu0 %v6257_v35  ;;  %2417 = vmatpush1.bf16.msra.mxu1 %v6258_v36  ;;  %v6330_v35 = vld [vmem:[#allocation6 + $0x28c] ss:$16 sps:$4 sm:$0xff]   ;;  %v6325_v36 = vld [vmem:[#allocation6 + $0x280] ss:$16 sps:$4 sm:$0xff]   ;;  %v6357_v5 = vld [vmem:[#allocation6 + $0x324] ss:$16 sps:$4 sm:$0xff]  }
  0x5d   :  { %1966 = vmatprep.subr.bf16.mxu0 %v6259_v37  ;;  %2418 = vmatprep.subr.bf16.mxu1 %v6261_v38  ;;  %v6328_v37 = vld [vmem:[#allocation6 + $0x288] ss:$16 sps:$4 sm:$0xff]   ;;  %v364_v38 = vpack.c.bf16 %v260_v33, %v252_v32  ;;  %v308_v11 = vld [vmem:[#allocation4 + $0x2c0] sm:$0xff] }
  0x5e   :  { %v6363_v12 = vld [vmem:[#allocation6 + $0x344] ss:$16 sps:$4 sm:$0xff]   ;;  %v341_v32 = vld [vmem:[#allocation4 + $0x3c8] sm:$0xff] }
  0x5f   :  { %v6369_v19 = vld [vmem:[#allocation6 + $0x364] ss:$16 sps:$4 sm:$0xff]  }
  0x60   :  { %1967 = vmatpush1.bf16.msra.mxu0 %v6263_v39  ;;  %2419 = vmatpush1.bf16.msra.mxu1 %v6264_v40  ;;  %v269_v39 = vld [vmem:[#allocation4 + $0x188] sm:$0xff]  ;;  %v324_v25 = vld [vmem:[#allocation4 + $0x340] sm:$0xff] }
  0x61   :  { %1968 = vmatprep.subr.bf16.mxu0 %v6265_v41  ;;  %2420 = vmatprep.subr.bf16.mxu1 %v6267_v42  ;;  %v277_v40 = vld [vmem:[#allocation4 + $0x1c8] sm:$0xff]  ;;  %v6333_v41 = vld [vmem:[#allocation6 + $0x2a4] ss:$16 sps:$4 sm:$0xff]  }
  0x62   :  { %v6336_v42 = vld [vmem:[#allocation6 + $0x2ac] ss:$16 sps:$4 sm:$0xff]   ;;  %v6375_v26 = vld [vmem:[#allocation6 + $0x384] ss:$16 sps:$4 sm:$0xff]  }
  0x63   :  { %v6381_v33 = vld [vmem:[#allocation6 + $0x3a4] ss:$16 sps:$4 sm:$0xff]  }
  0x64   :  { %1969 = vmatpush1.bf16.msra.mxu0 %v6269_v43  ;;  %2421 = vmatpush1.bf16.msra.mxu1 %v6270_v44  ;;  %v6331_v43 = vld [vmem:[#allocation6 + $0x2a0] ss:$16 sps:$4 sm:$0xff]   ;;  %v373_v44 = vpack.c.bf16 %v277_v40, %v269_v39  ;;  %v6387_v40 = vld [vmem:[#allocation6 + $0x3c4] ss:$16 sps:$4 sm:$0xff]  }
  0x65   :  { %1970 = vmatprep.subr.bf16.mxu0 %v6271_v45  ;;  %2422 = vmatprep.subr.bf16.mxu1 %v6273_v46  ;;  %v6334_v45 = vld [vmem:[#allocation6 + $0x2a8] ss:$16 sps:$4 sm:$0xff]   ;;  %v268_v46 = vld [vmem:[#allocation4 + $0x180] sm:$0xff] }
  0x66   :  { %v340_v39 = vld [vmem:[#allocation4 + $0x3c0] sm:$0xff] }
  0x68   :  { %1971 = vmatpush1.bf16.msra.mxu0 %v6275_v48  ;;  %2423 = vmatpush1.bf16.msra.mxu1 %v6276_v49  ;;  %v6339_v48 = vld [vmem:[#allocation6 + $0x2c4] ss:$16 sps:$4 sm:$0xff]   ;;  %v6342_v49 = vld [vmem:[#allocation6 + $0x2cc] ss:$16 sps:$4 sm:$0xff]  }
  0x69   :  { %1972 = vmatprep.subr.bf16.mxu0 %v6277_v51  ;;  %2424 = vmatprep.subr.bf16.mxu1 %v6279_v53  ;;  %v372_v51 = vpack.c.bf16 %v276_v47, %v268_v46  ;;  %v293_v53 = vld [vmem:[#allocation4 + $0x248] sm:$0xff]  ;;  %v231_v46 = vld [vmem:[#allocation4 + $0x58] sm:$0xff]  ;;  %v6393_v47 = vld [vmem:[#allocation6 + $0x3e4] ss:$16 sps:$4 sm:$0xff]  }
  0x6c   :  { %1973 = vmatpush1.bf16.msra.mxu0 %v6281_v54  ;;  %2425 = vmatpush1.bf16.msra.mxu1 %v6282_v55  ;;  %v6340_v54 = vld [vmem:[#allocation6 + $0x2c8] ss:$16 sps:$4 sm:$0xff]   ;;  %v6345_v55 = vld [vmem:[#allocation6 + $0x2e4] ss:$16 sps:$4 sm:$0xff]  }
  0x6d   :  { %1974 = vmatprep.subr.bf16.mxu0 %v6283_v56  ;;  %2426 = vmatprep.subr.bf16.mxu1 %v6285_v57  ;;  %v6348_v56 = vld [vmem:[#allocation6 + $0x2ec] ss:$16 sps:$4 sm:$0xff]   ;;  %v6343_v57 = vld [vmem:[#allocation6 + $0x2e0] ss:$16 sps:$4 sm:$0xff]  }
  0x70   :  { %1975 = vmatpush1.bf16.msra.mxu0 %v6287_v58  ;;  %2427 = vmatpush1.bf16.msra.mxu1 %v6288_v59  ;;  %v6346_v58 = vld [vmem:[#allocation6 + $0x2e8] ss:$16 sps:$4 sm:$0xff]   ;;  %v381_v59 = vpack.c.bf16 %v293_v53, %v285_v52  ;;  %v222_v52 = vld [vmem:[#allocation4 + $0x10] sm:$0xff] }
  0x71   :  { %1976 = vmatprep.subr.bf16.mxu0 %v6289_v60  ;;  %2428 = vmatprep.subr.bf16.mxu1 %v6291_v61  ;;  %v284_v60 = vld [vmem:[#allocation4 + $0x200] sm:$0xff]  ;;  %v230_v53 = vld [vmem:[#allocation4 + $0x50] sm:$0xff] }
  0x72   :  { %v292_v61 = vld [vmem:[#allocation4 + $0x240] sm:$0xff] }
  0x74   :  { %1977 = vmatpush1.bf16.msra.mxu0 %v6293_v62  ;;  %2429 = vmatpush1.bf16.msra.mxu1 %v6294_v63  ;;  %v6351_v62 = vld [vmem:[#allocation6 + $0x304] ss:$16 sps:$4 sm:$0xff]   ;;  %v6354_v63 = vld [vmem:[#allocation6 + $0x30c] ss:$16 sps:$4 sm:$0xff]  }
  0x75   :  { %1978 = vmatprep.subr.bf16.mxu0 %v6295_v0  ;;  %2430 = vmatprep.subr.bf16.mxu1 %v6297_v1  ;;  %v380_v0 = vpack.c.bf16 %v292_v61, %v284_v60  ;;  %v301_v1 = vld [vmem:[#allocation4 + $0x288] sm:$0xff]  ;;  %v6405_v61 = vld [vmem:[#allocation6 + $0x424] ss:$16 sps:$4 sm:$0xff]  }
  0x76   :  { %v6400_v60 = vld [vmem:[#allocation6 + $0x408] ss:$16 sps:$4 sm:$0xff]  }
  0x78   :  { %1979 = vmatpush1.bf16.msra.mxu0 %v6299_v2  ;;  %2431 = vmatpush1.bf16.msra.mxu1 %v6300_v3  ;;  %v309_v2 = vld [vmem:[#allocation4 + $0x2c8] sm:$0xff]  ;;  %v6349_v3 = vld [vmem:[#allocation6 + $0x300] ss:$16 sps:$4 sm:$0xff]  }
  0x79   :  { %2061 = vmatprep.subr.bf16.mxu0 %v6303_v6  ;;  %2513 = vmatprep.subr.bf16.mxu1 %v6306_v7  ;;  %v6360_v6 = vld [vmem:[#allocation6 + $0x32c] ss:$16 sps:$4 sm:$0xff]   ;;  %v6355_v7 = vld [vmem:[#allocation6 + $0x320] ss:$16 sps:$4 sm:$0xff]  }
  0x7b   :  { %1981 = vmatmul.mubr.bf16.vlgmr.msra.gmra.mrb[0].mxu0 %v348_v9  ;;  %2433 = vmatmul.mubr.bf16.vlgmr.msra.gmra.mrb[0].mxu1 %v348_v9  ;;  %v389_v9 = vpack.c.bf16 %v309_v2, %v301_v1  ;;  %v238_v2 = vld [vmem:[#allocation4 + $0x90] sm:$0xff] }
  0x7c   :  { %2062 = vmatpush1.bf16.msra.mxu0 %v6301_v8  ;;  %2514 = vmatpush1.bf16.msra.mxu1 %v6304_v10  ;;  %v6358_v8 = vld [vmem:[#allocation6 + $0x328] ss:$16 sps:$4 sm:$0xff]   ;;  %v300_v10 = vld [vmem:[#allocation4 + $0x280] sm:$0xff] }
  0x7d   :  { %2063 = vmatprep.subr.bf16.mxu0 %v6309_v13  ;;  %2515 = vmatprep.subr.bf16.mxu1 %v6312_v14  ;;  %v6366_v13 = vld [vmem:[#allocation6 + $0x34c] ss:$16 sps:$4 sm:$0xff]   ;;  %v6361_v14 = vld [vmem:[#allocation6 + $0x340] ss:$16 sps:$4 sm:$0xff]  }
  0x7e   :  { %1990 = vmatprep.mubr.bf16.mxu0 %v357_v16  ;;  %2442 = vmatprep.mubr.bf16.mxu1 %v357_v16  ;;  %v6364_v16 = vld [vmem:[#allocation6 + $0x348] ss:$16 sps:$4 sm:$0xff]  }
  0x80   :  { %2064 = vmatpush1.bf16.msra.mxu0 %v6307_v15  ;;  %2516 = vmatpush1.bf16.msra.mxu1 %v6310_v17  ;;  %v388_v15 = vpack.c.bf16 %v308_v11, %v300_v10  ;;  %v317_v17 = vld [vmem:[#allocation4 + $0x308] sm:$0xff]  ;;  %v6417_v11 = vld [vmem:[#allocation6 + $0x464] ss:$16 sps:$4 sm:$0xff]  }
  0x81   :  { %2065 = vmatprep.subr.bf16.mxu0 %v6315_v20  ;;  %2517 = vmatprep.subr.bf16.mxu1 %v6318_v21  ;;  %v6372_v20 = vld [vmem:[#allocation6 + $0x36c] ss:$16 sps:$4 sm:$0xff]   ;;  %v6367_v21 = vld [vmem:[#allocation6 + $0x360] ss:$16 sps:$4 sm:$0xff]   ;;  %v6412_v10 = vld [vmem:[#allocation6 + $0x448] ss:$16 sps:$4 sm:$0xff]  }
  0x83   :  { %1991 = vmatmul.mubr.bf16.gmra.mrb[4].mxu0 %v356_v24  ;;  %2443 = vmatmul.mubr.bf16.gmra.mrb[4].mxu1 %v356_v24  ;;  %v316_v24 = vld [vmem:[#allocation4 + $0x300] sm:$0xff] }
  0x84   :  { %2066 = vmatpush1.bf16.msra.mxu0 %v6313_v22  ;;  %2518 = vmatpush1.bf16.msra.mxu1 %v6316_v23  ;;  %v397_v22 = vpack.c.bf16 %v325_v18, %v317_v17  ;;  %v6370_v23 = vld [vmem:[#allocation6 + $0x368] ss:$16 sps:$4 sm:$0xff]   ;;  %v262_v17 = vld [vmem:[#allocation4 + $0x150] sm:$0xff] }
  0x85   :  { %2067 = vmatprep.subr.bf16.mxu0 %v6321_v27  ;;  %2519 = vmatprep.subr.bf16.mxu1 %v6324_v28  ;;  %v6378_v27 = vld [vmem:[#allocation6 + $0x38c] ss:$16 sps:$4 sm:$0xff]   ;;  %v6373_v28 = vld [vmem:[#allocation6 + $0x380] ss:$16 sps:$4 sm:$0xff]   ;;  %v6423_v18 = vld [vmem:[#allocation6 + $0x484] ss:$16 sps:$4 sm:$0xff]  }
  0x86   :  { %2000 = vmatprep.mubr.bf16.mxu0 %v365_v29  ;;  %2452 = vmatprep.mubr.bf16.mxu1 %v365_v29  ;;  %v6376_v29 = vld [vmem:[#allocation6 + $0x388] ss:$16 sps:$4 sm:$0xff]  }
  0x88   :  { %2068 = vmatpush1.bf16.msra.mxu0 %v6319_v30  ;;  %2520 = vmatpush1.bf16.msra.mxu1 %v6322_v31  ;;  %v396_v30 = vpack.c.bf16 %v324_v25, %v316_v24  ;;  %v333_v31 = vld [vmem:[#allocation4 + $0x388] sm:$0xff]  ;;  %v279_v24 = vld [vmem:[#allocation4 + $0x1d8] sm:$0xff]  ;;  %v6429_v25 = vld [vmem:[#allocation6 + $0x4a4] ss:$16 sps:$4 sm:$0xff]  }
  0x89   :  { %2069 = vmatprep.subr.bf16.mxu0 %v6327_v34  ;;  %2521 = vmatprep.subr.bf16.mxu1 %v6330_v35  ;;  %v6384_v34 = vld [vmem:[#allocation6 + $0x3ac] ss:$16 sps:$4 sm:$0xff]   ;;  %v405_v35 = vpack.c.bf16 %v341_v32, %v333_v31  ;;  %v278_v31 = vld [vmem:[#allocation4 + $0x1d0] sm:$0xff] }
  0x8a   :  { %v6435_v32 = vld [vmem:[#allocation6 + $0x4c4] ss:$16 sps:$4 sm:$0xff]  }
  0x8b   :  { %2001 = vmatmul.mubr.bf16.gmra.mrb[8].mxu0 %v364_v38  ;;  %2453 = vmatmul.mubr.bf16.gmra.mrb[8].mxu1 %v364_v38  ;;  %v332_v38 = vld [vmem:[#allocation4 + $0x380] sm:$0xff] }
  0x8c   :  { %2070 = vmatpush1.bf16.msra.mxu0 %v6325_v36  ;;  %2522 = vmatpush1.bf16.msra.mxu1 %v6328_v37  ;;  %v6379_v36 = vld [vmem:[#allocation6 + $0x3a0] ss:$16 sps:$4 sm:$0xff]   ;;  %v6382_v37 = vld [vmem:[#allocation6 + $0x3a8] ss:$16 sps:$4 sm:$0xff]  }
  0x8d   :  { %2071 = vmatprep.subr.bf16.mxu0 %v6333_v41  ;;  %2523 = vmatprep.subr.bf16.mxu1 %v6336_v42  ;;  %v6390_v41 = vld [vmem:[#allocation6 + $0x3cc] ss:$16 sps:$4 sm:$0xff]   ;;  %v6385_v42 = vld [vmem:[#allocation6 + $0x3c0] ss:$16 sps:$4 sm:$0xff]  }
  0x8e   :  { %2010 = vmatprep.mubr.bf16.mxu0 %v373_v44  ;;  %2462 = vmatprep.mubr.bf16.mxu1 %v373_v44  ;;  %v404_v44 = vpack.c.bf16 %v340_v39, %v332_v38  ;;  %v295_v38 = vld [vmem:[#allocation4 + $0x258] sm:$0xff]  ;;  %v6441_v39 = vld [vmem:[#allocation6 + $0x4e4] ss:$16 sps:$4 sm:$0xff]  }
  0x90   :  { %2072 = vmatpush1.bf16.msra.mxu0 %v6331_v43  ;;  %2524 = vmatpush1.bf16.msra.mxu1 %v6334_v45  ;;  %v6388_v43 = vld [vmem:[#allocation6 + $0x3c8] ss:$16 sps:$4 sm:$0xff]  }
  0x91   :  { %2073 = vmatprep.subr.bf16.mxu0 %v6339_v48  ;;  %2525 = vmatprep.subr.bf16.mxu1 %v6342_v49  ;;  %v223_v45 = vld [vmem:[#allocation4 + $0x18] sm:$0xff]  ;;  %v6391_v49 = vld [vmem:[#allocation6 + $0x3e0] ss:$16 sps:$4 sm:$0xff]  }
  0x92   :  { %v6396_v48 = vld [vmem:[#allocation6 + $0x3ec] ss:$16 sps:$4 sm:$0xff]  }
  0x93   :  { %2011 = vmatmul.mubr.bf16.gmra.mrb[12].mxu0 %v372_v51  ;;  %2463 = vmatmul.mubr.bf16.gmra.mrb[12].mxu1 %v372_v51  ;;  %v6394_v51 = vld [vmem:[#allocation6 + $0x3e8] ss:$16 sps:$4 sm:$0xff]  }
  0x94   :  { %2074 = vmatpush1.bf16.msra.mxu0 %v6337_v50  ;;  %2526 = vmatpush1.bf16.msra.mxu1 %v6340_v54  ;;  %v351_v50 = vpack.c.bf16 %v231_v46, %v223_v45  ;;  %v6399_v54 = vld [vmem:[#allocation6 + $0x404] ss:$16 sps:$4 sm:$0xff]  }
  0x95   :  { %2075 = vmatprep.subr.bf16.mxu0 %v6345_v55  ;;  %2527 = vmatprep.subr.bf16.mxu1 %v6348_v56  ;;  %v6402_v55 = vld [vmem:[#allocation6 + $0x40c] ss:$16 sps:$4 sm:$0xff]   ;;  %v6397_v56 = vld [vmem:[#allocation6 + $0x400] ss:$16 sps:$4 sm:$0xff]   ;;  %v6447_v46 = vld [vmem:[#allocation6 + $0x504] ss:$16 sps:$4 sm:$0xff]  }
  0x96   :  { %2020 = vmatprep.mubr.bf16.mxu0 %v381_v59  ;;  %2472 = vmatprep.mubr.bf16.mxu1 %v381_v59  ;;  %v247_v59 = vld [vmem:[#allocation4 + $0xd8] sm:$0xff]  ;;  %v294_v45 = vld [vmem:[#allocation4 + $0x250] sm:$0xff] }
  0x98   :  { %2076 = vmatpush1.bf16.msra.mxu0 %v6343_v57  ;;  %2528 = vmatpush1.bf16.msra.mxu1 %v6346_v58  ;;  %v350_v57 = vpack.c.bf16 %v230_v53, %v222_v52  ;;  %v239_v58 = vld [vmem:[#allocation4 + $0x98] sm:$0xff]  ;;  %v6453_v53 = vld [vmem:[#allocation6 + $0x524] ss:$16 sps:$4 sm:$0xff]  }
  0x99   :  { %2077 = vmatprep.subr.bf16.mxu0 %v6351_v62  ;;  %2529 = vmatprep.subr.bf16.mxu1 %v6354_v63  ;;  %v6408_v62 = vld [vmem:[#allocation6 + $0x42c] ss:$16 sps:$4 sm:$0xff]   ;;  %v6403_v63 = vld [vmem:[#allocation6 + $0x420] ss:$16 sps:$4 sm:$0xff]   ;;  %v359_v1 = vpack.c.bf16 %v247_v59, %v239_v58 }
  0x9a   :  { %v311_v52 = vld [vmem:[#allocation4 + $0x2d8] sm:$0xff]  ;;  %v302_v58 = vld [vmem:[#allocation4 + $0x290] sm:$0xff] }
  0x9b   :  { %2021 = vmatmul.mubr.bf16.gmra.mrb[16].mxu0 %v380_v0  ;;  %2473 = vmatmul.mubr.bf16.gmra.mrb[16].mxu1 %v380_v0  ;;  %v6406_v0 = vld [vmem:[#allocation6 + $0x428] ss:$16 sps:$4 sm:$0xff]   ;;  %v310_v59 = vld [vmem:[#allocation4 + $0x2d0] sm:$0xff] }
  0x9c   :  { %2078 = vmatpush1.bf16.msra.mxu0 %v6349_v3  ;;  %2530 = vmatpush1.bf16.msra.mxu1 %v6352_v4  ;;  %v246_v3 = vld [vmem:[#allocation4 + $0xd0] sm:$0xff] }
  0x9d   :  { %2079 = vmatprep.subr.bf16.mxu0 %v6357_v5  ;;  %2531 = vmatprep.subr.bf16.mxu1 %v6360_v6  ;;  %v6411_v4 = vld [vmem:[#allocation6 + $0x444] ss:$16 sps:$4 sm:$0xff]   ;;  %v6414_v5 = vld [vmem:[#allocation6 + $0x44c] ss:$16 sps:$4 sm:$0xff]   ;;  %v358_v6 = vpack.c.bf16 %v246_v3, %v238_v2  ;;  %v6460_v2 = vld [vmem:[#allocation6 + $0x548] ss:$16 sps:$4 sm:$0xff]  }
  0x9e   :  { %2030 = vmatprep.mubr.bf16.mxu0 %v389_v9  ;;  %2482 = vmatprep.mubr.bf16.mxu1 %v389_v9  ;;  %v6409_v9 = vld [vmem:[#allocation6 + $0x440] ss:$16 sps:$4 sm:$0xff]   ;;  %v6465_v3 = vld [vmem:[#allocation6 + $0x564] ss:$16 sps:$4 sm:$0xff]  }
  0xa0   :  { %2080 = vmatpush1.bf16.msra.mxu0 %v6355_v7  ;;  %2532 = vmatpush1.bf16.msra.mxu1 %v6358_v8  ;;  %v255_v7 = vld [vmem:[#allocation4 + $0x118] sm:$0xff] }
  0xa1   :  { %2081 = vmatprep.subr.bf16.mxu0 %v6363_v12  ;;  %2533 = vmatprep.subr.bf16.mxu1 %v6366_v13  ;;  %v263_v8 = vld [vmem:[#allocation4 + $0x158] sm:$0xff]  ;;  %v6415_v13 = vld [vmem:[#allocation6 + $0x460] ss:$16 sps:$4 sm:$0xff]  }
  0xa2   :  { %v6420_v12 = vld [vmem:[#allocation6 + $0x46c] ss:$16 sps:$4 sm:$0xff]  }
  0xa3   :  { %2031 = vmatmul.mubr.bf16.gmra.mrb[20].mxu0 %v388_v15  ;;  %2483 = vmatmul.mubr.bf16.gmra.mrb[20].mxu1 %v388_v15  ;;  %v367_v15 = vpack.c.bf16 %v263_v8, %v255_v7  ;;  %v318_v8 = vld [vmem:[#allocation4 + $0x310] sm:$0xff] }
  0xa4   :  { %2082 = vmatpush1.bf16.msra.mxu0 %v6361_v14  ;;  %2534 = vmatpush1.bf16.msra.mxu1 %v6364_v16  ;;  %v6418_v14 = vld [vmem:[#allocation6 + $0x468] ss:$16 sps:$4 sm:$0xff]   ;;  %v254_v16 = vld [vmem:[#allocation4 + $0x110] sm:$0xff] }
  0xa5   :  { %2083 = vmatprep.subr.bf16.mxu0 %v6369_v19  ;;  %2535 = vmatprep.subr.bf16.mxu1 %v6372_v20  ;;  %v6426_v19 = vld [vmem:[#allocation6 + $0x48c] ss:$16 sps:$4 sm:$0xff]   ;;  %v6421_v20 = vld [vmem:[#allocation6 + $0x480] ss:$16 sps:$4 sm:$0xff]  }
  0xa6   :  { %2040 = vmatprep.mubr.bf16.mxu0 %v397_v22  ;;  %2492 = vmatprep.mubr.bf16.mxu1 %v397_v22  ;;  %v6424_v22 = vld [vmem:[#allocation6 + $0x488] ss:$16 sps:$4 sm:$0xff]  }
  0xa8   :  { %2084 = vmatpush1.bf16.msra.mxu0 %v6367_v21  ;;  %2536 = vmatpush1.bf16.msra.mxu1 %v6370_v23  ;;  %v366_v21 = vpack.c.bf16 %v262_v17, %v254_v16  ;;  %v271_v23 = vld [vmem:[#allocation4 + $0x198] sm:$0xff]  ;;  %v6477_v17 = vld [vmem:[#allocation6 + $0x5a4] ss:$16 sps:$4 sm:$0xff]  }
  0xa9   :  { %2085 = vmatprep.subr.bf16.mxu0 %v6375_v26  ;;  %2537 = vmatprep.subr.bf16.mxu1 %v6378_v27  ;;  %v6432_v26 = vld [vmem:[#allocation6 + $0x4ac] ss:$16 sps:$4 sm:$0xff]   ;;  %v6427_v27 = vld [vmem:[#allocation6 + $0x4a0] ss:$16 sps:$4 sm:$0xff]   ;;  %v6472_v16 = vld [vmem:[#allocation6 + $0x588] ss:$16 sps:$4 sm:$0xff]  }
  0xab   :  { %2041 = vmatmul.mubr.bf16.gmra.mrb[24].mxu0 %v396_v30  ;;  %2493 = vmatmul.mubr.bf16.gmra.mrb[24].mxu1 %v396_v30  ;;  %v270_v30 = vld [vmem:[#allocation4 + $0x190] sm:$0xff] }
  0xac   :  { %2086 = vmatpush1.bf16.msra.mxu0 %v6373_v28  ;;  %2538 = vmatpush1.bf16.msra.mxu1 %v6376_v29  ;;  %v375_v28 = vpack.c.bf16 %v279_v24, %v271_v23  ;;  %v6430_v29 = vld [vmem:[#allocation6 + $0x4a8] ss:$16 sps:$4 sm:$0xff]   ;;  %v342_v23 = vld [vmem:[#allocation4 + $0x3d0] sm:$0xff] }
  0xad   :  { %2087 = vmatprep.subr.bf16.mxu0 %v6381_v33  ;;  %2539 = vmatprep.subr.bf16.mxu1 %v6384_v34  ;;  %v6438_v33 = vld [vmem:[#allocation6 + $0x4cc] ss:$16 sps:$4 sm:$0xff]   ;;  %v6433_v34 = vld [vmem:[#allocation6 + $0x4c0] ss:$16 sps:$4 sm:$0xff]   ;;  %v6483_v24 = vld [vmem:[#allocation6 + $0x5c4] ss:$16 sps:$4 sm:$0xff]  }
  0xae   :  { %2050 = vmatprep.mubr.bf16.mxu0 %v405_v35  ;;  %2502 = vmatprep.mubr.bf16.mxu1 %v405_v35  ;;  %v6436_v35 = vld [vmem:[#allocation6 + $0x4c8] ss:$16 sps:$4 sm:$0xff]  }
  0xb0   :  { %2088 = vmatpush1.bf16.msra.mxu0 %v6379_v36  ;;  %2540 = vmatpush1.bf16.msra.mxu1 %v6382_v37  ;;  %v374_v36 = vpack.c.bf16 %v278_v31, %v270_v30  ;;  %v287_v37 = vld [vmem:[#allocation4 + $0x218] sm:$0xff]  ;;  %v233_v30 = vld [vmem:[#allocation4 + $0x68] sm:$0xff]  ;;  %v6489_v31 = vld [vmem:[#allocation6 + $0x5e4] ss:$16 sps:$4 sm:$0xff]  }
  0xb1   :  { %2089 = vmatprep.subr.bf16.mxu0 %v6387_v40  ;;  %2541 = vmatprep.subr.bf16.mxu1 %v6390_v41  ;;  %v6444_v40 = vld [vmem:[#allocation6 + $0x4ec] ss:$16 sps:$4 sm:$0xff]   ;;  %v383_v41 = vpack.c.bf16 %v295_v38, %v287_v37  ;;  %v232_v37 = vld [vmem:[#allocation4 + $0x60] sm:$0xff] }
  0xb2   :  { %v6495_v38 = vld [vmem:[#allocation6 + $0x604] ss:$16 sps:$4 sm:$0xff]  }
  0xb3   :  { %2051 = vmatmul.mubr.bf16.gmra.mrb[28].mxu0 %v404_v44  ;;  %2503 = vmatmul.mubr.bf16.gmra.mrb[28].mxu1 %v404_v44  ;;  %v286_v44 = vld [vmem:[#allocation4 + $0x210] sm:$0xff] }
  0xb4   :  { %2090 = vmatpush1.bf16.msra.mxu0 %v6385_v42  ;;  %2542 = vmatpush1.bf16.msra.mxu1 %v6388_v43  ;;  %v6439_v42 = vld [vmem:[#allocation6 + $0x4e0] ss:$16 sps:$4 sm:$0xff]   ;;  %v6442_v43 = vld [vmem:[#allocation6 + $0x4e8] ss:$16 sps:$4 sm:$0xff]  }
  0xb5   :  { %2091 = vmatprep.subr.bf16.mxu0 %v6393_v47  ;;  %2543 = vmatprep.subr.bf16.mxu1 %v6396_v48  ;;  %v6450_v47 = vld [vmem:[#allocation6 + $0x50c] ss:$16 sps:$4 sm:$0xff]   ;;  %v6445_v48 = vld [vmem:[#allocation6 + $0x500] ss:$16 sps:$4 sm:$0xff]  }
  0xb6   :  { %2093 = vmatprep.mubr.bf16.mxu0 %v351_v50  ;;  %2545 = vmatprep.mubr.bf16.mxu1 %v351_v50  ;;  %v382_v50 = vpack.c.bf16 %v294_v45, %v286_v44  ;;  %v249_v44 = vld [vmem:[#allocation4 + $0xe8] sm:$0xff]  ;;  %v6501_v45 = vld [vmem:[#allocation6 + $0x624] ss:$16 sps:$4 sm:$0xff]  }
  0xb8   :  { %2092 = vmatpush1.bf16.msra.mxu0 %v6391_v49  ;;  %2544 = vmatpush1.bf16.msra.mxu1 %v6394_v51  ;;  %v6448_v49 = vld [vmem:[#allocation6 + $0x508] ss:$16 sps:$4 sm:$0xff]  }
  0xb9   :  { %2174 = vmatprep.subr.bf16.mxu0 %v6399_v54  ;;  %2626 = vmatprep.subr.bf16.mxu1 %v6402_v55  ;;  %v303_v51 = vld [vmem:[#allocation4 + $0x298] sm:$0xff]  ;;  %v6451_v55 = vld [vmem:[#allocation6 + $0x520] ss:$16 sps:$4 sm:$0xff]  }
  0xba   :  { %v6456_v54 = vld [vmem:[#allocation6 + $0x52c] ss:$16 sps:$4 sm:$0xff]  }
  0xbb   :  { %2094 = vmatmul.mubr.bf16.vlgmr.msra.gmra.mrb[0].mxu0 %v350_v57  ;;  %2546 = vmatmul.mubr.bf16.vlgmr.msra.gmra.mrb[0].mxu1 %v350_v57  ;;  %v6454_v57 = vld [vmem:[#allocation6 + $0x528] ss:$16 sps:$4 sm:$0xff]  }
  0xbc   :  { %2175 = vmatpush1.bf16.msra.mxu0 %v6397_v56  ;;  %2627 = vmatpush1.bf16.msra.mxu1 %v6400_v60  ;;  %v391_v56 = vpack.c.bf16 %v311_v52, %v303_v51  ;;  %v6459_v60 = vld [vmem:[#allocation6 + $0x544] ss:$16 sps:$4 sm:$0xff]  }
  0xbd   :  { %2176 = vmatprep.subr.bf16.mxu0 %v6405_v61  ;;  %2628 = vmatprep.subr.bf16.mxu1 %v6408_v62  ;;  %v6462_v61 = vld [vmem:[#allocation6 + $0x54c] ss:$16 sps:$4 sm:$0xff]   ;;  %v6457_v62 = vld [vmem:[#allocation6 + $0x540] ss:$16 sps:$4 sm:$0xff]   ;;  %v6507_v52 = vld [vmem:[#allocation6 + $0x644] ss:$16 sps:$4 sm:$0xff]  }
  0xbe   :  { %2103 = vmatprep.mubr.bf16.mxu0 %v359_v1  ;;  %2555 = vmatprep.mubr.bf16.mxu1 %v359_v1  ;;  %v327_v1 = vld [vmem:[#allocation4 + $0x358] sm:$0xff]  ;;  %v248_v51 = vld [vmem:[#allocation4 + $0xe0] sm:$0xff] }
  0xc0   :  { %2177 = vmatpush1.bf16.msra.mxu0 %v6403_v63  ;;  %2629 = vmatpush1.bf16.msra.mxu1 %v6406_v0  ;;  %v390_v63 = vpack.c.bf16 %v310_v59, %v302_v58  ;;  %v319_v0 = vld [vmem:[#allocation4 + $0x318] sm:$0xff]  ;;  %v265_v58 = vld [vmem:[#allocation4 + $0x168] sm:$0xff]  ;;  %v6513_v59 = vld [vmem:[#allocation6 + $0x664] ss:$16 sps:$4 sm:$0xff]  }
  0xc1   :  { %2178 = vmatprep.subr.bf16.mxu0 %v6411_v4  ;;  %2630 = vmatprep.subr.bf16.mxu1 %v6414_v5  ;;  %v6468_v4 = vld [vmem:[#allocation6 + $0x56c] ss:$16 sps:$4 sm:$0xff]   ;;  %v6463_v5 = vld [vmem:[#allocation6 + $0x560] ss:$16 sps:$4 sm:$0xff]   ;;  %v399_v7 = vpack.c.bf16 %v327_v1, %v319_v0 }
  0xc2   :  { %v256_v0 = vld [vmem:[#allocation4 + $0x120] sm:$0xff] }
  0xc3   :  { %2104 = vmatmul.mubr.bf16.gmra.mrb[4].mxu0 %v358_v6  ;;  %2556 = vmatmul.mubr.bf16.gmra.mrb[4].mxu1 %v358_v6  ;;  %v6466_v6 = vld [vmem:[#allocation6 + $0x568] ss:$16 sps:$4 sm:$0xff]   ;;  %v264_v1 = vld [vmem:[#allocation4 + $0x160] sm:$0xff] }
  0xc4   :  { %2179 = vmatpush1.bf16.msra.mxu0 %v6409_v9  ;;  %2631 = vmatpush1.bf16.msra.mxu1 %v6412_v10  ;;  %v326_v9 = vld [vmem:[#allocation4 + $0x350] sm:$0xff] }
  0xc5   :  { %2180 = vmatprep.subr.bf16.mxu0 %v6417_v11  ;;  %2632 = vmatprep.subr.bf16.mxu1 %v6420_v12  ;;  %v6471_v10 = vld [vmem:[#allocation6 + $0x584] ss:$16 sps:$4 sm:$0xff]   ;;  %v6474_v11 = vld [vmem:[#allocation6 + $0x58c] ss:$16 sps:$4 sm:$0xff]   ;;  %v398_v12 = vpack.c.bf16 %v326_v9, %v318_v8  ;;  %v6520_v8 = vld [vmem:[#allocation6 + $0x688] ss:$16 sps:$4 sm:$0xff]  }
  0xc6   :  { %2113 = vmatprep.mubr.bf16.mxu0 %v367_v15  ;;  %2565 = vmatprep.mubr.bf16.mxu1 %v367_v15  ;;  %v6469_v15 = vld [vmem:[#allocation6 + $0x580] ss:$16 sps:$4 sm:$0xff]   ;;  %v6525_v9 = vld [vmem:[#allocation6 + $0x6a4] ss:$16 sps:$4 sm:$0xff]  }
  0xc8   :  { %2181 = vmatpush1.bf16.msra.mxu0 %v6415_v13  ;;  %2633 = vmatpush1.bf16.msra.mxu1 %v6418_v14  ;;  %v335_v13 = vld [vmem:[#allocation4 + $0x398] sm:$0xff] }
  0xc9   :  { %2182 = vmatprep.subr.bf16.mxu0 %v6423_v18  ;;  %2634 = vmatprep.subr.bf16.mxu1 %v6426_v19  ;;  %v343_v14 = vld [vmem:[#allocation4 + $0x3d8] sm:$0xff]  ;;  %v6475_v19 = vld [vmem:[#allocation6 + $0x5a0] ss:$16 sps:$4 sm:$0xff]  }
  0xca   :  { %v6480_v18 = vld [vmem:[#allocation6 + $0x5ac] ss:$16 sps:$4 sm:$0xff]  }
  0xcb   :  { %2114 = vmatmul.mubr.bf16.gmra.mrb[8].mxu0 %v366_v21  ;;  %2566 = vmatmul.mubr.bf16.gmra.mrb[8].mxu1 %v366_v21  ;;  %v407_v21 = vpack.c.bf16 %v343_v14, %v335_v13  ;;  %v6526_v13 = vld [vmem:[#allocation6 + $0x6a8] ss:$16 sps:$4 sm:$0xff]   ;;  %v272_v14 = vld [vmem:[#allocation4 + $0x1a0] sm:$0xff] }
  0xcc   :  { %2183 = vmatpush1.bf16.msra.mxu0 %v6421_v20  ;;  %2635 = vmatpush1.bf16.msra.mxu1 %v6424_v22  ;;  %v6478_v20 = vld [vmem:[#allocation6 + $0x5a8] ss:$16 sps:$4 sm:$0xff]   ;;  %v334_v22 = vld [vmem:[#allocation4 + $0x390] sm:$0xff] }
  0xcd   :  { %2184 = vmatprep.subr.bf16.mxu0 %v6429_v25  ;;  %2636 = vmatprep.subr.bf16.mxu1 %v6432_v26  ;;  %v6486_v25 = vld [vmem:[#allocation6 + $0x5cc] ss:$16 sps:$4 sm:$0xff]   ;;  %v6481_v26 = vld [vmem:[#allocation6 + $0x5c0] ss:$16 sps:$4 sm:$0xff]  }
  0xce   :  { %2123 = vmatprep.mubr.bf16.mxu0 %v375_v28  ;;  %2575 = vmatprep.mubr.bf16.mxu1 %v375_v28  ;;  %v6484_v28 = vld [vmem:[#allocation6 + $0x5c8] ss:$16 sps:$4 sm:$0xff]  }
  0xd0   :  { %2185 = vmatpush1.bf16.msra.mxu0 %v6427_v27  ;;  %2637 = vmatpush1.bf16.msra.mxu1 %v6430_v29  ;;  %v406_v27 = vpack.c.bf16 %v342_v23, %v334_v22  ;;  %v225_v29 = vld [vmem:[#allocation4 + $0x28] sm:$0xff]  ;;  %v6537_v23 = vld [vmem:[#allocation6 + $0x6e4] ss:$16 sps:$4 sm:$0xff]  }
  0xd1   :  { %2186 = vmatprep.subr.bf16.mxu0 %v6435_v32  ;;  %2638 = vmatprep.subr.bf16.mxu1 %v6438_v33  ;;  %v6492_v32 = vld [vmem:[#allocation6 + $0x5ec] ss:$16 sps:$4 sm:$0xff]   ;;  %v6487_v33 = vld [vmem:[#allocation6 + $0x5e0] ss:$16 sps:$4 sm:$0xff]  }
  0xd2   :  { %v297_v22 = vld [vmem:[#allocation4 + $0x268] sm:$0xff] }
  0xd3   :  { %2124 = vmatmul.mubr.bf16.gmra.mrb[12].mxu0 %v374_v36  ;;  %2576 = vmatmul.mubr.bf16.gmra.mrb[12].mxu1 %v374_v36  ;;  %v224_v36 = vld [vmem:[#allocation4 + $0x20] sm:$0xff] }
  0xd4   :  { %2187 = vmatpush1.bf16.msra.mxu0 %v6433_v34  ;;  %2639 = vmatpush1.bf16.msra.mxu1 %v6436_v35  ;;  %v353_v34 = vpack.c.bf16 %v233_v30, %v225_v29  ;;  %v6490_v35 = vld [vmem:[#allocation6 + $0x5e8] ss:$16 sps:$4 sm:$0xff]   ;;  %v296_v29 = vld [vmem:[#allocation4 + $0x260] sm:$0xff] }
  0xd5   :  { %2188 = vmatprep.subr.bf16.mxu0 %v6441_v39  ;;  %2640 = vmatprep.subr.bf16.mxu1 %v6444_v40  ;;  %v6498_v39 = vld [vmem:[#allocation6 + $0x60c] ss:$16 sps:$4 sm:$0xff]   ;;  %v6493_v40 = vld [vmem:[#allocation6 + $0x600] ss:$16 sps:$4 sm:$0xff]   ;;  %v6543_v30 = vld [vmem:[#allocation6 + $0x704] ss:$16 sps:$4 sm:$0xff]  }
  0xd6   :  { %2133 = vmatprep.mubr.bf16.mxu0 %v383_v41  ;;  %2585 = vmatprep.mubr.bf16.mxu1 %v383_v41  ;;  %v6496_v41 = vld [vmem:[#allocation6 + $0x608] ss:$16 sps:$4 sm:$0xff]  }
  0xd8   :  { %2189 = vmatpush1.bf16.msra.mxu0 %v6439_v42  ;;  %2641 = vmatpush1.bf16.msra.mxu1 %v6442_v43  ;;  %v352_v42 = vpack.c.bf16 %v232_v37, %v224_v36  ;;  %v241_v43 = vld [vmem:[#allocation4 + $0xa8] sm:$0xff]  ;;  %v6549_v37 = vld [vmem:[#allocation6 + $0x724] ss:$16 sps:$4 sm:$0xff]  }
  0xd9   :  { %2190 = vmatprep.subr.bf16.mxu0 %v6447_v46  ;;  %2642 = vmatprep.subr.bf16.mxu1 %v6450_v47  ;;  %v6504_v46 = vld [vmem:[#allocation6 + $0x62c] ss:$16 sps:$4 sm:$0xff]   ;;  %v361_v47 = vpack.c.bf16 %v249_v44, %v241_v43  ;;  %v312_v43 = vld [vmem:[#allocation4 + $0x2e0] sm:$0xff] }
  0xda   :  { %v313_v36 = vld [vmem:[#allocation4 + $0x2e8] sm:$0xff]  ;;  %v6555_v44 = vld [vmem:[#allocation6 + $0x744] ss:$16 sps:$4 sm:$0xff]  }
  0xdb   :  { %2134 = vmatmul.mubr.bf16.gmra.mrb[16].mxu0 %v382_v50  ;;  %2586 = vmatmul.mubr.bf16.gmra.mrb[16].mxu1 %v382_v50  ;;  %v240_v50 = vld [vmem:[#allocation4 + $0xa0] sm:$0xff] }
  0xdc   :  { %2191 = vmatpush1.bf16.msra.mxu0 %v6445_v48  ;;  %2643 = vmatpush1.bf16.msra.mxu1 %v6448_v49  ;;  %v6499_v48 = vld [vmem:[#allocation6 + $0x620] ss:$16 sps:$4 sm:$0xff]   ;;  %v6502_v49 = vld [vmem:[#allocation6 + $0x628] ss:$16 sps:$4 sm:$0xff]  }
  0xdd   :  { %2192 = vmatprep.subr.bf16.mxu0 %v6453_v53  ;;  %2644 = vmatprep.subr.bf16.mxu1 %v6456_v54  ;;  %v6510_v53 = vld [vmem:[#allocation6 + $0x64c] ss:$16 sps:$4 sm:$0xff]   ;;  %v6505_v54 = vld [vmem:[#allocation6 + $0x640] ss:$16 sps:$4 sm:$0xff]  }
  0xde   :  { %2143 = vmatprep.mubr.bf16.mxu0 %v391_v56  ;;  %2595 = vmatprep.mubr.bf16.mxu1 %v391_v56  ;;  %v360_v56 = vpack.c.bf16 %v248_v51, %v240_v50  ;;  %v6561_v51 = vld [vmem:[#allocation6 + $0x764] ss:$16 sps:$4 sm:$0xff]  }
  0xe0   :  { %2193 = vmatpush1.bf16.msra.mxu0 %v6451_v55  ;;  %2645 = vmatpush1.bf16.msra.mxu1 %v6454_v57  ;;  %v6508_v55 = vld [vmem:[#allocation6 + $0x648] ss:$16 sps:$4 sm:$0xff]  }
  0xe1   :  { %2194 = vmatprep.subr.bf16.mxu0 %v6459_v60  ;;  %2646 = vmatprep.subr.bf16.mxu1 %v6462_v61  ;;  %v257_v57 = vld [vmem:[#allocation4 + $0x128] sm:$0xff] }
  0xe2   :  { %v6516_v60 = vld [vmem:[#allocation6 + $0x66c] ss:$16 sps:$4 sm:$0xff]   ;;  %v369_v61 = vpack.c.bf16 %v265_v58, %v257_v57  ;;  %v328_v57 = vld [vmem:[#allocation4 + $0x360] sm:$0xff] }
  0xe3   :  { %2144 = vmatmul.mubr.bf16.gmra.mrb[20].mxu0 %v390_v63  ;;  %2596 = vmatmul.mubr.bf16.gmra.mrb[20].mxu1 %v390_v63  ;;  %v6514_v63 = vld [vmem:[#allocation6 + $0x668] ss:$16 sps:$4 sm:$0xff]   ;;  %v6567_v58 = vld [vmem:[#allocation6 + $0x784] ss:$16 sps:$4 sm:$0xff]  }
  0xe4   :  { %2195 = vmatpush1.bf16.msra.mxu0 %v6457_v62  ;;  %2647 = vmatpush1.bf16.msra.mxu1 %v6460_v2  ;;  %v6511_v62 = vld [vmem:[#allocation6 + $0x660] ss:$16 sps:$4 sm:$0xff]   ;;  %v6519_v2 = vld [vmem:[#allocation6 + $0x684] ss:$16 sps:$4 sm:$0xff]  }
  0xe5   :  { %2196 = vmatprep.subr.bf16.mxu0 %v6465_v3  ;;  %2648 = vmatprep.subr.bf16.mxu1 %v6468_v4  ;;  %v6522_v3 = vld [vmem:[#allocation6 + $0x68c] ss:$16 sps:$4 sm:$0xff]   ;;  %v368_v4 = vpack.c.bf16 %v264_v1, %v256_v0  ;;  %v6573_v1 = vld [vmem:[#allocation6 + $0x7a4] ss:$16 sps:$4 sm:$0xff]  }
  0xe6   :  { %2153 = vmatprep.mubr.bf16.mxu0 %v399_v7  ;;  %2605 = vmatprep.mubr.bf16.mxu1 %v399_v7  ;;  %v6517_v7 = vld [vmem:[#allocation6 + $0x680] ss:$16 sps:$4 sm:$0xff]  }
  0xe8   :  { %2197 = vmatpush1.bf16.msra.mxu0 %v6463_v5  ;;  %2649 = vmatpush1.bf16.msra.mxu1 %v6466_v6  ;;  %v273_v5 = vld [vmem:[#allocation4 + $0x1a8] sm:$0xff] }
  0xe9   :  { %2198 = vmatprep.subr.bf16.mxu0 %v6471_v10  ;;  %2650 = vmatprep.subr.bf16.mxu1 %v6474_v11  ;;  %v281_v6 = vld [vmem:[#allocation4 + $0x1e8] sm:$0xff] }
  0xea   :  { %v6528_v10 = vld [vmem:[#allocation6 + $0x6ac] ss:$16 sps:$4 sm:$0xff]   ;;  %v377_v11 = vpack.c.bf16 %v281_v6, %v273_v5  ;;  %v336_v6 = vld [vmem:[#allocation4 + $0x3a0] sm:$0xff] }
  0xeb   :  { %2154 = vmatmul.mubr.bf16.gmra.mrb[24].mxu0 %v398_v12  ;;  %2606 = vmatmul.mubr.bf16.gmra.mrb[24].mxu1 %v398_v12  ;;  %v6523_v12 = vld [vmem:[#allocation6 + $0x6a0] ss:$16 sps:$4 sm:$0xff]  }
  0xec   :  { %2199 = vmatpush1.bf16.msra.mxu0 %v6469_v15  ;;  %2651 = vmatpush1.bf16.msra.mxu1 %v6472_v16  ;;  %v280_v15 = vld [vmem:[#allocation4 + $0x1e0] sm:$0xff] }
  0xed   :  { %2200 = vmatprep.subr.bf16.mxu0 %v6477_v17  ;;  %2652 = vmatprep.subr.bf16.mxu1 %v6480_v18  ;;  %v6531_v16 = vld [vmem:[#allocation6 + $0x6c4] ss:$16 sps:$4 sm:$0xff]   ;;  %v6534_v17 = vld [vmem:[#allocation6 + $0x6cc] ss:$16 sps:$4 sm:$0xff]   ;;  %v6529_v18 = vld [vmem:[#allocation6 + $0x6c0] ss:$16 sps:$4 sm:$0xff]  }
  0xee   :  { %2163 = vmatprep.mubr.bf16.mxu0 %v407_v21  ;;  %2615 = vmatprep.mubr.bf16.mxu1 %v407_v21  ;;  %v289_v21 = vld [vmem:[#allocation4 + $0x228] sm:$0xff] }
  0xf0   :  { %2201 = vmatpush1.bf16.msra.mxu0 %v6475_v19  ;;  %2653 = vmatpush1.bf16.msra.mxu1 %v6478_v20  ;;  %v6532_v19 = vld [vmem:[#allocation6 + $0x6c8] ss:$16 sps:$4 sm:$0xff]   ;;  %v376_v20 = vpack.c.bf16 %v280_v15, %v272_v14  ;;  %v6585_v15 = vld [vmem:[#allocation6 + $0x7e4] ss:$16 sps:$4 sm:$0xff]  }
  0xf1   :  { %2202 = vmatprep.subr.bf16.mxu0 %v6483_v24  ;;  %2654 = vmatprep.subr.bf16.mxu1 %v6486_v25  ;;  %v6540_v24 = vld [vmem:[#allocation6 + $0x6ec] ss:$16 sps:$4 sm:$0xff]   ;;  %v6535_v25 = vld [vmem:[#allocation6 + $0x6e0] ss:$16 sps:$4 sm:$0xff]  }
  0xf3   :  { %2164 = vmatmul.mubr.bf16.gmra.mrb[28].mxu0 %v406_v27  ;;  %2616 = vmatmul.mubr.bf16.gmra.mrb[28].mxu1 %v406_v27  ;;  %v385_v27 = vpack.c.bf16 %v297_v22, %v289_v21  ;;  %v234_v21 = vld [vmem:[#allocation4 + $0x70] sm:$0xff]  ;;  %v243_v22 = vld [vmem:[#allocation4 + $0xb8] sm:$0xff] }
  0xf4   :  { %2203 = vmatpush1.bf16.msra.mxu0 %v6481_v26  ;;  %2655 = vmatpush1.bf16.msra.mxu1 %v6484_v28  ;;  %v6538_v26 = vld [vmem:[#allocation6 + $0x6e8] ss:$16 sps:$4 sm:$0xff]   ;;  %v288_v28 = vld [vmem:[#allocation4 + $0x220] sm:$0xff] }
  0xf5   :  { %2204 = vmatprep.subr.bf16.mxu0 %v6489_v31  ;;  %2656 = vmatprep.subr.bf16.mxu1 %v6492_v32  ;;  %v6546_v31 = vld [vmem:[#allocation6 + $0x70c] ss:$16 sps:$4 sm:$0xff]   ;;  %v6541_v32 = vld [vmem:[#allocation6 + $0x700] ss:$16 sps:$4 sm:$0xff]  }
  0xf6   :  { %2206 = vmatprep.mubr.bf16.mxu0 %v353_v34  ;;  %2658 = vmatprep.mubr.bf16.mxu1 %v353_v34  ;;  %v384_v34 = vpack.c.bf16 %v296_v29, %v288_v28  ;;  %v6594_v28 = vld [vmem:[#allocation8 + $0x14] ss:$8 sps:$4 sm:$0xff]  }
  0xf7   :  { %v242_v29 = vld [vmem:[#allocation4 + $0xb0] sm:$0xff] }
  0xf8   :  { %2205 = vmatpush1.bf16.msra.mxu0 %v6487_v33  ;;  %2657 = vmatpush1.bf16.msra.mxu1 %v6490_v35  ;;  %v6544_v33 = vld [vmem:[#allocation6 + $0x708] ss:$16 sps:$4 sm:$0xff]  }
  0xf9   :  { %2287 = vmatprep.subr.bf16.mxu0 %v6495_v38  ;;  %2739 = vmatprep.subr.bf16.mxu1 %v6498_v39  ;;  %v305_v35 = vld [vmem:[#allocation4 + $0x2a8] sm:$0xff]  ;;  %v6547_v39 = vld [vmem:[#allocation6 + $0x720] ss:$16 sps:$4 sm:$0xff]  }
  0xfa   :  { %v6552_v38 = vld [vmem:[#allocation6 + $0x72c] ss:$16 sps:$4 sm:$0xff]  }
  0xfb   :  { %2207 = vmatmul.mubr.bf16.vlgmr.msra.gmra.mrb[0].mxu0 %v352_v42  ;;  %2659 = vmatmul.mubr.bf16.vlgmr.msra.gmra.mrb[0].mxu1 %v352_v42  ;;  %v304_v42 = vld [vmem:[#allocation4 + $0x2a0] sm:$0xff] }
  0xfc   :  { %2288 = vmatpush1.bf16.msra.mxu0 %v6493_v40  ;;  %2740 = vmatpush1.bf16.msra.mxu1 %v6496_v41  ;;  %v6550_v40 = vld [vmem:[#allocation6 + $0x728] ss:$16 sps:$4 sm:$0xff]   ;;  %v393_v41 = vpack.c.bf16 %v313_v36, %v305_v35  ;;  %v392_v50 = vpack.c.bf16 %v312_v43, %v304_v42 }
  0xfd   :  { %2289 = vmatprep.subr.bf16.mxu0 %v6501_v45  ;;  %2741 = vmatprep.subr.bf16.mxu1 %v6504_v46  ;;  %v6558_v45 = vld [vmem:[#allocation6 + $0x74c] ss:$16 sps:$4 sm:$0xff]   ;;  %v6598_v43 = vld [vmem:[#allocation8 + $0x30] ss:$8 sps:$4 sm:$0xff]  }
  0xfe   :  { %2216 = vmatprep.mubr.bf16.mxu0 %v361_v47  ;;  %2668 = vmatprep.mubr.bf16.mxu1 %v361_v47  ;;  %v321_v46 = vld [vmem:[#allocation4 + $0x328] sm:$0xff]  ;;  %v283_v42 = vld [vmem:[#allocation4 + $0x1f8] sm:$0xff] }
  0xff   :  { %v329_v47 = vld [vmem:[#allocation4 + $0x368] sm:$0xff] }
 0x100   :  { %2290 = vmatpush1.bf16.msra.mxu0 %v6499_v48  ;;  %2742 = vmatpush1.bf16.msra.mxu1 %v6502_v49  ;;  %v6553_v48 = vld [vmem:[#allocation6 + $0x740] ss:$16 sps:$4 sm:$0xff]   ;;  %v6556_v49 = vld [vmem:[#allocation6 + $0x748] ss:$16 sps:$4 sm:$0xff]  }
 0x101   :  { %2291 = vmatprep.subr.bf16.mxu0 %v6507_v52  ;;  %2743 = vmatprep.subr.bf16.mxu1 %v6510_v53  ;;  %v6564_v52 = vld [vmem:[#allocation6 + $0x76c] ss:$16 sps:$4 sm:$0xff]   ;;  %v6559_v53 = vld [vmem:[#allocation6 + $0x760] ss:$16 sps:$4 sm:$0xff]  }
 0x103   :  { %2217 = vmatmul.mubr.bf16.gmra.mrb[4].mxu0 %v360_v56  ;;  %2669 = vmatmul.mubr.bf16.gmra.mrb[4].mxu1 %v360_v56  ;;  %v320_v56 = vld [vmem:[#allocation4 + $0x320] sm:$0xff] }
 0x104   :  { %2292 = vmatpush1.bf16.msra.mxu0 %v6505_v54  ;;  %2744 = vmatpush1.bf16.msra.mxu1 %v6508_v55  ;;  %v6562_v54 = vld [vmem:[#allocation6 + $0x768] ss:$16 sps:$4 sm:$0xff]   ;;  %v401_v55 = vpack.c.bf16 %v329_v47, %v321_v46  ;;  %v400_v0 = vpack.c.bf16 %v328_v57, %v320_v56 }
 0x105   :  { %2293 = vmatprep.subr.bf16.mxu0 %v6513_v59  ;;  %2745 = vmatprep.subr.bf16.mxu1 %v6516_v60  ;;  %v6570_v59 = vld [vmem:[#allocation6 + $0x78c] ss:$16 sps:$4 sm:$0xff]   ;;  %v6601_v47 = vld [vmem:[#allocation8 + $0x40] ss:$8 sps:$4 sm:$0xff]  }
 0x106   :  { %2226 = vmatprep.mubr.bf16.mxu0 %v369_v61  ;;  %2678 = vmatprep.mubr.bf16.mxu1 %v369_v61  ;;  %v337_v60 = vld [vmem:[#allocation4 + $0x3a8] sm:$0xff] }
 0x107   :  { %v345_v61 = vld [vmem:[#allocation4 + $0x3e8] sm:$0xff] }
 0x108   :  { %2294 = vmatpush1.bf16.msra.mxu0 %v6511_v62  ;;  %2746 = vmatpush1.bf16.msra.mxu1 %v6514_v63  ;;  %v6565_v62 = vld [vmem:[#allocation6 + $0x780] ss:$16 sps:$4 sm:$0xff]   ;;  %v6568_v63 = vld [vmem:[#allocation6 + $0x788] ss:$16 sps:$4 sm:$0xff]   ;;  %v409_v5 = vpack.c.bf16 %v345_v61, %v337_v60 }
 0x109   :  { %2295 = vmatprep.subr.bf16.mxu0 %v6519_v2  ;;  %2747 = vmatprep.subr.bf16.mxu1 %v6522_v3  ;;  %v6576_v2 = vld [vmem:[#allocation6 + $0x7ac] ss:$16 sps:$4 sm:$0xff]   ;;  %v6571_v3 = vld [vmem:[#allocation6 + $0x7a0] ss:$16 sps:$4 sm:$0xff]  }
 0x10a   :  { %v6607_v57 = vld [vmem:[#allocation8 + $0x60] ss:$8 sps:$4 sm:$0xff]   ;;  %v298_v60 = vld [vmem:[#allocation4 + $0x270] sm:$0xff]  ;;  %v307_v61 = vld [vmem:[#allocation4 + $0x2b8] sm:$0xff] }
 0x10b   :  { %2227 = vmatmul.mubr.bf16.gmra.mrb[8].mxu0 %v368_v4  ;;  %2679 = vmatmul.mubr.bf16.gmra.mrb[8].mxu1 %v368_v4  ;;  %v6574_v4 = vld [vmem:[#allocation6 + $0x7a8] ss:$16 sps:$4 sm:$0xff]  }
 0x10c   :  { %2296 = vmatpush1.bf16.msra.mxu0 %v6517_v7  ;;  %2748 = vmatpush1.bf16.msra.mxu1 %v6520_v8  ;;  %v344_v7 = vld [vmem:[#allocation4 + $0x3e0] sm:$0xff] }
 0x10d   :  { %2297 = vmatprep.subr.bf16.mxu0 %v6525_v9  ;;  %2749 = vmatprep.subr.bf16.mxu1 %v6528_v10  ;;  %v6579_v8 = vld [vmem:[#allocation6 + $0x7c4] ss:$16 sps:$4 sm:$0xff]   ;;  %v6582_v9 = vld [vmem:[#allocation6 + $0x7cc] ss:$16 sps:$4 sm:$0xff]   ;;  %v408_v14 = vpack.c.bf16 %v344_v7, %v336_v6 }
 0x10e   :  { %2236 = vmatprep.mubr.bf16.mxu0 %v377_v11  ;;  %2688 = vmatprep.mubr.bf16.mxu1 %v377_v11  ;;  %v227_v10 = vld [vmem:[#allocation4 + $0x38] sm:$0xff]  ;;  %v314_v6 = vld [vmem:[#allocation4 + $0x2f0] sm:$0xff] }
 0x10f   :  { %v235_v11 = vld [vmem:[#allocation4 + $0x78] sm:$0xff] }
 0x110   :  { %2298 = vmatpush1.bf16.msra.mxu0 %v6523_v12  ;;  %2750 = vmatpush1.bf16.msra.mxu1 %v6526_v13  ;;  %v6577_v12 = vld [vmem:[#allocation6 + $0x7c0] ss:$16 sps:$4 sm:$0xff]   ;;  %v6580_v13 = vld [vmem:[#allocation6 + $0x7c8] ss:$16 sps:$4 sm:$0xff]  }
 0x111   :  { %2299 = vmatprep.subr.bf16.mxu0 %v6531_v16  ;;  %2751 = vmatprep.subr.bf16.mxu1 %v6534_v17  ;;  %v6588_v16 = vld [vmem:[#allocation6 + $0x7ec] ss:$16 sps:$4 sm:$0xff]   ;;  %v6583_v17 = vld [vmem:[#allocation6 + $0x7e0] ss:$16 sps:$4 sm:$0xff]  }
 0x112   :  { %v323_v7 = vld [vmem:[#allocation4 + $0x338] sm:$0xff] }
 0x113   :  { %2237 = vmatmul.mubr.bf16.gmra.mrb[12].mxu0 %v376_v20  ;;  %2689 = vmatmul.mubr.bf16.gmra.mrb[12].mxu1 %v376_v20  ;;  %v226_v20 = vld [vmem:[#allocation4 + $0x30] sm:$0xff] }
 0x114   :  { %2300 = vmatpush1.bf16.msra.mxu0 %v6529_v18  ;;  %2752 = vmatpush1.bf16.msra.mxu1 %v6532_v19  ;;  %v6586_v18 = vld [vmem:[#allocation6 + $0x7e8] ss:$16 sps:$4 sm:$0xff]   ;;  %v355_v19 = vpack.c.bf16 %v235_v11, %v227_v10 }
 0x115   :  { %2301 = vmatprep.subr.bf16.mxu0 %v6537_v23  ;;  %2753 = vmatprep.subr.bf16.mxu1 %v6540_v24  ;;  %v251_v23 = vld [vmem:[#allocation4 + $0xf8] sm:$0xff]  ;;  %v6591_v24 = vld [vmem:[#allocation8 + $0x4] ss:$8 sps:$4 sm:$0xff]  }
 0x116   :  { %2246 = vmatprep.mubr.bf16.mxu0 %v385_v27  ;;  %2698 = vmatprep.mubr.bf16.mxu1 %v385_v27  ;;  %v363_v27 = vpack.c.bf16 %v251_v23, %v243_v22 }
 0x118   :  { %2302 = vmatpush1.bf16.msra.mxu0 %v6535_v25  ;;  %2754 = vmatpush1.bf16.msra.mxu1 %v6538_v26  ;;  %v354_v25 = vpack.c.bf16 %v234_v21, %v226_v20  ;;  %v6589_v26 = vld [vmem:[#allocation8] ss:$8 sps:$4 sm:$0xff]   ;;  %v3049_v21 = vlaneseq }
 0x119   :  { %2303 = vmatprep.subr.bf16.mxu0 %v6543_v30  ;;  %2755 = vmatprep.subr.bf16.mxu1 %v6546_v31  ;;  %v250_v30 = vld [vmem:[#allocation4 + $0xf0] sm:$0xff]  ;;  %v259_v31 = vld [vmem:[#allocation4 + $0x138] sm:$0xff] }
 0x11a   :  { %v362_v35 = vpack.c.bf16 %v250_v30, %v242_v29  ;;  %v7255_v22 = vshrl.u32 %v3049_v21, 7  ;;  %v6619_v29 = vld [vmem:[#allocation8 + $0xa0] ss:$8 sps:$4 sm:$0xff]   ;;  %v6624_v30 = vld [vmem:[#allocation8 + $0xb4] ss:$8 sps:$4 sm:$0xff]  }
 0x11b   :  { %2247 = vmatmul.mubr.bf16.gmra.mrb[16].mxu0 %v384_v34  ;;  %2699 = vmatmul.mubr.bf16.gmra.mrb[16].mxu1 %v384_v34  ;;  %v6597_v34 = vld [vmem:[#allocation8 + $0x24] ss:$8 sps:$4 sm:$0xff]  }
 0x11c   :  { %2304 = vmatpush1.bf16.msra.mxu0 %v6541_v32  ;;  %2756 = vmatpush1.bf16.msra.mxu1 %v6544_v33  ;;  %v267_v32 = vld [vmem:[#allocation4 + $0x178] sm:$0xff]  ;;  %8222 = vst [vmem:[#allocation11_spill] sm:$0xff] %v7255_v22  ;;  %v3059_v23 = vsub.s32 2, %v7255_v22 }
 0x11d   :  { %2305 = vmatprep.subr.bf16.mxu0 %v6549_v37  ;;  %2757 = vmatprep.subr.bf16.mxu1 %v6552_v38  ;;  %v6592_v33 = vld [vmem:[#allocation8 + $0x10] ss:$8 sps:$4 sm:$0xff]   ;;  %v371_v36 = vpack.c.bf16 %v267_v32, %v259_v31  ;;  %v6595_v37 = vld [vmem:[#allocation8 + $0x20] ss:$8 sps:$4 sm:$0xff]   ;;  %v6600_v38 = vld [vmem:[#allocation8 + $0x34] ss:$8 sps:$4 sm:$0xff]  }
 0x11e   :  { %2256 = vmatprep.mubr.bf16.mxu0 %v393_v41  ;;  %2708 = vmatprep.mubr.bf16.mxu1 %v393_v41  ;;  %v275_v41 = vld [vmem:[#allocation4 + $0x1b8] sm:$0xff]  ;;  %v6627_v32 = vld [vmem:[#allocation8 + $0xc4] ss:$8 sps:$4 sm:$0xff]  }
 0x11f   :  { %v379_v46 = vpack.c.bf16 %v283_v42, %v275_v41  ;;  %v6622_v31 = vld [vmem:[#allocation8 + $0xb0] ss:$8 sps:$4 sm:$0xff]   ;;  %v8211_v41 = vsub.s32 0, %v7255_v22  ;;  %v8210_v42 = vsub.s32 1, %v7255_v22 }
 0x120   :  { %2306 = vmatpush1.bf16.msra.mxu0 %v6547_v39  ;;  %2758 = vmatpush1.bf16.msra.mxu1 %v6550_v40  ;;  %v258_v39 = vld [vmem:[#allocation4 + $0x130] sm:$0xff] }
 0x121   :  { %2307 = vmatprep.subr.bf16.mxu0 %v6555_v44  ;;  %2759 = vmatprep.subr.bf16.mxu1 %v6558_v45  ;;  %v266_v40 = vld [vmem:[#allocation4 + $0x170] sm:$0xff]  ;;  %v6603_v44 = vld [vmem:[#allocation8 + $0x44] ss:$8 sps:$4 sm:$0xff]  }
 0x122   :  { %v370_v45 = vpack.c.bf16 %v266_v40, %v258_v39  ;;  %v6634_v39 = vld [vmem:[#allocation8 + $0xf0] ss:$8 sps:$4 sm:$0xff]   ;;  %v6639_v40 = vld [vmem:[#allocation8 + $0x104] ss:$8 sps:$4 sm:$0xff]  }
 0x123   :  { %2257 = vmatmul.mubr.bf16.gmra.mrb[20].mxu0 %v392_v50  ;;  %2709 = vmatmul.mubr.bf16.gmra.mrb[20].mxu1 %v392_v50  ;;  %v282_v50 = vld [vmem:[#allocation4 + $0x1f0] sm:$0xff] }
 0x124   :  { %2308 = vmatpush1.bf16.msra.mxu0 %v6553_v48  ;;  %2760 = vmatpush1.bf16.msra.mxu1 %v6556_v49  ;;  %v6606_v48 = vld [vmem:[#allocation8 + $0x54] ss:$8 sps:$4 sm:$0xff]  }
 0x125   :  { %2309 = vmatprep.subr.bf16.mxu0 %v6561_v51  ;;  %2761 = vmatprep.subr.bf16.mxu1 %v6564_v52  ;;  %v274_v49 = vld [vmem:[#allocation4 + $0x1b0] sm:$0xff]  ;;  %v291_v51 = vld [vmem:[#allocation4 + $0x238] sm:$0xff] }
 0x126   :  { %2266 = vmatprep.mubr.bf16.mxu0 %v401_v55  ;;  %2718 = vmatprep.mubr.bf16.mxu1 %v401_v55  ;;  %v299_v52 = vld [vmem:[#allocation4 + $0x278] sm:$0xff]  ;;  %v378_v55 = vpack.c.bf16 %v282_v50, %v274_v49 }
 0x127   :  { %v387_v56 = vpack.c.bf16 %v299_v52, %v291_v51 }
 0x128   :  { %2310 = vmatpush1.bf16.msra.mxu0 %v6559_v53  ;;  %2762 = vmatpush1.bf16.msra.mxu1 %v6562_v54  ;;  %v6604_v53 = vld [vmem:[#allocation8 + $0x50] ss:$8 sps:$4 sm:$0xff]   ;;  %v6609_v54 = vld [vmem:[#allocation8 + $0x64] ss:$8 sps:$4 sm:$0xff]  }
 0x129   :  { %2311 = vmatprep.subr.bf16.mxu0 %v6567_v58  ;;  %2763 = vmatprep.subr.bf16.mxu1 %v6570_v59  ;;  %v6612_v58 = vld [vmem:[#allocation8 + $0x74] ss:$8 sps:$4 sm:$0xff]  }
 0x12a   :  { %v290_v59 = vld [vmem:[#allocation4 + $0x230] sm:$0xff] }
 0x12b   :  { %2267 = vmatmul.mubr.bf16.gmra.mrb[24].mxu0 %v400_v0  ;;  %2719 = vmatmul.mubr.bf16.gmra.mrb[24].mxu1 %v400_v0  ;;  %v6615_v0 = vld [vmem:[#allocation8 + $0x84] ss:$8 sps:$4 sm:$0xff]  }
 0x12c   :  { %2312 = vmatpush1.bf16.msra.mxu0 %v6565_v62  ;;  %2764 = vmatpush1.bf16.msra.mxu1 %v6568_v63  ;;  %v315_v62 = vld [vmem:[#allocation4 + $0x2f8] sm:$0xff] }
 0x12d   :  { %2313 = vmatprep.subr.bf16.mxu0 %v6573_v1  ;;  %2765 = vmatprep.subr.bf16.mxu1 %v6576_v2  ;;  %v6610_v63 = vld [vmem:[#allocation8 + $0x70] ss:$8 sps:$4 sm:$0xff]   ;;  %v386_v1 = vpack.c.bf16 %v298_v60, %v290_v59  ;;  %v395_v2 = vpack.c.bf16 %v315_v62, %v307_v61 }
 0x12e   :  { %2276 = vmatprep.mubr.bf16.mxu0 %v409_v5  ;;  %2728 = vmatprep.mubr.bf16.mxu1 %v409_v5  ;;  %v306_v5 = vld [vmem:[#allocation4 + $0x2b0] sm:$0xff] }
 0x12f   :  { %v394_v10 = vpack.c.bf16 %v314_v6, %v306_v5 }
 0x130   :  { %2314 = vmatpush1.bf16.msra.mxu0 %v6571_v3  ;;  %2766 = vmatpush1.bf16.msra.mxu1 %v6574_v4  ;;  %v6613_v3 = vld [vmem:[#allocation8 + $0x80] ss:$8 sps:$4 sm:$0xff]   ;;  %v6618_v4 = vld [vmem:[#allocation8 + $0x94] ss:$8 sps:$4 sm:$0xff]  }
 0x131   :  { %2315 = vmatprep.subr.bf16.mxu0 %v6579_v8  ;;  %2767 = vmatprep.subr.bf16.mxu1 %v6582_v9  ;;  %v331_v8 = vld [vmem:[#allocation4 + $0x378] sm:$0xff] }
 0x132   :  { %v6616_v9 = vld [vmem:[#allocation8 + $0x90] ss:$8 sps:$4 sm:$0xff]   ;;  %v403_v11 = vpack.c.bf16 %v331_v8, %v323_v7 }
 0x133   :  { %2277 = vmatmul.mubr.bf16.gmra.mrb[28].mxu0 %v408_v14  ;;  %2729 = vmatmul.mubr.bf16.gmra.mrb[28].mxu1 %v408_v14  ;;  %v339_v14 = vld [vmem:[#allocation4 + $0x3b8] sm:$0xff] }
 0x134   :  { %2316 = vmatpush1.bf16.msra.mxu0 %v6577_v12  ;;  %2768 = vmatpush1.bf16.msra.mxu1 %v6580_v13  ;;  %v322_v12 = vld [vmem:[#allocation4 + $0x330] sm:$0xff] }
 0x135   :  { %2317 = vmatprep.subr.bf16.mxu0 %v6585_v15  ;;  %2769 = vmatprep.subr.bf16.mxu1 %v6588_v16  ;;  %v330_v13 = vld [vmem:[#allocation4 + $0x370] sm:$0xff]  ;;  %v347_v15 = vld [vmem:[#allocation4 + $0x3f8] sm:$0xff] }
 0x136   :  { %2319 = vmatprep.mubr.bf16.mxu0 %v355_v19  ;;  %2771 = vmatprep.mubr.bf16.mxu1 %v355_v19  ;;  %v402_v16 = vpack.c.bf16 %v330_v13, %v322_v12  ;;  %v346_v19 = vld [vmem:[#allocation4 + $0x3f0] sm:$0xff] }
 0x138   :  { %2318 = vmatpush1.bf16.msra.mxu0 %v6583_v17  ;;  %2770 = vmatpush1.bf16.msra.mxu1 %v6586_v18  ;;  %v411_v17 = vpack.c.bf16 %v347_v15, %v339_v14  ;;  %v338_v18 = vld [vmem:[#allocation4 + $0x3b0] sm:$0xff] }
 0x139   :  { %3881 = vmatprep.subr.bf16.mxu0 %v6591_v24  ;;  %v410_v20 = vpack.c.bf16 %v346_v19, %v338_v18  ;;  %v3047_v24 = vld [vmem:[%s8198_s2] sm:$0xf] }
 0x13b   :  { %2320 = vmatmul.mubr.bf16.vlgmr.msra.gmra.mrb[0].mxu0 %v354_v25  ;;  %2772 = vmatmul.mubr.bf16.vlgmr.msra.gmra.mrb[0].mxu1 %v354_v25  ;;  %v7261_v25 = vrot.slane %v3047_v24, %v3059_v23 }
 0x13c   :  { %2329 = vmatprep.mubr.bf16.mxu0 %v363_v27  ;;  %2781 = vmatprep.mubr.bf16.mxu1 %v363_v27 }
 0x13d   :  { %3882 = vmatpush1.bf16.msra.mxu0 %v6589_v26  ;;  %v3063_v26 = vsub.s32 3, %v7255_v22 }
 0x13e   :  { %3883 = vmatprep.subr.bf16.mxu0 %v6594_v28  ;;  %v6621_v28 = vld [vmem:[#allocation8 + $0xa4] ss:$8 sps:$4 sm:$0xff]  }
 0x13f   :  { %v7264_v27 = vrot.slane %v3047_v24, %v3063_v26 }
 0x141   :  { %3884 = vmatpush1.bf16.msra.mxu0 %v6592_v33  ;;  %v6625_v33 = vld [vmem:[#allocation8 + $0xc0] ss:$8 sps:$4 sm:$0xff]  }
 0x142   :  { %3885 = vmatprep.subr.bf16.mxu0 %v6597_v34  ;;  %v6630_v34 = vld [vmem:[#allocation8 + $0xd4] ss:$8 sps:$4 sm:$0xff]  }
 0x143   :  { %2330 = vmatmul.mubr.bf16.gmra.mrb[4].mxu0 %v362_v35  ;;  %2782 = vmatmul.mubr.bf16.gmra.mrb[4].mxu1 %v362_v35  ;;  %v6628_v35 = vld [vmem:[#allocation8 + $0xd0] ss:$8 sps:$4 sm:$0xff]  }
 0x144   :  { %2339 = vmatprep.mubr.bf16.mxu0 %v371_v36  ;;  %2791 = vmatprep.mubr.bf16.mxu1 %v371_v36  ;;  %v6633_v36 = vld [vmem:[#allocation8 + $0xe4] ss:$8 sps:$4 sm:$0xff]  }
 0x145   :  { %3886 = vmatpush1.bf16.msra.mxu0 %v6595_v37  ;;  %v6631_v37 = vld [vmem:[#allocation8 + $0xe0] ss:$8 sps:$4 sm:$0xff]  }
 0x146   :  { %3887 = vmatprep.subr.bf16.mxu0 %v6600_v38  ;;  %v6636_v38 = vld [vmem:[#allocation8 + $0xf4] ss:$8 sps:$4 sm:$0xff]  }
 0x149   :  { %3888 = vmatpush1.bf16.msra.mxu0 %v6598_v43  ;;  %v7270_v43 = vrot.slane %v3047_v24, %v8211_v41 }
 0x14a   :  { %3889 = vmatprep.subr.bf16.mxu0 %v6603_v44  ;;  %v7274_v44 = vrot.slane %v3047_v24, %v8210_v42 }
 0x14b   :  { %2340 = vmatmul.mubr.bf16.gmra.mrb[8].mxu0 %v370_v45  ;;  %2792 = vmatmul.mubr.bf16.gmra.mrb[8].mxu1 %v370_v45 }
 0x14c   :  { %2349 = vmatprep.mubr.bf16.mxu0 %v379_v46  ;;  %2801 = vmatprep.mubr.bf16.mxu1 %v379_v46 }
 0x14d   :  { %3890 = vmatpush1.bf16.msra.mxu0 %v6601_v47 }
 0x14e   :  { %3891 = vmatprep.subr.bf16.mxu0 %v6606_v48 }
 0x151   :  { %3892 = vmatpush1.bf16.msra.mxu0 %v6604_v53 }
 0x152   :  { %3893 = vmatprep.subr.bf16.mxu0 %v6609_v54 }
 0x153   :  { %2350 = vmatmul.mubr.bf16.gmra.mrb[12].mxu0 %v378_v55  ;;  %2802 = vmatmul.mubr.bf16.gmra.mrb[12].mxu1 %v378_v55 }
 0x154   :  { %2359 = vmatprep.mubr.bf16.mxu0 %v387_v56  ;;  %2811 = vmatprep.mubr.bf16.mxu1 %v387_v56 }
 0x155   :  { %3894 = vmatpush1.bf16.msra.mxu0 %v6607_v57 }
 0x156   :  { %3895 = vmatprep.subr.bf16.mxu0 %v6612_v58 }
 0x159   :  { %3896 = vmatpush1.bf16.msra.mxu0 %v6610_v63 }
 0x15a   :  { %3897 = vmatprep.subr.bf16.mxu0 %v6615_v0 }
 0x15b   :  { %2360 = vmatmul.mubr.bf16.gmra.mrb[16].mxu0 %v386_v1  ;;  %2812 = vmatmul.mubr.bf16.gmra.mrb[16].mxu1 %v386_v1 }
 0x15c   :  { %2369 = vmatprep.mubr.bf16.mxu0 %v395_v2  ;;  %2821 = vmatprep.mubr.bf16.mxu1 %v395_v2 }
 0x15d   :  { %3898 = vmatpush1.bf16.msra.mxu0 %v6613_v3 }
 0x15e   :  { %3899 = vmatprep.subr.bf16.mxu0 %v6618_v4 }
 0x161   :  { %3900 = vmatpush1.bf16.msra.mxu0 %v6616_v9 }
 0x162   :  { %3901 = vmatprep.subr.bf16.mxu0 %v6621_v28 }
 0x163   :  { %2370 = vmatmul.mubr.bf16.gmra.mrb[20].mxu0 %v394_v10  ;;  %2822 = vmatmul.mubr.bf16.gmra.mrb[20].mxu1 %v394_v10 }
 0x164   :  { %2379 = vmatprep.mubr.bf16.mxu0 %v403_v11  ;;  %2831 = vmatprep.mubr.bf16.mxu1 %v403_v11 }
 0x165   :  { %3902 = vmatpush1.bf16.msra.mxu0 %v6619_v29 }
 0x166   :  { %3903 = vmatprep.subr.bf16.mxu0 %v6624_v30 }
 0x169   :  { %3904 = vmatpush1.bf16.msra.mxu0 %v6622_v31 }
 0x16a   :  { %3905 = vmatprep.subr.bf16.mxu0 %v6627_v32 }
 0x16b   :  { %2380 = vmatmul.mubr.bf16.gmra.mrb[24].mxu0 %v402_v16  ;;  %2832 = vmatmul.mubr.bf16.gmra.mrb[24].mxu1 %v402_v16 }
 0x16c   :  { %2389 = vmatprep.mubr.bf16.mxu0 %v411_v17  ;;  %2841 = vmatprep.mubr.bf16.mxu1 %v411_v17 }
 0x16d   :  { %3906 = vmatpush1.bf16.msra.mxu0 %v6625_v33 }
 0x16e   :  { %3907 = vmatprep.subr.bf16.mxu0 %v6630_v34 }
 0x171   :  { %3908 = vmatpush1.bf16.msra.mxu0 %v6628_v35 }
 0x172   :  { %3909 = vmatprep.subr.bf16.mxu0 %v6633_v36 }
 0x173   :  { %2390 = vmatmul.mubr.bf16.gmra.mrb[28].mxu0 %v410_v20  ;;  %2842 = vmatmul.mubr.bf16.gmra.mrb[28].mxu1 %v410_v20 }
 0x175   :  { %3910 = vmatpush1.bf16.msra.mxu0 %v6631_v37 }
 0x176   :  { %3911 = vmatprep.subr.bf16.mxu0 %v6636_v38 }
 0x179   :  { %3912 = vmatpush1.bf16.msra.mxu0 %v6634_v39 }
 0x17a   :  { %3994 = vmatprep.subr.bf16.mxu0 %v6639_v40 }
 0x20e   :  { %v2321_v45 = vpop.f32.mrb[0].mxu0  ;;  %v2773_v46 = vpop.f32.mrb[0].mxu1 }
 0x20f   :  { %v3069_v47 = vadd.f32 %v7270_v43, %v2321_v45  ;;  %v3071_v48 = vadd.f32 %v7261_v25, %v2773_v46  ;;  %v2323_v49 = vpop.f32.mrb[1].mxu0  ;;  %v2775_v50 = vpop.f32.mrb[1].mxu1 }
 0x210   :  { %v3070_v51 = vadd.f32 %v7274_v44, %v2323_v49  ;;  %v3072_v52 = vadd.f32 %v7264_v27, %v2775_v50  ;;  %v2325_v53 = vpop.f32.mrb[2].mxu0  ;;  %v2777_v54 = vpop.f32.mrb[2].mxu1 }
 0x211   :  { %v3197_v55 = vmul.f32 0.70710677, %v3069_v47  ;;  %v3199_v56 = vmul.f32 0.70710677, %v3071_v48  ;;  %v3073_v59 = vadd.f32 %v7270_v43, %v2325_v53  ;;  %v3075_v60 = vadd.f32 %v7261_v25, %v2777_v54  ;;  %v2327_v61 = vpop.f32.mrb[3].mxu0  ;;  %v2779_v62 = vpop.f32.mrb[3].mxu1 }
 0x212   :  { %v3198_v57 = vmul.f32 0.70710677, %v3070_v51  ;;  %v3200_v58 = vmul.f32 0.70710677, %v3072_v52  ;;  %v3074_v63 = vadd.f32 %v7274_v44, %v2327_v61  ;;  %v3076_v0 = vadd.f32 %v7264_v27, %v2779_v62 }
 0x213   :  { %6715 = verf.f32 %v3197_v55  ;;  %v3201_v1 = vmul.f32 0.70710677, %v3073_v59  ;;  %v3203_v2 = vmul.f32 0.70710677, %v3075_v60  ;;  %v3133_v19 = vmul.f32 0.5, %v3069_v47 }
 0x214   :  { %6717 = verf.f32 %v3199_v56  ;;  %v3202_v3 = vmul.f32 0.70710677, %v3074_v63  ;;  %v3204_v5 = vmul.f32 0.70710677, %v3076_v0  ;;  %v3135_v23 = vmul.f32 0.5, %v3071_v48 }
 0x215   :  { %6719 = verf.f32 %v3198_v57  ;;  %v7290_v29 = vmul.f32 0.5, %v3070_v51  ;;  %v3136_v34 = vmul.f32 0.5, %v3072_v52  ;;  %v3137_v39 = vmul.f32 0.5, %v3073_v59 }
 0x216   :  { %6721 = verf.f32 %v3200_v58  ;;  %v2331_v4 = vpop.f32.mrb[4].mxu0  ;;  %v2783_v7 = vpop.f32.mrb[4].mxu1  ;;  %v3139_v40 = vmul.f32 0.5, %v3075_v60  ;;  %v7296_v45 = vmul.f32 0.5, %v3074_v63  ;;  %v7298_v46 = vmul.f32 0.5, %v3076_v0 }
 0x217   :  { %6723 = verf.f32 %v3201_v1  ;;  %v3077_v6 = vadd.f32 %v7270_v43, %v2331_v4  ;;  %v2333_v8 = vpop.f32.mrb[5].mxu0  ;;  %v3079_v9 = vadd.f32 %v7261_v25, %v2783_v7  ;;  %v2785_v11 = vpop.f32.mrb[5].mxu1 }
 0x218   :  { %6725 = verf.f32 %v3203_v2  ;;  %v3078_v10 = vadd.f32 %v7274_v44, %v2333_v8  ;;  %v2335_v12 = vpop.f32.mrb[6].mxu0  ;;  %v3080_v14 = vadd.f32 %v7264_v27, %v2785_v11  ;;  %v2787_v15 = vpop.f32.mrb[6].mxu1 }
 0x219   :  { %6727 = verf.f32 %v3202_v3  ;;  %v3205_v13 = vmul.f32 0.70710677, %v3077_v6  ;;  %v2337_v16 = vpop.f32.mrb[7].mxu0  ;;  %v3207_v17 = vmul.f32 0.70710677, %v3079_v9  ;;  %v2789_v18 = vpop.f32.mrb[7].mxu1  ;;  %v3081_v24 = vadd.f32 %v7270_v43, %v2335_v12 }
 0x21a   :  { %6729 = verf.f32 %v3204_v5  ;;  %v3206_v20 = vmul.f32 0.70710677, %v3078_v10  ;;  %v3208_v21 = vmul.f32 0.70710677, %v3080_v14  ;;  %v3083_v26 = vadd.f32 %v7261_v25, %v2787_v15 }
 0x21b   :  { %6731 = verf.f32 %v3205_v13  ;;  %v3082_v30 = vadd.f32 %v7274_v44, %v2337_v16  ;;  %v7294_v31 = vadd.f32 %v7264_v27, %v2789_v18  ;;  %v3209_v35 = vmul.f32 0.70710677, %v3081_v24 }
 0x21c   :  { %6733 = verf.f32 %v3207_v17  ;;  %v7300_v49 = vmul.f32 0.5, %v3077_v6  ;;  %v7302_v50 = vmul.f32 0.5, %v3079_v9  ;;  %v3211_v51 = vmul.f32 0.70710677, %v3083_v26 }
 0x21d   :  { %v6716_v28 = vpop.eup %6715  ;;  %6735 = verf.f32 %v3206_v20  ;;  %v7304_v56 = vmul.f32 0.5, %v3078_v10  ;;  %v3210_v57 = vmul.f32 0.70710677, %v3082_v30  ;;  %v7310_v63 = vmul.f32 0.5, %v3080_v14 }
 0x21e   :  { %v6718_v32 = vpop.eup %6717  ;;  %v3325_v33 = vadd.f32 1.0, %v6716_v28  ;;  %6737 = verf.f32 %v3208_v21  ;;  %v2341_v36 = vpop.f32.mrb[8].mxu0  ;;  %v3212_v3 = vmul.f32 0.70710677, %v7294_v31  ;;  %v7325_v16 = vmul.f32 0.5, %v3081_v24 }
 0x21f   :  { %v2793_v37 = vpop.f32.mrb[8].mxu1  ;;  %v6720_v38 = vpop.eup %6719  ;;  %v3327_v55 = vadd.f32 1.0, %v6718_v32  ;;  %6739 = verf.f32 %v3209_v35  ;;  %v3085_v4 = vadd.f32 %v7270_v43, %v2341_v36  ;;  %v7327_v17 = vmul.f32 0.5, %v3083_v26 }
 0x220   :  { %v2343_v47 = vpop.f32.mrb[9].mxu0  ;;  %v6722_v48 = vpop.eup %6721  ;;  %v7308_v61 = vmul.f32 %v3325_v33, %v3133_v19  ;;  %v3087_v5 = vadd.f32 %v7261_v25, %v2793_v37  ;;  %v3326_v7 = vadd.f32 1.0, %v6720_v38  ;;  %6741 = verf.f32 %v3211_v51 }
 0x221   :  { %v2795_v53 = vpop.f32.mrb[9].mxu1  ;;  %v2345_v52 = vpop.f32.mrb[10].mxu0  ;;  %v3328_v8 = vadd.f32 1.0, %v6722_v48  ;;  %v7319_v11 = vmul.f32 %v3327_v55, %v3135_v23  ;;  %6743 = verf.f32 %v3210_v57  ;;  %v3213_v13 = vmul.f32 0.70710677, %v3085_v4 }
 0x222   :  { %v6724_v54 = vpop.eup %6723  ;;  %v2797_v58 = vpop.f32.mrb[10].mxu1  ;;  %v3086_v18 = vadd.f32 %v7274_v44, %v2343_v47  ;;  %v7334_v32 = vmul.f32 0.5, %v3082_v30  ;;  %6745 = verf.f32 %v3212_v3  ;;  %v7339_v26 = vmul.f32 %v3326_v7, %v7290_v29 }
 0x223   :  { %v7306_v59 = vpop.f32.mrb[11].mxu0  ;;  %v6726_v60 = vpop.eup %6725  ;;  %v3329_v62 = vadd.f32 1.0, %v6724_v54  ;;  %8223 = vst [vmem:[#allocation12_spill] sm:$0xff] %v7319_v11  ;;  %v7341_v36 = vmul.f32 %v3328_v8, %v3136_v34  ;;  %v7344_v37 = vmul.f32 0.5, %v7294_v31  ;;  %v3215_v38 = vmul.f32 0.70710677, %v3087_v5 }
 0x224   :  { %v7312_v0 = vpop.f32.mrb[11].mxu1  ;;  %v6728_v1 = vpop.eup %6727  ;;  %v3331_v2 = vadd.f32 1.0, %v6726_v60  ;;  %6747 = verf.f32 %v3213_v13  ;;  %v3088_v48 = vadd.f32 %v7264_v27, %v2795_v53  ;;  %v3214_v55 = vmul.f32 0.70710677, %v3086_v18 }
 0x225   :  { %v6730_v6 = vpop.eup %6729  ;;  %v7317_v9 = vmul.f32 %v3329_v62, %v3137_v39  ;;  %v3330_v28 = vadd.f32 1.0, %v6728_v1  ;;  %8225 = vst [vmem:[#allocation14_spill] sm:$0xff] %v7341_v36  ;;  %v3089_v34 = vadd.f32 %v7270_v43, %v2345_v52  ;;  %v3091_v31 = vadd.f32 %v7261_v25, %v2797_v58 }
 0x226   :  { %v6732_v10 = vpop.eup %6731  ;;  %v7321_v12 = vmul.f32 %v3331_v2, %v3139_v40  ;;  %v2351_v19 = vpop.f32.mrb[12].mxu0  ;;  %v3332_v47 = vadd.f32 1.0, %v6730_v6  ;;  %v7356_v1 = vmul.f32 0.5, %v3085_v4  ;;  %v7358_v3 = vmul.f32 0.5, %v3087_v5 }
 0x227   :  { %v6734_v14 = vpop.eup %6733  ;;  %v3453_v15 = vpack.c.bf16 %v7317_v9, %v7308_v61  ;;  %v7330_v20 = vpop.f32.mrb[12].mxu1  ;;  %v3333_v30 = vadd.f32 1.0, %v6732_v10  ;;  %v3394_v57 = vmul.f32 %v3330_v28, %v7296_v45  ;;  %6749 = verf.f32 %v3215_v38 }
 0x228   :  { %8224 = vst [vmem:[#allocation13_spill] sm:$0xff] %v7321_v12  ;;  %v6736_v21 = vpop.eup %6735  ;;  %v2353_v33 = vpop.f32.mrb[13].mxu0  ;;  %v3335_v29 = vadd.f32 1.0, %v6734_v14  ;;  %v3216_v53 = vmul.f32 0.70710677, %v3088_v48  ;;  %v7361_v7 = vmul.f32 %v3332_v47, %v7298_v46  ;;  %v7366_v52 = vmul.f32 0.5, %v3086_v18 }
 0x229   :  { %v7336_v35 = vpop.f32.mrb[13].mxu1  ;;  %v6738_v24 = vpop.eup %6737  ;;  %v3334_v60 = vadd.f32 1.0, %v6736_v21  ;;  %v3217_v6 = vmul.f32 0.70710677, %v3089_v34  ;;  %v7364_v8 = vmul.f32 %v3333_v30, %v7300_v49  ;;  %v3219_v58 = vmul.f32 0.70710677, %v3091_v31 }
 0x22a   :  { %v2355_v39 = vpop.f32.mrb[14].mxu0  ;;  %v7346_v40 = vpop.f32.mrb[14].mxu1  ;;  %v3336_v62 = vadd.f32 1.0, %v6738_v24  ;;  %8226 = vst [vmem:[#allocation15_spill] sm:$0xff] %v7361_v7  ;;  %v7369_v10 = vmul.f32 %v3335_v29, %v7302_v50  ;;  %6751 = verf.f32 %v3214_v55  ;;  %v3090_v4 = vadd.f32 %v7274_v44, %v7306_v59 }
 0x22b   :  { %v7349_v51 = vpop.f32.mrb[15].mxu0  ;;  %v7351_v54 = vpop.f32.mrb[15].mxu1  ;;  %v3092_v5 = vadd.f32 %v7264_v27, %v7312_v0  ;;  %v7380_v14 = vmul.f32 %v3334_v60, %v7304_v56  ;;  %6753 = verf.f32 %v3216_v53  ;;  %v3093_v50 = vadd.f32 %v7270_v43, %v2351_v19 }
 0x22c   :  { %v6740_v2 = vpop.eup %6739  ;;  %8227 = vst [vmem:[#allocation16_spill] sm:$0xff] %v7369_v10  ;;  %v7383_v18 = vmul.f32 %v3336_v62, %v7310_v63  ;;  %v7390_v0 = vmul.f32 0.5, %v3088_v48  ;;  %6755 = verf.f32 %v3217_v6  ;;  %v3218_v24 = vmul.f32 0.70710677, %v3090_v4 }
 0x22d   :  { %v6742_v45 = vpop.eup %6741  ;;  %v3337_v28 = vadd.f32 1.0, %v6740_v2  ;;  %6757 = verf.f32 %v3219_v58  ;;  %v3220_v63 = vmul.f32 0.70710677, %v3092_v5  ;;  %v3221_v29 = vmul.f32 0.70710677, %v3093_v50 }
 0x22e   :  { %v7375_v13 = vpop.f32.mrb[16].mxu0  ;;  %v7377_v46 = vpop.f32.mrb[16].mxu1  ;;  %8228 = vst [vmem:[#allocation17_spill] sm:$0xff] %v7383_v18  ;;  %v3339_v30 = vadd.f32 1.0, %v6742_v45  ;;  %6759 = verf.f32 %v3218_v24  ;;  %v3095_v60 = vadd.f32 %v7261_v25, %v7330_v20  ;;  %v3094_v48 = vadd.f32 %v7274_v44, %v2353_v33  ;;  %v6637_v45 = vld [vmem:[#allocation8 + $0x100] ss:$8 sps:$4 sm:$0xff]  }
 0x22f   :  { %v6744_v49 = vpop.eup %6743  ;;  %v7386_v21 = vpop.f32.mrb[17].mxu0  ;;  %6761 = verf.f32 %v3220_v63  ;;  %v7405_v53 = vadd.f32 %v7264_v27, %v7336_v35  ;;  %v3454_v6 = vpack.c.bf16 %v3394_v57, %v7339_v26  ;;  %v7409_v58 = vadd.f32 %v7270_v43, %v2355_v39  ;;  %v6642_v33 = vld [vmem:[#allocation8 + $0x114] ss:$8 sps:$4 sm:$0xff]   ;;  %v6640_v26 = vld [vmem:[#allocation8 + $0x110] ss:$8 sps:$4 sm:$0xff]  }
 0x230   :  { %v7388_v59 = vpop.f32.mrb[17].mxu1  ;;  %v7392_v38 = vpop.f32.mrb[18].mxu0  ;;  %v3338_v19 = vadd.f32 1.0, %v6744_v49  ;;  %v7411_v24 = vmul.f32 0.5, %v3089_v34  ;;  %6763 = verf.f32 %v3221_v29  ;;  %v3223_v20 = vmul.f32 0.70710677, %v3095_v60 }
 0x231   :  { %v7394_v47 = vpop.f32.mrb[18].mxu1  ;;  %v6746_v56 = vpop.eup %6745  ;;  %v7414_v42 = vmul.f32 %v3337_v28, %v7325_v16  ;;  %v7417_v63 = vmul.f32 %v3339_v30, %v7327_v17  ;;  %v7419_v35 = vmul.f32 0.5, %v3091_v31  ;;  %v3222_v41 = vmul.f32 0.70710677, %v3094_v48  ;;  %3913 = vmatprep.mubr.bf16.mxu0 %v3454_v6 }
 0x232   :  { %v7396_v55 = vpop.f32.mrb[19].mxu0  ;;  %v7401_v62 = vpop.f32.mrb[19].mxu1  ;;  %v3340_v49 = vadd.f32 1.0, %v6746_v56  ;;  %v7422_v57 = vmul.f32 %v3338_v19, %v7334_v32  ;;  %v7424_v56 = vmul.f32 0.5, %v3090_v4  ;;  %v3224_v29 = vmul.f32 0.70710677, %v7405_v53  ;;  %3914 = vmatmul.mubr.bf16.vlgmr.msra.gmra.mrb[32].mxu0 %v3453_v15 }
 0x233   :  { %v6748_v2 = vpop.eup %6747  ;;  %8229 = vst [vmem:[#allocation18_spill] sm:$0xff] %v7417_v63  ;;  %v7434_v31 = vmul.f32 0.5, %v3092_v5  ;;  %6765 = verf.f32 %v3223_v20  ;;  %v3225_v28 = vmul.f32 0.70710677, %v7409_v58  ;;  %v3099_v32 = vadd.f32 %v7261_v25, %v7346_v40  ;;  %3995 = vmatpush1.bf16.msra.mxu0 %v6637_v45  ;;  %v6645_v5 = vld [vmem:[#allocation8 + $0x124] ss:$8 sps:$4 sm:$0xff]  }
 0x234   :  { %v6750_v39 = vpop.eup %6749  ;;  %v3341_v34 = vadd.f32 1.0, %v6748_v2  ;;  %v7444_v61 = vmul.f32 %v3340_v49, %v7344_v37  ;;  %6767 = verf.f32 %v3222_v41  ;;  %v3098_v9 = vadd.f32 %v7274_v44, %v7349_v51  ;;  %3996 = vmatprep.subr.bf16.mxu0 %v6642_v33 }
 0x235   :  { %v6752_v19 = vpop.eup %6751  ;;  %v3100_v15 = vadd.f32 %v7264_v27, %v7351_v54  ;;  %v3343_v45 = vadd.f32 1.0, %v6750_v39  ;;  %v7454_v20 = vmul.f32 0.5, %v3093_v50  ;;  %6769 = verf.f32 %v3224_v29  ;;  %v6643_v39 = vld [vmem:[#allocation8 + $0x120] ss:$8 sps:$4 sm:$0xff]  }
 0x236   :  { %v7430_v16 = vpop.f32.mrb[20].mxu0  ;;  %v7432_v17 = vpop.f32.mrb[20].mxu1  ;;  %8230 = vst [vmem:[#allocation19_spill] sm:$0xff] %v7444_v61  ;;  %v3227_v37 = vmul.f32 0.70710677, %v3099_v32  ;;  %v7461_v23 = vmul.f32 %v3341_v34, %v7356_v1  ;;  %v7463_v54 = vmul.f32 0.5, %v3095_v60  ;;  %6771 = verf.f32 %v3225_v28 }
 0x237   :  { %v7439_v4 = vpop.f32.mrb[21].mxu0  ;;  %v7441_v30 = vpop.f32.mrb[21].mxu1  ;;  %v3226_v33 = vmul.f32 0.70710677, %v3098_v9  ;;  %v3342_v11 = vadd.f32 1.0, %v6752_v19  ;;  %v7465_v12 = vmul.f32 0.5, %v3094_v48  ;;  %3997 = vmatpush1.bf16.msra.mxu0 %v6640_v26  ;;  %v3101_v10 = vadd.f32 %v7270_v43, %v7375_v13 }
 0x238   :  { %v7450_v2 = vpop.f32.mrb[22].mxu0  ;;  %v7452_v40 = vpop.f32.mrb[22].mxu1  ;;  %6773 = verf.f32 %v3227_v37  ;;  %v3228_v50 = vmul.f32 0.70710677, %v3100_v15  ;;  %v3103_v1 = vadd.f32 %v7261_v25, %v7377_v46  ;;  %3998 = vmatprep.subr.bf16.mxu0 %v6645_v5  ;;  %v6648_v60 = vld [vmem:[#allocation8 + $0x134] ss:$8 sps:$4 sm:$0xff]   ;;  %v7472_v28 = vmul.f32 %v3343_v45, %v7358_v3 }
 0x239   :  { %v6754_v6 = vpop.eup %6753  ;;  %v7456_v49 = vpop.f32.mrb[23].mxu0  ;;  %6775 = verf.f32 %v3226_v33  ;;  %v7475_v48 = vmul.f32 0.5, %v7405_v53  ;;  %v7478_v26 = vmul.f32 0.5, %v7409_v58  ;;  %v6646_v19 = vld [vmem:[#allocation8 + $0x130] ss:$8 sps:$4 sm:$0xff]   ;;  %v3102_v46 = vadd.f32 %v7274_v44, %v7386_v21 }
 0x23a   :  { %v7458_v41 = vpop.f32.mrb[23].mxu1  ;;  %v6756_v51 = vpop.eup %6755  ;;  %v3344_v63 = vadd.f32 1.0, %v6754_v6  ;;  %8231 = vst [vmem:[#allocation20_spill] sm:$0xff] %v7472_v28  ;;  %6777 = verf.f32 %v3228_v50  ;;  %v3229_v33 = vmul.f32 0.70710677, %v3101_v10  ;;  %v7485_v3 = vmul.f32 %v3342_v11, %v7366_v52 }
 0x23b   :  { %v6758_v22 = vpop.eup %6757  ;;  %v3345_v37 = vadd.f32 1.0, %v6756_v51  ;;  %v7487_v45 = vmul.f32 0.5, %v3099_v32  ;;  %v7489_v53 = vmul.f32 0.5, %v3098_v9  ;;  %v7491_v58 = vmul.f32 0.5, %v3100_v15  ;;  %3999 = vmatpush1.bf16.msra.mxu0 %v6643_v39  ;;  %v6651_v52 = vld [vmem:[#allocation8 + $0x144] ss:$8 sps:$4 sm:$0xff]  }
 0x23c   :  { %v6760_v29 = vpop.eup %6759  ;;  %v3347_v13 = vadd.f32 1.0, %v6758_v22  ;;  %v7498_v22 = vmul.f32 %v3344_v63, %v7390_v0  ;;  %v3104_v11 = vadd.f32 %v7264_v27, %v7388_v59  ;;  %4000 = vmatprep.subr.bf16.mxu0 %v6648_v60  ;;  %6779 = verf.f32 %v3229_v33 }
 0x23d   :  { %v6762_v34 = vpop.eup %6761  ;;  %v3346_v21 = vadd.f32 1.0, %v6760_v29  ;;  %v3231_v61 = vmul.f32 0.70710677, %v3103_v1  ;;  %v3458_v18 = vpack.c.bf16 %v7422_v57, %v7380_v14  ;;  %v7513_v59 = vmul.f32 %v3345_v37, %v7411_v24 }
 0x23e   :  { %v6764_v6 = vpop.eup %6763  ;;  %v7482_v5 = vpop.f32.mrb[24].mxu0  ;;  %8232 = vst [vmem:[#allocation21_spill] sm:$0xff] %v7498_v22  ;;  %v3348_v28 = vadd.f32 1.0, %v6762_v34  ;;  %v7516_v60 = vmul.f32 %v3347_v13, %v7419_v35  ;;  %v7518_v34 = vmul.f32 0.5, %v3101_v10  ;;  %v3230_v22 = vmul.f32 0.70710677, %v3102_v46 }
 0x23f   :  { %v7493_v50 = vpop.f32.mrb[24].mxu1  ;;  %v7495_v51 = vpop.f32.mrb[25].mxu0  ;;  %v3349_v39 = vadd.f32 1.0, %v6764_v6  ;;  %v6649_v6 = vld [vmem:[#allocation8 + $0x140] ss:$8 sps:$4 sm:$0xff]   ;;  %v7522_v36 = vmul.f32 0.5, %v3103_v1  ;;  %3923 = vmatprep.mubr.bf16.mxu0 %v3458_v18  ;;  %v7526_v57 = vadd.f32 %v7270_v43, %v7392_v38  ;;  %v7530_v24 = vadd.f32 %v7261_v25, %v7394_v47  ;;  %4001 = vmatpush1.bf16.msra.mxu0 %v6646_v19 }
 0x240   :  { %v7502_v32 = vpop.f32.mrb[25].mxu1  ;;  %v7504_v9 = vpop.f32.mrb[26].mxu0  ;;  %8234 = vst [vmem:[#allocation23_spill] sm:$0xff] %v7516_v60  ;;  %v3232_v14 = vmul.f32 0.70710677, %v3104_v11  ;;  %v7533_v37 = vmul.f32 %v3346_v21, %v7424_v56  ;;  %v7535_v60 = vmul.f32 0.5, %v3102_v46  ;;  %v3457_v18 = vpack.c.bf16 %v7414_v42, %v7364_v8  ;;  %4002 = vmatprep.subr.bf16.mxu0 %v6651_v52 }
 0x241   :  { %v6766_v15 = vpop.eup %6765  ;;  %v7508_v0 = vpop.f32.mrb[26].mxu1  ;;  %v6654_v10 = vld [vmem:[#allocation8 + $0x154] ss:$8 sps:$4 sm:$0xff]   ;;  %v6687_v56 = vld [vmem:[%s8201_s5 + $0x48] sm:$0xff]   ;;  %v7549_v19 = vmul.f32 %v3348_v28, %v7434_v31  ;;  %v7552_v46 = vmul.f32 %v3349_v39, %v7454_v20  ;;  %6781 = verf.f32 %v3231_v61  ;;  %v3233_v42 = vmul.f32 0.70710677, %v7526_v57 }
 0x242   :  { %v7510_v63 = vpop.f32.mrb[27].mxu0  ;;  %v6768_v29 = vpop.eup %6767  ;;  %v3351_v13 = vadd.f32 1.0, %v6766_v15  ;;  %v6685_v38 = vld [vmem:[%s8201_s5 + $0x40] sm:$0xff]   ;;  %v6652_v8 = vld [vmem:[#allocation8 + $0x150] ss:$8 sps:$4 sm:$0xff]   ;;  %6783 = verf.f32 %v3230_v22  ;;  %3924 = vmatmul.mubr.bf16.gmra.mrb[36].mxu0 %v3457_v18  ;;  %v7562_v28 = vmul.f32 0.5, %v3104_v11  ;;  %v3108_v61 = vadd.f32 %v7264_v27, %v7401_v62 }
 0x243   :  { %8233 = vst [vmem:[#allocation22_spill] sm:$0xff] %v7510_v63  ;;  %v7520_v33 = vpop.f32.mrb[27].mxu1  ;;  %v6770_v7 = vpop.eup %6769  ;;  %v6686_v47 = vld [vmem:[%s8201_s5] sm:$0xff]   ;;  %8236 = vst [vmem:[#allocation25_spill] sm:$0xff] %v7549_v19  ;;  %v3350_v52 = vadd.f32 1.0, %v6768_v29  ;;  %5758 = vmatprep.subr.bf16.mxu1 %v6685_v38  ;;  %6785 = verf.f32 %v3232_v14  ;;  %v7568_v22 = vadd.f32 %v7270_v43, %v7430_v16  ;;  %4003 = vmatpush1.bf16.msra.mxu0 %v6649_v6  ;;  %v6688_v11 = vld [vmem:[%s8201_s5 + $0x8] sm:$0xff]  }
 0x244   :  { %8235 = vst [vmem:[#allocation24_spill] sm:$0xff] %v7520_v33  ;;  %v6772_v35 = vpop.eup %6771  ;;  %v3235_v15 = vmul.f32 0.70710677, %v7530_v24  ;;  %v3106_v33 = vadd.f32 %v7274_v44, %v7396_v55  ;;  %v6657_v39 = vld [vmem:[#allocation8 + $0x164] ss:$8 sps:$4 sm:$0xff]   ;;  %5759 = vmatpush3.bf16.msra.mxu1 %v6686_v47  ;;  %v7578_v14 = vmul.f32 %v3351_v13, %v7463_v54  ;;  %v3352_v18 = vadd.f32 1.0, %v6770_v7  ;;  %4004 = vmatprep.subr.bf16.mxu0 %v6654_v10 }
 0x245   :  { %v6774_v1 = vpop.eup %6773  ;;  %v3353_v62 = vadd.f32 1.0, %v6772_v35  ;;  %6787 = verf.f32 %v3233_v42  ;;  %5760 = vmatprep.subr.bf16.mxu1 %v6687_v56  ;;  %v6689_v38 = vld [vmem:[%s8201_s5 + $0x50] sm:$0xff]   ;;  %v7590_v7 = vmul.f32 %v3350_v52, %v7465_v12  ;;  %v3111_v35 = vadd.f32 %v7261_v25, %v7432_v17  ;;  %v6655_v13 = vld [vmem:[#allocation8 + $0x160] ss:$8 sps:$4 sm:$0xff]  }
 0x246   :  { %v6776_v21 = vpop.eup %6775  ;;  %v7558_v63 = vpop.f32.mrb[28].mxu0  ;;  %8239 = vst [vmem:[#allocation28_spill] sm:$0xff] %v7578_v14  ;;  %v3355_v47 = vadd.f32 1.0, %v6774_v1  ;;  %6789 = verf.f32 %v3235_v15  ;;  %v3234_v19 = vmul.f32 0.70710677, %v3106_v33  ;;  %v3110_v15 = vadd.f32 %v7274_v44, %v7439_v4  ;;  %v6690_v17 = vld [vmem:[%s8201_s5 + $0x10] sm:$0xff]  }
 0x247   :  { %v7560_v31 = vpop.f32.mrb[28].mxu1  ;;  %v6778_v20 = vpop.eup %6777  ;;  %v3354_v54 = vadd.f32 1.0, %v6776_v21  ;;  %v3237_v1 = vmul.f32 0.70710677, %v7568_v22  ;;  %v7601_v14 = vadd.f32 %v7264_v27, %v7441_v30  ;;  %4005 = vmatpush1.bf16.msra.mxu0 %v6652_v8  ;;  %v6660_v12 = vld [vmem:[#allocation8 + $0x174] ss:$8 sps:$4 sm:$0xff]   ;;  %v7607_v21 = vmul.f32 %v3352_v18, %v7475_v48 }
 0x248   :  { %v7570_v29 = vpop.f32.mrb[29].mxu0  ;;  %v7572_v55 = vpop.f32.mrb[29].mxu1  ;;  %v3356_v10 = vadd.f32 1.0, %v6778_v20  ;;  %6791 = verf.f32 %v3234_v19  ;;  %5761 = vmatpush3.bf16.msra.mxu1 %v6688_v11  ;;  %v7610_v19 = vmul.f32 0.5, %v7526_v57  ;;  %v7613_v52 = vmul.f32 0.5, %v7530_v24  ;;  %4006 = vmatprep.subr.bf16.mxu0 %v6657_v39  ;;  %v6691_v30 = vld [vmem:[%s8201_s5 + $0x58] sm:$0xff]  }
 0x249   :  { %8237 = vst [vmem:[#allocation26_spill] sm:$0xff] %v7570_v29  ;;  %8238 = vst [vmem:[#allocation27_spill] sm:$0xff] %v7572_v55  ;;  %v7580_v16 = vpop.f32.mrb[30].mxu0  ;;  %v7582_v6 = vpop.f32.mrb[30].mxu1  ;;  %v3236_v55 = vmul.f32 0.70710677, %v3108_v61  ;;  %5762 = vmatprep.subr.bf16.mxu1 %v6689_v38  ;;  %v7619_v8 = vmul.f32 %v3353_v62, %v7478_v26  ;;  %v7622_v20 = vmul.f32 %v3355_v47, %v7487_v45 }
 0x24a   :  { %v7587_v29 = vpop.f32.mrb[31].mxu0  ;;  %v7594_v56 = vpop.f32.mrb[31].mxu1  ;;  %v3239_v4 = vmul.f32 0.70710677, %v3111_v35  ;;  %v7624_v48 = vmul.f32 0.5, %v3106_v33  ;;  %v7627_v57 = vmul.f32 %v3354_v54, %v7489_v53  ;;  %v7629_v11 = vmul.f32 0.5, %v3108_v61 }
 0x24b   :  { %v6780_v42 = vpop.eup %6779  ;;  %6793 = verf.f32 %v3236_v55  ;;  %v3238_v39 = vmul.f32 0.70710677, %v3110_v15  ;;  %v7632_v38 = vmul.f32 %v3356_v10, %v7491_v58  ;;  %v3240_v26 = vmul.f32 0.70710677, %v7601_v14  ;;  %4007 = vmatpush1.bf16.msra.mxu0 %v6655_v13  ;;  %v6658_v33 = vld [vmem:[#allocation8 + $0x170] ss:$8 sps:$4 sm:$0xff]  }
 0x24c   :  { %v3357_v24 = vadd.f32 1.0, %v6780_v42  ;;  %v6782_v18 = vpop.eup %6781  ;;  %6795 = verf.f32 %v3237_v1  ;;  %v3462_v45 = vpack.c.bf16 %v7533_v37, %v7485_v3  ;;  %5763 = vmatpush3.bf16.msra.mxu1 %v6690_v17  ;;  %v6692_v53 = vld [vmem:[%s8201_s5 + $0x18] sm:$0xff]   ;;  %v3113_v55 = vadd.f32 %v7270_v43, %v7450_v2  ;;  %4008 = vmatprep.subr.bf16.mxu0 %v6660_v12  ;;  %v6663_v3 = vld [vmem:[#allocation8 + $0x184] ss:$8 sps:$4 sm:$0xff]   ;;  %v6661_v1 = vld [vmem:[#allocation8 + $0x180] ss:$8 sps:$4 sm:$0xff]  }
 0x24d   :  { %v6784_v61 = vpop.eup %6783  ;;  %6797 = verf.f32 %v3239_v4  ;;  %v3115_v58 = vadd.f32 %v7261_v25, %v7452_v40  ;;  %v3461_v62 = vpack.c.bf16 %v7513_v59, %v7461_v23  ;;  %5764 = vmatprep.subr.bf16.mxu1 %v6691_v30  ;;  %v6693_v37 = vld [vmem:[%s8201_s5 + $0x60] sm:$0xff]   ;;  %v7650_v54 = vmul.f32 0.5, %v7568_v22 }
 0x24e   :  { %v6786_v47 = vpop.eup %6785  ;;  %6799 = verf.f32 %v3238_v39  ;;  %3933 = vmatprep.mubr.bf16.mxu0 %v3462_v45  ;;  %v3114_v2 = vadd.f32 %v7274_v44, %v7456_v49  ;;  %v3116_v40 = vadd.f32 %v7264_v27, %v7458_v41  ;;  %v7657_v59 = vmul.f32 %v3357_v24, %v7518_v34  ;;  %v6694_v49 = vld [vmem:[%s8201_s5 + $0x20] sm:$0xff]  }
 0x24f   :  { %v6788_v23 = vpop.eup %6787  ;;  %v3359_v10 = vadd.f32 1.0, %v6782_v18  ;;  %v7659_v13 = vmul.f32 0.5, %v3111_v35  ;;  %v3241_v42 = vmul.f32 0.70710677, %v3113_v55  ;;  %3934 = vmatmul.mubr.bf16.gmra.mrb[40].mxu0 %v3461_v62  ;;  %v3358_v12 = vadd.f32 1.0, %v6784_v61 }
 0x250   :  { %v6790_v22 = vpop.eup %6789  ;;  %6801 = verf.f32 %v3240_v26  ;;  %v3243_v17 = vmul.f32 0.70710677, %v3115_v58  ;;  %v3242_v4 = vmul.f32 0.70710677, %v3114_v2  ;;  %4009 = vmatpush1.bf16.msra.mxu0 %v6658_v33  ;;  %5765 = vmatpush3.bf16.msra.mxu1 %v6692_v53  ;;  %v3360_v41 = vadd.f32 1.0, %v6786_v47 }
 0x251   :  { %v7664_v34 = vmul.f32 0.5, %v3110_v15  ;;  %6803 = verf.f32 %v3241_v42  ;;  %v3244_v35 = vmul.f32 0.70710677, %v3116_v40  ;;  %4010 = vmatprep.subr.bf16.mxu0 %v6663_v3  ;;  %v6666_v30 = vld [vmem:[#allocation8 + $0x194] ss:$8 sps:$4 sm:$0xff]   ;;  %5766 = vmatprep.subr.bf16.mxu1 %v6693_v37  ;;  %v3361_v39 = vadd.f32 1.0, %v6788_v23 }
 0x252   :  { %v6792_v24 = vpop.eup %6791  ;;  %6805 = verf.f32 %v3243_v17  ;;  %v3117_v18 = vadd.f32 %v7270_v43, %v7482_v5  ;;  %v3119_v26 = vadd.f32 %v7261_v25, %v7493_v50  ;;  %v3363_v45 = vadd.f32 1.0, %v6790_v22  ;;  %v6664_v50 = vld [vmem:[#allocation8 + $0x190] ss:$8 sps:$4 sm:$0xff]  }
 0x253   :  { %6807 = verf.f32 %v3242_v4  ;;  %v7672_v15 = vadd.f32 %v7274_v44, %v7495_v51  ;;  %v7676_v33 = vadd.f32 %v7264_v27, %v7502_v32  ;;  %v7679_v61 = vmul.f32 %v3359_v10, %v7522_v36  ;;  %v6669_v36 = vld [vmem:[#allocation8 + $0x1a4] ss:$8 sps:$4 sm:$0xff]  }
 0x254   :  { %v7682_v62 = vmul.f32 0.5, %v7601_v14  ;;  %6809 = verf.f32 %v3244_v35  ;;  %v3245_v5 = vmul.f32 0.70710677, %v3117_v18  ;;  %4011 = vmatpush1.bf16.msra.mxu0 %v6661_v1  ;;  %5767 = vmatpush3.bf16.msra.mxu1 %v6694_v49  ;;  %v7685_v3 = vmul.f32 %v3358_v12, %v7535_v60  ;;  %v6667_v49 = vld [vmem:[#allocation8 + $0x1a0] ss:$8 sps:$4 sm:$0xff]  }
 0x255   :  { %v6794_v53 = vpop.eup %6793  ;;  %v7688_v51 = vmul.f32 %v3360_v41, %v7562_v28  ;;  %v3362_v32 = vadd.f32 1.0, %v6792_v24  ;;  %v7690_v37 = vmul.f32 0.5, %v3113_v55  ;;  %4012 = vmatprep.subr.bf16.mxu0 %v6666_v30  ;;  %v7693_v14 = vmul.f32 %v3361_v39, %v7610_v19  ;;  %v6672_v30 = vld [vmem:[#allocation8 + $0x1b4] ss:$8 sps:$4 sm:$0xff]  }
 0x256   :  { %v6796_v47 = vpop.eup %6795  ;;  %v7695_v23 = vmul.f32 0.5, %v3115_v58  ;;  %v7697_v10 = vmul.f32 0.5, %v3114_v2  ;;  %v3247_v42 = vmul.f32 0.70710677, %v3119_v26  ;;  %v7700_v60 = vmul.f32 %v3363_v45, %v7613_v52 }
 0x257   :  { %v6798_v1 = vpop.eup %6797  ;;  %v3364_v28 = vadd.f32 1.0, %v6794_v53  ;;  %v7702_v22 = vmul.f32 0.5, %v3116_v40  ;;  %v3246_v55 = vmul.f32 0.70710677, %v7672_v15  ;;  %v7705_v17 = vmul.f32 0.5, %v3117_v18 }
 0x258   :  { %v6800_v12 = vpop.eup %6799  ;;  %6811 = verf.f32 %v3245_v5  ;;  %v3248_v19 = vmul.f32 0.70710677, %v7676_v33  ;;  %v3466_v58 = vpack.c.bf16 %v7627_v57, %v7590_v7  ;;  %4013 = vmatpush1.bf16.msra.mxu0 %v6664_v50  ;;  %v7711_v2 = vmul.f32 %v3362_v32, %v7624_v48  ;;  %v8240_v57 = vld [vmem:[#allocation22_spill] sm:$0xff] }
 0x259   :  { %v3365_v52 = vadd.f32 1.0, %v6796_v47  ;;  %v3121_v40 = vadd.f32 %v7270_v43, %v7504_v9  ;;  %v3123_v4 = vadd.f32 %v7261_v25, %v7508_v0  ;;  %4014 = vmatprep.subr.bf16.mxu0 %v6669_v36  ;;  %v7717_v35 = vmul.f32 0.5, %v3119_v26  ;;  %v6670_v36 = vld [vmem:[#allocation8 + $0x1b0] ss:$8 sps:$4 sm:$0xff]  }
 0x25a   :  { %v6802_v41 = vpop.eup %6801  ;;  %6813 = verf.f32 %v3247_v42  ;;  %3943 = vmatprep.mubr.bf16.mxu0 %v3466_v58  ;;  %v3465_v7 = vpack.c.bf16 %v7619_v8, %v7552_v46  ;;  %v3122_v48 = vadd.f32 %v7274_v44, %v8240_v57  ;;  %v3367_v39 = vadd.f32 1.0, %v6798_v1  ;;  %v8241_v46 = vld [vmem:[#allocation24_spill] sm:$0xff] }
 0x25b   :  { %v6804_v24 = vpop.eup %6803  ;;  %v3366_v9 = vadd.f32 1.0, %v6800_v12  ;;  %6815 = verf.f32 %v3246_v55  ;;  %v3249_v18 = vmul.f32 0.70710677, %v3121_v40  ;;  %v7724_v45 = vmul.f32 %v3364_v28, %v7629_v11  ;;  %v6675_v28 = vld [vmem:[#allocation8 + $0x1c4] ss:$8 sps:$4 sm:$0xff]  }
 0x25c   :  { %v6806_v0 = vpop.eup %6805  ;;  %6817 = verf.f32 %v3248_v19  ;;  %v3251_v26 = vmul.f32 0.70710677, %v3123_v4  ;;  %3944 = vmatmul.mubr.bf16.gmra.mrb[44].mxu0 %v3465_v7  ;;  %v3250_v53 = vmul.f32 0.70710677, %v3122_v48  ;;  %v3368_v50 = vadd.f32 1.0, %v6802_v41 }
 0x25d   :  { %v6808_v5 = vpop.eup %6807  ;;  %6819 = verf.f32 %v3249_v18  ;;  %v3124_v8 = vadd.f32 %v7264_v27, %v8241_v46  ;;  %v7730_v32 = vadd.f32 %v7270_v43, %v7558_v63  ;;  %4015 = vmatpush1.bf16.msra.mxu0 %v6667_v49  ;;  %v7733_v11 = vmul.f32 %v3365_v52, %v7650_v54 }
 0x25e   :  { %v6810_v47 = vpop.eup %6809  ;;  %v7736_v42 = vmul.f32 0.5, %v7672_v15  ;;  %6821 = verf.f32 %v3251_v26  ;;  %v7740_v1 = vadd.f32 %v7261_v25, %v7560_v31  ;;  %4016 = vmatprep.subr.bf16.mxu0 %v6672_v30  ;;  %v7743_v55 = vmul.f32 %v3367_v39, %v7659_v13  ;;  %v6673_v13 = vld [vmem:[#allocation8 + $0x1c0] ss:$8 sps:$4 sm:$0xff]  }
 0x25f   :  { %v7746_v63 = vmul.f32 %v3366_v9, %v7664_v34  ;;  %v7749_v12 = vmul.f32 0.5, %v7676_v33  ;;  %6823 = verf.f32 %v3250_v53  ;;  %v3369_v54 = vadd.f32 1.0, %v6804_v24  ;;  %v8242_v33 = vld [vmem:[#allocation26_spill] sm:$0xff]  ;;  %v8243_v30 = vld [vmem:[#allocation27_spill] sm:$0xff] }
 0x260   :  { %v3371_v15 = vadd.f32 1.0, %v6806_v0  ;;  %v3370_v19 = vadd.f32 1.0, %v6808_v5  ;;  %v3252_v58 = vmul.f32 0.70710677, %v3124_v8  ;;  %v7752_v52 = vmul.f32 %v3368_v50, %v7682_v62  ;;  %v6678_v62 = vld [vmem:[#allocation8 + $0x1d4] ss:$8 sps:$4 sm:$0xff]  }
 0x261   :  { %v3372_v31 = vadd.f32 1.0, %v6810_v47  ;;  %v3185_v49 = vmul.f32 0.5, %v3121_v40  ;;  %v3253_v41 = vmul.f32 0.70710677, %v7730_v32  ;;  %4017 = vmatpush1.bf16.msra.mxu0 %v6670_v36  ;;  %v3255_v34 = vmul.f32 0.70710677, %v7740_v1 }
 0x262   :  { %v6812_v7 = vpop.eup %6811  ;;  %6825 = verf.f32 %v3252_v58  ;;  %v7758_v57 = vadd.f32 %v7274_v44, %v8242_v33  ;;  %v7762_v24 = vadd.f32 %v7264_v27, %v8243_v30  ;;  %4018 = vmatprep.subr.bf16.mxu0 %v6675_v28  ;;  %v3187_v39 = vmul.f32 0.5, %v3123_v4 }
 0x263   :  { %v3186_v40 = vmul.f32 0.5, %v3122_v48  ;;  %v3470_v9 = vpack.c.bf16 %v7711_v2, %v7685_v3  ;;  %v7768_v18 = vadd.f32 %v7270_v43, %v7580_v16  ;;  %v7771_v26 = vmul.f32 %v3369_v54, %v7690_v37 }
 0x264   :  { %v6814_v0 = vpop.eup %6813  ;;  %v7774_v53 = vmul.f32 %v3371_v15, %v7695_v23  ;;  %v3434_v5 = vmul.f32 %v3370_v19, %v7697_v10  ;;  %v3188_v50 = vmul.f32 0.5, %v3124_v8  ;;  %v3373_v4 = vadd.f32 1.0, %v6812_v7  ;;  %v6676_v10 = vld [vmem:[#allocation8 + $0x1d0] ss:$8 sps:$4 sm:$0xff]   ;;  %v6684_v7 = vld [vmem:[#allocation8 + $0x1f4] ss:$8 sps:$4 sm:$0xff]  }
 0x265   :  { %v6816_v46 = vpop.eup %6815  ;;  %6827 = verf.f32 %v3253_v41  ;;  %v3254_v48 = vmul.f32 0.70710677, %v7758_v57  ;;  %v3256_v3 = vmul.f32 0.70710677, %v7762_v24  ;;  %3953 = vmatprep.mubr.bf16.mxu0 %v3470_v9  ;;  %4019 = vmatpush1.bf16.msra.mxu0 %v6673_v13  ;;  %v7780_v16 = vmul.f32 %v3372_v31, %v7702_v22  ;;  %v6681_v22 = vld [vmem:[#allocation8 + $0x1e4] ss:$8 sps:$4 sm:$0xff]  }
 0x266   :  { %v6818_v43 = vpop.eup %6817  ;;  %6829 = verf.f32 %v3255_v34  ;;  %v3257_v37 = vmul.f32 0.70710677, %v7768_v18  ;;  %v7785_v23 = vadd.f32 %v7261_v25, %v7582_v6  ;;  %4020 = vmatprep.subr.bf16.mxu0 %v6678_v62  ;;  %v3375_v8 = vadd.f32 1.0, %v6814_v0  ;;  %v6679_v31 = vld [vmem:[#allocation8 + $0x1e0] ss:$8 sps:$4 sm:$0xff]   ;;  %v8244_v62 = vld [vmem:[#allocation14_spill] sm:$0xff] }
 0x267   :  { %v6820_v2 = vpop.eup %6819  ;;  %6831 = verf.f32 %v3254_v48  ;;  %v3469_v36 = vpack.c.bf16 %v7693_v14, %v7657_v59  ;;  %v7791_v47 = vadd.f32 %v7274_v44, %v7587_v29  ;;  %v3374_v54 = vadd.f32 1.0, %v6816_v46  ;;  %v8245_v9 = vld [vmem:[#allocation15_spill] sm:$0xff] }
 0x268   :  { %v6822_v28 = vpop.eup %6821  ;;  %v3377_v15 = vadd.f32 1.0, %v6820_v2  ;;  %6833 = verf.f32 %v3256_v3  ;;  %v3259_v25 = vmul.f32 0.70710677, %v7785_v23  ;;  %v7795_v19 = vmul.f32 %v3373_v4, %v7705_v17  ;;  %v8250_v3 = vld [vmem:[#allocation21_spill] sm:$0xff] }
 0x269   :  { %v6824_v6 = vpop.eup %6823  ;;  %v3379_v58 = vadd.f32 1.0, %v6822_v28  ;;  %6835 = verf.f32 %v3257_v37  ;;  %3954 = vmatmul.mubr.bf16.gmra.mrb[48].mxu0 %v3469_v36  ;;  %v3258_v59 = vmul.f32 0.70710677, %v7791_v47  ;;  %v7802_v29 = vadd.f32 %v7264_v27, %v7594_v56  ;;  %v8253_v28 = vld [vmem:[#allocation23_spill] sm:$0xff] }
 0x26a   :  { %v7798_v14 = vmul.f32 %v3377_v15, %v3185_v49  ;;  %v3378_v44 = vadd.f32 1.0, %v6824_v6  ;;  %6837 = verf.f32 %v3259_v25  ;;  %4021 = vmatpush1.bf16.msra.mxu0 %v6676_v10  ;;  %v3376_v41 = vadd.f32 1.0, %v6818_v43  ;;  %v8251_v43 = vld [vmem:[#allocation25_spill] sm:$0xff]  ;;  %v8254_v6 = vld [vmem:[#allocation28_spill] sm:$0xff] }
 0x26b   :  { %6839 = verf.f32 %v3258_v59  ;;  %v3474_v17 = vpack.c.bf16 %v3434_v5, %v7746_v63  ;;  %v3473_v13 = vpack.c.bf16 %v7771_v26, %v7733_v11  ;;  %4022 = vmatprep.subr.bf16.mxu0 %v6681_v22  ;;  %v3438_v49 = vmul.f32 %v3374_v54, %v7736_v42  ;;  %v8246_v63 = vld [vmem:[#allocation17_spill] sm:$0xff]  ;;  %v8247_v5 = vld [vmem:[#allocation19_spill] sm:$0xff]  ;;  %v8248_v11 = vld [vmem:[#allocation16_spill] sm:$0xff] }
 0x26c   :  { %v6826_v34 = vpop.eup %6825  ;;  %v3442_v33 = vmul.f32 %v3378_v44, %v3186_v40  ;;  %v3260_v30 = vmul.f32 0.70710677, %v7802_v29  ;;  %v3477_v27 = vpack.c.bf16 %v7798_v14, %v7795_v19  ;;  %v3456_v0 = vpack.c.bf16 %v8245_v9, %v8244_v62  ;;  %v8249_v26 = vld [vmem:[#allocation18_spill] sm:$0xff]  ;;  %v8252_v22 = vld [vmem:[#allocation20_spill] sm:$0xff] }
 0x26d   :  { %v3380_v56 = vadd.f32 1.0, %v6826_v34  ;;  %3963 = vmatprep.mubr.bf16.mxu0 %v3474_v17  ;;  %v3460_v46 = vpack.c.bf16 %v8247_v5, %v8246_v63  ;;  %v3459_v4 = vpack.c.bf16 %v8249_v26, %v8248_v11  ;;  %v7817_v48 = vmul.f32 %v3379_v58, %v3187_v39  ;;  %v6682_v40 = vld [vmem:[#allocation8 + $0x1f0] ss:$8 sps:$4 sm:$0xff]   ;;  %v7885_v63 = vld [vmem:[%s8203_s7] sm:$0xff]  }
 0x26e   :  { %6841 = verf.f32 %v3260_v30  ;;  %v3478_v42 = vpack.c.bf16 %v3442_v33, %v3438_v49  ;;  %4023 = vmatpush1.bf16.msra.mxu0 %v6679_v31  ;;  %v3464_v37 = vpack.c.bf16 %v8251_v43, %v8250_v3  ;;  %v7822_v2 = vmul.f32 %v3376_v41, %v7749_v12  ;;  %v6698_v62 = vld [vmem:[%s8201_s5 + $0x30] sm:$0xff]   ;;  %v6699_v9 = vld [vmem:[%s8201_s5 + $0x78] sm:$0xff]   ;;  %v3549_v5 = vld [vmem:[%s8200_s4] sm:$0x3] }
 0x26f   :  { %v6828_v10 = vpop.eup %6827  ;;  %v7824_v36 = vmul.f32 %v3380_v56, %v3188_v50  ;;  %4024 = vmatprep.subr.bf16.mxu0 %v6684_v7  ;;  %v3463_v54 = vpack.c.bf16 %v8253_v28, %v8252_v22  ;;  %v3468_v39 = vpack.c.bf16 %v7632_v38, %v7607_v21  ;;  %v3439_v25 = vmul.f32 %v3375_v8, %v7717_v35 }
 0x270   :  { %v6830_v15 = vpop.eup %6829  ;;  %v3467_v19 = vpack.c.bf16 %v7622_v20, %v8254_v6  ;;  %v3472_v58 = vpack.c.bf16 %v7724_v45, %v7688_v51  ;;  %v3471_v12 = vpack.c.bf16 %v7700_v60, %v7679_v61  ;;  %v3476_v59 = vpack.c.bf16 %v7780_v16, %v7752_v52 }
 0x271   :  { %v6832_v50 = vpop.eup %6831  ;;  %3964 = vmatmul.mubr.bf16.gmra.mrb[52].mxu0 %v3473_v13  ;;  %v3475_v21 = vpack.c.bf16 %v7774_v53, %v7743_v55  ;;  %v3480_v38 = vpack.c.bf16 %v7824_v36, %v7822_v2  ;;  %v3381_v8 = vadd.f32 1.0, %v6828_v10  ;;  %v3479_v20 = vpack.c.bf16 %v7817_v48, %v3439_v25  ;;  %v8255_v10 = vld [vmem:[#allocation13_spill] sm:$0xff]  ;;  %v8256_v2 = vld [vmem:[#allocation12_spill] sm:$0xff] }
 0x272   :  { %v6834_v35 = vpop.eup %6833  ;;  %3973 = vmatprep.mubr.bf16.mxu0 %v3478_v42  ;;  %4025 = vmatpush1.bf16.msra.mxu0 %v6682_v40  ;;  %v3383_v45 = vadd.f32 1.0, %v6830_v15  ;;  %v3189_v60 = vmul.f32 0.5, %v7730_v32  ;;  %v3382_v14 = vadd.f32 1.0, %v6832_v50  ;;  %v3193_v52 = vmul.f32 0.5, %v7768_v18 }
 0x273   :  { %v6836_v51 = vpop.eup %6835  ;;  %v3191_v55 = vmul.f32 0.5, %v7740_v1  ;;  %v3190_v53 = vmul.f32 0.5, %v7758_v57  ;;  %v3195_v31 = vmul.f32 0.5, %v7785_v23  ;;  %v3194_v7 = vmul.f32 0.5, %v7791_v47 }
 0x274   :  { %v6838_v61 = vpop.eup %6837  ;;  %v3385_v16 = vadd.f32 1.0, %v6836_v51  ;;  %v3445_v17 = vmul.f32 %v3381_v8, %v3189_v60  ;;  %v3384_v33 = vadd.f32 1.0, %v6834_v35  ;;  %v3192_v42 = vmul.f32 0.5, %v7762_v24  ;;  %v6695_v24 = vld [vmem:[%s8201_s5 + $0x68] sm:$0xff]  }
 0x275   :  { %v6840_v44 = vpop.eup %6839  ;;  %v3387_v41 = vadd.f32 1.0, %v6838_v61  ;;  %v3447_v49 = vmul.f32 %v3383_v45, %v3191_v55  ;;  %v3446_v56 = vmul.f32 %v3382_v14, %v3190_v53  ;;  %v3196_v1 = vmul.f32 0.5, %v7802_v29  ;;  %v6696_v29 = vld [vmem:[%s8201_s5 + $0x28] sm:$0xff]   ;;  %5768 = vmatprep.subr.bf16.mxu1 %v6695_v24 }
 0x276   :  { %v3449_v13 = vmul.f32 %v3385_v16, %v3193_v52  ;;  %v3386_v34 = vadd.f32 1.0, %v6840_v44  ;;  %v3448_v3 = vmul.f32 %v3384_v33, %v3192_v42  ;;  %v8257_v36 = vpack.c.bf16 %v8255_v10, %v8256_v2  ;;  %5769 = vmatpush3.bf16.msra.mxu1 %v6696_v29 }
 0x277   :  { %v3451_v32 = vmul.f32 %v3387_v41, %v3195_v31 }
 0x278   :  { %v6842_v30 = vpop.eup %6841  ;;  %v3450_v18 = vmul.f32 %v3386_v34, %v3194_v7  ;;  %v3481_v48 = vpack.c.bf16 %v3449_v13, %v3445_v17 }
 0x279   :  { %v3388_v57 = vadd.f32 1.0, %v6842_v30  ;;  %3974 = vmatmul.mubr.bf16.gmra.mrb[56].mxu0 %v3477_v27  ;;  %v3483_v23 = vpack.c.bf16 %v3451_v32, %v3447_v49  ;;  %v6697_v27 = vld [vmem:[%s8201_s5 + $0x70] sm:$0xff]  }
 0x27a   :  { %v3482_v40 = vpack.c.bf16 %v3450_v18, %v3446_v56  ;;  %5770 = vmatprep.subr.bf16.mxu1 %v6697_v27 }
 0x27b   :  { %v3452_v43 = vmul.f32 %v3388_v57, %v3196_v1  ;;  %5771 = vmatpush3.bf16.msra.mxu1 %v6698_v62 }
 0x27c   :  { %3983 = vmatprep.mubr.bf16.mxu0 %v3482_v40  ;;  %5772 = vmatprep.subr.bf16.mxu1 %v6699_v9 }
 0x27d   :  { %v3484_v47 = vpack.c.bf16 %v3452_v43, %v3448_v3 }
 0x281   :  { %3984 = vmatmul.mubr.bf16.gmra.mrb[60].mxu0 %v3481_v48 }
 0x282   :  { %4026 = vmatprep.mubr.bf16.mxu0 %v3456_v0  ;;  %v6700_v0 = vld [vmem:[%s8201_s5 + $0x38] sm:$0xff]  }
 0x283   :  { %5773 = vmatpush3.bf16.msra.mxu1 %v6700_v0 }
 0x284   :  { %5860 = vmatprep.subr.bf16.mxu1 %v7885_v63 }
 0x289   :  { %4027 = vmatmul.mubr.bf16.vlgmr.msra.gmra.mrb[32].mxu0 %v8257_v36 }
 0x28a   :  { %4036 = vmatprep.mubr.bf16.mxu0 %v3460_v46  ;;  %v8258_v46 = vld [vmem:[#allocation11_spill] sm:$0xff] }
 0x28b   :  { %v8259_v11 = vsub.s32 0, %v8258_v46 }
 0x28d   :  { %v7893_v26 = vrot.slane %v3549_v5, %v8259_v11 }
 0x291   :  { %4037 = vmatmul.mubr.bf16.gmra.mrb[36].mxu0 %v3459_v4  ;;  %v8260_v4 = vsub.s32 1, %v8258_v46 }
 0x292   :  { %4046 = vmatprep.mubr.bf16.mxu0 %v3464_v37 }
 0x293   :  { %v7897_v37 = vrot.slane %v3549_v5, %v8260_v4 }
 0x299   :  { %4047 = vmatmul.mubr.bf16.gmra.mrb[40].mxu0 %v3463_v54 }
 0x29a   :  { %4056 = vmatprep.mubr.bf16.mxu0 %v3468_v39 }
 0x2a1   :  { %4057 = vmatmul.mubr.bf16.gmra.mrb[44].mxu0 %v3467_v19 }
 0x2a2   :  { %4066 = vmatprep.mubr.bf16.mxu0 %v3472_v58 }
 0x2a9   :  { %4067 = vmatmul.mubr.bf16.gmra.mrb[48].mxu0 %v3471_v12 }
 0x2aa   :  { %4076 = vmatprep.mubr.bf16.mxu0 %v3476_v59 }
 0x2b1   :  { %4077 = vmatmul.mubr.bf16.gmra.mrb[52].mxu0 %v3475_v21 }
 0x2b2   :  { %4086 = vmatprep.mubr.bf16.mxu0 %v3480_v38 }
 0x2b9   :  { %4087 = vmatmul.mubr.bf16.gmra.mrb[56].mxu0 %v3479_v20 }
 0x2ba   :  { %4096 = vmatprep.mubr.bf16.mxu0 %v3484_v47 }
 0x2c1   :  { %4097 = vmatmul.mubr.bf16.gmra.mrb[60].mxu0 %v3483_v23 }
 0x35c   :  { %v4028_v22 = vpop.f32.mrb[32].mxu0 }
 0x35d   :  { %v5940_v28 = vadd.f32 %v4028_v22, %v7893_v26  ;;  %v4030_v54 = vpop.f32.mrb[33].mxu0 }
 0x35e   :  { %v5941_v39 = vadd.f32 %v4030_v54, %v7897_v37  ;;  %v4032_v15 = vpop.f32.mrb[34].mxu0 }
 0x35f   :  { %v4139_v25 = vmul.f32 0.70710677, %v5940_v28  ;;  %v5942_v6 = vadd.f32 %v4032_v15, %v7893_v26  ;;  %v4034_v19 = vpop.f32.mrb[35].mxu0  ;;  %v4107_v49 = vmul.f32 0.5, %v5940_v28 }
 0x360   :  { %v4140_v58 = vmul.f32 0.70710677, %v5941_v39  ;;  %v5943_v12 = vadd.f32 %v4034_v19, %v7897_v37  ;;  %v4108_v18 = vmul.f32 0.5, %v5941_v39 }
 0x361   :  { %6843 = verf.f32 %v4139_v25  ;;  %v4141_v50 = vmul.f32 0.70710677, %v5942_v6  ;;  %v4109_v33 = vmul.f32 0.5, %v5942_v6 }
 0x362   :  { %6845 = verf.f32 %v4140_v58  ;;  %v4142_v59 = vmul.f32 0.70710677, %v5943_v12  ;;  %v4110_v48 = vmul.f32 0.5, %v5943_v12 }
 0x363   :  { %6847 = verf.f32 %v4141_v50 }
 0x364   :  { %6849 = verf.f32 %v4142_v59  ;;  %v4038_v21 = vpop.f32.mrb[36].mxu0 }
 0x365   :  { %v5944_v38 = vadd.f32 %v4038_v21, %v7893_v26  ;;  %v4040_v35 = vpop.f32.mrb[37].mxu0 }
 0x366   :  { %v5945_v8 = vadd.f32 %v4040_v35, %v7897_v37  ;;  %v4042_v20 = vpop.f32.mrb[38].mxu0 }
 0x367   :  { %v4143_v51 = vmul.f32 0.70710677, %v5944_v38  ;;  %v5946_v45 = vadd.f32 %v4042_v20, %v7893_v26  ;;  %v4044_v61 = vpop.f32.mrb[39].mxu0  ;;  %v4111_v54 = vmul.f32 0.5, %v5944_v38 }
 0x368   :  { %v4144_v60 = vmul.f32 0.70710677, %v5945_v8  ;;  %v5947_v14 = vadd.f32 %v4044_v61, %v7897_v37  ;;  %v4112_v19 = vmul.f32 0.5, %v5945_v8 }
 0x369   :  { %6851 = verf.f32 %v4143_v51  ;;  %v4145_v52 = vmul.f32 0.70710677, %v5946_v45  ;;  %v4113_v39 = vmul.f32 0.5, %v5946_v45 }
 0x36a   :  { %6853 = verf.f32 %v4144_v60  ;;  %v4146_v16 = vmul.f32 0.70710677, %v5947_v14  ;;  %v4114_v58 = vmul.f32 0.5, %v5947_v14 }
 0x36b   :  { %v6844_v44 = vpop.eup %6843  ;;  %6855 = verf.f32 %v4145_v52 }
 0x36c   :  { %v6846_v55 = vpop.eup %6845  ;;  %v4203_v53 = vadd.f32 1.0, %v6844_v44  ;;  %6857 = verf.f32 %v4146_v16  ;;  %v4048_v31 = vpop.f32.mrb[40].mxu0 }
 0x36d   :  { %v6848_v41 = vpop.eup %6847  ;;  %v4204_v17 = vadd.f32 1.0, %v6846_v55  ;;  %v7908_v13 = vadd.f32 %v4048_v31, %v7893_v26  ;;  %v4050_v7 = vpop.f32.mrb[41].mxu0 }
 0x36e   :  { %v6850_v34 = vpop.eup %6849  ;;  %v4205_v32 = vadd.f32 1.0, %v6848_v41  ;;  %v7911_v30 = vadd.f32 %v4050_v7, %v7897_v37  ;;  %v4052_v56 = vpop.f32.mrb[42].mxu0  ;;  %v4235_v23 = vmul.f32 %v4203_v53, %v4107_v49 }
 0x36f   :  { %v4206_v42 = vadd.f32 1.0, %v6850_v34  ;;  %v4147_v1 = vmul.f32 0.70710677, %v7908_v13  ;;  %v4054_v57 = vpop.f32.mrb[43].mxu0  ;;  %v7916_v43 = vadd.f32 %v4052_v56, %v7893_v26  ;;  %v4236_v47 = vmul.f32 %v4204_v17, %v4108_v18 }
 0x370   :  { %v4237_v40 = vmul.f32 %v4205_v32, %v4109_v33  ;;  %v4148_v3 = vmul.f32 0.70710677, %v7911_v30  ;;  %v7919_v2 = vadd.f32 %v4054_v57, %v7897_v37  ;;  %v4115_v17 = vmul.f32 0.5, %v7908_v13 }
 0x371   :  { %v4238_v10 = vmul.f32 %v4206_v42, %v4110_v48  ;;  %6859 = verf.f32 %v4147_v1  ;;  %v4149_v24 = vmul.f32 0.70710677, %v7916_v43  ;;  %v4116_v32 = vmul.f32 0.5, %v7911_v30 }
 0x372   :  { %v4267_v36 = vpack.c.bf16 %v4237_v40, %v4235_v23  ;;  %6861 = verf.f32 %v4148_v3  ;;  %v4150_v27 = vmul.f32 0.70710677, %v7919_v2  ;;  %v4117_v56 = vmul.f32 0.5, %v7916_v43 }
 0x373   :  { %v6852_v29 = vpop.eup %6851  ;;  %v4268_v62 = vpack.c.bf16 %v4238_v10, %v4236_v47  ;;  %6863 = verf.f32 %v4149_v24  ;;  %v4118_v1 = vmul.f32 0.5, %v7919_v2 }
 0x374   :  { %v6854_v9 = vpop.eup %6853  ;;  %v4207_v0 = vadd.f32 1.0, %v6852_v29  ;;  %v4058_v5 = vpop.f32.mrb[44].mxu0  ;;  %6865 = verf.f32 %v4150_v27 }
 0x375   :  { %v6856_v46 = vpop.eup %6855  ;;  %v4208_v11 = vadd.f32 1.0, %v6854_v9  ;;  %v7924_v4 = vadd.f32 %v4058_v5, %v7893_v26  ;;  %v4060_v22 = vpop.f32.mrb[45].mxu0  ;;  %4450 = vmatprep.mubr.bf16.mxu1 %v4268_v62 }
 0x376   :  { %v6858_v28 = vpop.eup %6857  ;;  %v4209_v15 = vadd.f32 1.0, %v6856_v46  ;;  %v7927_v25 = vadd.f32 %v4060_v22, %v7897_v37  ;;  %v4062_v6 = vpop.f32.mrb[46].mxu0  ;;  %4451 = vmatmul.mubr.bf16.vlgmr.msra.gmra.mrb[32].mxu1 %v4267_v36  ;;  %v4239_v21 = vmul.f32 %v4207_v0, %v4111_v54 }
 0x377   :  { %v4210_v12 = vadd.f32 1.0, %v6858_v28  ;;  %v4151_v50 = vmul.f32 0.70710677, %v7924_v4  ;;  %v4064_v59 = vpop.f32.mrb[47].mxu0  ;;  %5861 = vmatpush3.bf16.msra.mxu1 %v7885_v63  ;;  %v5954_v38 = vadd.f32 %v4062_v6, %v7893_v26  ;;  %v4240_v51 = vmul.f32 %v4208_v11, %v4112_v19 }
 0x378   :  { %v4241_v35 = vmul.f32 %v4209_v15, %v4113_v39  ;;  %v4152_v20 = vmul.f32 0.70710677, %v7927_v25  ;;  %v5955_v61 = vadd.f32 %v4064_v59, %v7897_v37  ;;  %v4119_v11 = vmul.f32 0.5, %v7924_v4 }
 0x379   :  { %v4242_v45 = vmul.f32 %v4210_v12, %v4114_v58  ;;  %6867 = verf.f32 %v4151_v50  ;;  %v4153_v8 = vmul.f32 0.70710677, %v5954_v38  ;;  %v4120_v15 = vmul.f32 0.5, %v7927_v25 }
 0x37a   :  { %6869 = verf.f32 %v4152_v20  ;;  %v4269_v60 = vpack.c.bf16 %v4241_v35, %v4239_v21  ;;  %v4154_v52 = vmul.f32 0.70710677, %v5955_v61  ;;  %v4121_v6 = vmul.f32 0.5, %v5954_v38 }
 0x37b   :  { %v6860_v14 = vpop.eup %6859  ;;  %v4270_v16 = vpack.c.bf16 %v4242_v45, %v4240_v51  ;;  %6871 = verf.f32 %v4153_v8  ;;  %v4122_v50 = vmul.f32 0.5, %v5955_v61 }
 0x37c   :  { %v6862_v44 = vpop.eup %6861  ;;  %v4068_v63 = vpop.f32.mrb[48].mxu0  ;;  %v4211_v55 = vadd.f32 1.0, %v6860_v14  ;;  %6873 = verf.f32 %v4154_v52 }
 0x37d   :  { %v7935_v53 = vadd.f32 %v4068_v63, %v7893_v26  ;;  %v4070_v31 = vpop.f32.mrb[49].mxu0  ;;  %4458 = vmatprep.mubr.bf16.mxu1 %v4270_v16  ;;  %v6864_v41 = vpop.eup %6863  ;;  %v4212_v7 = vadd.f32 1.0, %v6862_v44 }
 0x37e   :  { %v7939_v34 = vadd.f32 %v4070_v31, %v7897_v37  ;;  %v4072_v49 = vpop.f32.mrb[50].mxu0  ;;  %4459 = vmatmul.mubr.bf16.gmra.mrb[36].mxu1 %v4269_v60  ;;  %v6866_v33 = vpop.eup %6865  ;;  %v4213_v18 = vadd.f32 1.0, %v6864_v41  ;;  %v4243_v40 = vmul.f32 %v4211_v55, %v4115_v17 }
 0x37f   :  { %v4155_v48 = vmul.f32 0.70710677, %v7935_v53  ;;  %v4074_v42 = vpop.f32.mrb[51].mxu0  ;;  %v4214_v57 = vadd.f32 1.0, %v6866_v33  ;;  %v7947_v23 = vadd.f32 %v4072_v49, %v7893_v26  ;;  %v4244_v30 = vmul.f32 %v4212_v7, %v4116_v32 }
 0x380   :  { %v4156_v13 = vmul.f32 0.70710677, %v7939_v34  ;;  %v4245_v3 = vmul.f32 %v4213_v18, %v4117_v56  ;;  %v7950_v47 = vadd.f32 %v4074_v42, %v7897_v37  ;;  %v4123_v41 = vmul.f32 0.5, %v7935_v53 }
 0x381   :  { %6875 = verf.f32 %v4155_v48  ;;  %v4246_v43 = vmul.f32 %v4214_v57, %v4118_v1  ;;  %v4157_v10 = vmul.f32 0.70710677, %v7947_v23  ;;  %v4124_v32 = vmul.f32 0.5, %v7939_v34 }
 0x382   :  { %6877 = verf.f32 %v4156_v13  ;;  %v4158_v2 = vmul.f32 0.70710677, %v7950_v47  ;;  %v4271_v24 = vpack.c.bf16 %v4245_v3, %v4243_v40  ;;  %v4125_v56 = vmul.f32 0.5, %v7947_v23 }
 0x383   :  { %v6868_v36 = vpop.eup %6867  ;;  %6879 = verf.f32 %v4157_v10  ;;  %v4272_v62 = vpack.c.bf16 %v4246_v43, %v4244_v30  ;;  %v4126_v1 = vmul.f32 0.5, %v7950_v47 }
 0x384   :  { %v6870_v29 = vpop.eup %6869  ;;  %v4078_v27 = vpop.f32.mrb[52].mxu0  ;;  %v4215_v9 = vadd.f32 1.0, %v6868_v36  ;;  %6881 = verf.f32 %v4158_v2 }
 0x385   :  { %v7955_v0 = vadd.f32 %v4078_v27, %v7893_v26  ;;  %v4080_v5 = vpop.f32.mrb[53].mxu0  ;;  %v6872_v46 = vpop.eup %6871  ;;  %v4216_v22 = vadd.f32 1.0, %v6870_v29  ;;  %4466 = vmatprep.mubr.bf16.mxu1 %v4272_v62 }
 0x386   :  { %v7959_v28 = vadd.f32 %v4080_v5, %v7897_v37  ;;  %v4082_v54 = vpop.f32.mrb[54].mxu0  ;;  %v6874_v39 = vpop.eup %6873  ;;  %v4217_v19 = vadd.f32 1.0, %v6872_v46  ;;  %4467 = vmatmul.mubr.bf16.gmra.mrb[40].mxu1 %v4271_v24  ;;  %v4247_v35 = vmul.f32 %v4215_v9, %v4119_v11 }
 0x387   :  { %v4159_v58 = vmul.f32 0.70710677, %v7955_v0  ;;  %v4084_v12 = vpop.f32.mrb[55].mxu0  ;;  %v4218_v59 = vadd.f32 1.0, %v6874_v39  ;;  %v7965_v4 = vadd.f32 %v4082_v54, %v7893_v26  ;;  %v4248_v25 = vmul.f32 %v4216_v22, %v4120_v15 }
 0x388   :  { %v4160_v21 = vmul.f32 0.70710677, %v7959_v28  ;;  %v4249_v20 = vmul.f32 %v4217_v19, %v4121_v6  ;;  %v7968_v51 = vadd.f32 %v4084_v12, %v7897_v37  ;;  %v4127_v46 = vmul.f32 0.5, %v7955_v0 }
 0x389   :  { %6883 = verf.f32 %v4159_v58  ;;  %v4250_v38 = vmul.f32 %v4218_v59, %v4122_v50  ;;  %v4161_v45 = vmul.f32 0.70710677, %v7965_v4  ;;  %v4128_v15 = vmul.f32 0.5, %v7959_v28 }
 0x38a   :  { %6885 = verf.f32 %v4160_v21  ;;  %v4162_v61 = vmul.f32 0.70710677, %v7968_v51  ;;  %v4273_v60 = vpack.c.bf16 %v4249_v20, %v4247_v35  ;;  %v4129_v6 = vmul.f32 0.5, %v7965_v4 }
 0x38b   :  { %v6876_v8 = vpop.eup %6875  ;;  %6887 = verf.f32 %v4161_v45  ;;  %v4274_v16 = vpack.c.bf16 %v4250_v38, %v4248_v25  ;;  %v4130_v50 = vmul.f32 0.5, %v7968_v51 }
 0x38c   :  { %v6878_v14 = vpop.eup %6877  ;;  %v4088_v52 = vpop.f32.mrb[56].mxu0  ;;  %v4219_v44 = vadd.f32 1.0, %v6876_v8  ;;  %6889 = verf.f32 %v4162_v61 }
 0x38d   :  { %v7973_v63 = vadd.f32 %v4088_v52, %v7893_v26  ;;  %v4090_v55 = vpop.f32.mrb[57].mxu0  ;;  %v6880_v31 = vpop.eup %6879  ;;  %v4220_v17 = vadd.f32 1.0, %v6878_v14  ;;  %4474 = vmatprep.mubr.bf16.mxu1 %v4274_v16 }
 0x38e   :  { %v7977_v7 = vadd.f32 %v4090_v55, %v7897_v37  ;;  %v4092_v49 = vpop.f32.mrb[58].mxu0  ;;  %v6882_v33 = vpop.eup %6881  ;;  %v4221_v18 = vadd.f32 1.0, %v6880_v31  ;;  %4475 = vmatmul.mubr.bf16.gmra.mrb[44].mxu1 %v4273_v60  ;;  %v4251_v40 = vmul.f32 %v4219_v44, %v4123_v41 }
 0x38f   :  { %v4163_v48 = vmul.f32 0.70710677, %v7973_v63  ;;  %v4094_v42 = vpop.f32.mrb[59].mxu0  ;;  %v4222_v57 = vadd.f32 1.0, %v6882_v33  ;;  %v5966_v13 = vadd.f32 %v4092_v49, %v7893_v26  ;;  %v4252_v34 = vmul.f32 %v4220_v17, %v4124_v32 }
 0x390   :  { %v4164_v53 = vmul.f32 0.70710677, %v7977_v7  ;;  %v4253_v3 = vmul.f32 %v4221_v18, %v4125_v56  ;;  %v5967_v30 = vadd.f32 %v4094_v42, %v7897_v37  ;;  %v4131_v44 = vmul.f32 0.5, %v7973_v63 }
 0x391   :  { %6891 = verf.f32 %v4163_v48  ;;  %v4254_v43 = vmul.f32 %v4222_v57, %v4126_v1  ;;  %v4165_v23 = vmul.f32 0.70710677, %v5966_v13  ;;  %v4133_v55 = vmul.f32 0.5, %v5966_v13 }
 0x392   :  { %6893 = verf.f32 %v4164_v53  ;;  %v4166_v36 = vmul.f32 0.70710677, %v5967_v30  ;;  %v4275_v2 = vpack.c.bf16 %v4253_v3, %v4251_v40  ;;  %v4132_v31 = vmul.f32 0.5, %v7977_v7 }
 0x393   :  { %v6884_v10 = vpop.eup %6883  ;;  %6895 = verf.f32 %v4165_v23  ;;  %v4276_v29 = vpack.c.bf16 %v4254_v43, %v4252_v34  ;;  %v4134_v41 = vmul.f32 0.5, %v5967_v30 }
 0x394   :  { %v6886_v24 = vpop.eup %6885  ;;  %v4098_v47 = vpop.f32.mrb[60].mxu0  ;;  %v4223_v27 = vadd.f32 1.0, %v6884_v10  ;;  %6897 = verf.f32 %v4166_v36 }
 0x395   :  { %v5968_v62 = vadd.f32 %v4098_v47, %v7893_v26  ;;  %v4100_v9 = vpop.f32.mrb[61].mxu0  ;;  %v6888_v5 = vpop.eup %6887  ;;  %v4224_v11 = vadd.f32 1.0, %v6886_v24  ;;  %4482 = vmatprep.mubr.bf16.mxu1 %v4276_v29  ;;  %v6702_v29 = vld [vmem:[%s8203_s7 + $0x8] sm:$0xff]  }
 0x396   :  { %v5969_v22 = vadd.f32 %v4100_v9, %v7897_v37  ;;  %v4102_v54 = vpop.f32.mrb[62].mxu0  ;;  %v6890_v39 = vpop.eup %6889  ;;  %v4225_v19 = vadd.f32 1.0, %v6888_v5  ;;  %4483 = vmatmul.mubr.bf16.gmra.mrb[48].mxu1 %v4275_v2  ;;  %v4255_v35 = vmul.f32 %v4223_v27, %v4127_v46  ;;  %5862 = vmatprep.subr.bf16.mxu1 %v6702_v29  ;;  %v6703_v27 = vld [vmem:[%s8203_s7 + $0x10] sm:$0xff]   ;;  %v6705_v9 = vld [vmem:[%s8203_s7 + $0x20] sm:$0xff]   ;;  %v6706_v5 = vld [vmem:[%s8203_s7 + $0x28] sm:$0xff]  }
 0x397   :  { %v4167_v58 = vmul.f32 0.70710677, %v5968_v62  ;;  %v4104_v12 = vpop.f32.mrb[63].mxu0  ;;  %v4226_v59 = vadd.f32 1.0, %v6890_v39  ;;  %v5970_v0 = vadd.f32 %v4102_v54, %v7893_v26  ;;  %v4256_v38 = vmul.f32 %v4224_v11, %v4128_v15  ;;  %5863 = vmatpush3.bf16.msra.mxu1 %v6702_v29  ;;  %v6707_v46 = vld [vmem:[%s8203_s7 + $0x30] sm:$0xff]   ;;  %v6708_v11 = vld [vmem:[%s8203_s7 + $0x38] sm:$0xff]  }
 0x398   :  { %v4168_v21 = vmul.f32 0.70710677, %v5969_v22  ;;  %v4257_v20 = vmul.f32 %v4225_v19, %v4129_v6  ;;  %v5971_v25 = vadd.f32 %v4104_v12, %v7897_v37  ;;  %v4135_v13 = vmul.f32 0.5, %v5968_v62  ;;  %v6704_v62 = vld [vmem:[%s8203_s7 + $0x18] sm:$0xff]   ;;  %5864 = vmatprep.subr.bf16.mxu1 %v6703_v27  ;;  %v8020_v54 = vld [vmem:[%s8202_s6] ss:$0 sm:$0xff] }
 0x399   :  { %6899 = verf.f32 %v4167_v58  ;;  %v4258_v45 = vmul.f32 %v4226_v59, %v4130_v50  ;;  %v4169_v28 = vmul.f32 0.70710677, %v5970_v0  ;;  %v4137_v3 = vmul.f32 0.5, %v5970_v0 }
 0x39a   :  { %6901 = verf.f32 %v4168_v21  ;;  %v4170_v8 = vmul.f32 0.70710677, %v5971_v25  ;;  %v4277_v61 = vpack.c.bf16 %v4257_v20, %v4255_v35  ;;  %v4136_v7 = vmul.f32 0.5, %v5969_v22 }
 0x39b   :  { %v6892_v4 = vpop.eup %6891  ;;  %6903 = verf.f32 %v4169_v28  ;;  %v4278_v14 = vpack.c.bf16 %v4258_v45, %v4256_v38  ;;  %v4138_v30 = vmul.f32 0.5, %v5971_v25  ;;  %5865 = vmatpush3.bf16.msra.mxu1 %v6703_v27 }
 0x39c   :  { %v6894_v60 = vpop.eup %6893  ;;  %v4227_v51 = vadd.f32 1.0, %v6892_v4  ;;  %6905 = verf.f32 %v4170_v8  ;;  %5866 = vmatprep.subr.bf16.mxu1 %v6704_v62 }
 0x39d   :  { %v6896_v52 = vpop.eup %6895  ;;  %v4228_v16 = vadd.f32 1.0, %v6894_v60  ;;  %4490 = vmatprep.mubr.bf16.mxu1 %v4278_v14 }
 0x39e   :  { %v6898_v26 = vpop.eup %6897  ;;  %v4229_v37 = vadd.f32 1.0, %v6896_v52  ;;  %4491 = vmatmul.mubr.bf16.gmra.mrb[52].mxu1 %v4277_v61  ;;  %v4259_v49 = vmul.f32 %v4227_v51, %v4131_v44 }
 0x39f   :  { %v4230_v17 = vadd.f32 1.0, %v6898_v26  ;;  %v4260_v32 = vmul.f32 %v4228_v16, %v4132_v31  ;;  %5867 = vmatpush3.bf16.msra.mxu1 %v6704_v62 }
 0x3a0   :  { %v4261_v33 = vmul.f32 %v4229_v37, %v4133_v55  ;;  %5868 = vmatprep.subr.bf16.mxu1 %v6705_v9 }
 0x3a1   :  { %v4262_v56 = vmul.f32 %v4230_v17, %v4134_v41 }
 0x3a2   :  { %v4279_v48 = vpack.c.bf16 %v4261_v33, %v4259_v49 }
 0x3a3   :  { %v6900_v18 = vpop.eup %6899  ;;  %v4280_v1 = vpack.c.bf16 %v4262_v56, %v4260_v32  ;;  %5869 = vmatpush3.bf16.msra.mxu1 %v6705_v9 }
 0x3a4   :  { %v6902_v42 = vpop.eup %6901  ;;  %v4231_v57 = vadd.f32 1.0, %v6900_v18  ;;  %5870 = vmatprep.subr.bf16.mxu1 %v6706_v5 }
 0x3a5   :  { %v6904_v53 = vpop.eup %6903  ;;  %v4232_v40 = vadd.f32 1.0, %v6902_v42  ;;  %4498 = vmatprep.mubr.bf16.mxu1 %v4280_v1 }
 0x3a6   :  { %v6906_v63 = vpop.eup %6905  ;;  %v4233_v34 = vadd.f32 1.0, %v6904_v53  ;;  %4499 = vmatmul.mubr.bf16.gmra.mrb[56].mxu1 %v4279_v48  ;;  %v4263_v23 = vmul.f32 %v4231_v57, %v4135_v13 }
 0x3a7   :  { %v4234_v43 = vadd.f32 1.0, %v6906_v63  ;;  %v4264_v36 = vmul.f32 %v4232_v40, %v4136_v7  ;;  %5871 = vmatpush3.bf16.msra.mxu1 %v6706_v5 }
 0x3a8   :  { %v4265_v10 = vmul.f32 %v4233_v34, %v4137_v3  ;;  %5872 = vmatprep.subr.bf16.mxu1 %v6707_v46 }
 0x3a9   :  { %v4266_v2 = vmul.f32 %v4234_v43, %v4138_v30 }
 0x3aa   :  { %v4281_v24 = vpack.c.bf16 %v4265_v10, %v4263_v23 }
 0x3ab   :  { %v4282_v47 = vpack.c.bf16 %v4266_v2, %v4264_v36  ;;  %5873 = vmatpush3.bf16.msra.mxu1 %v6707_v46 }
 0x3ac   :  { %5874 = vmatprep.subr.bf16.mxu1 %v6708_v11 }
 0x3ad   :  { %4506 = vmatprep.mubr.bf16.mxu1 %v4282_v47 }
 0x3ae   :  { %4507 = vmatmul.mubr.bf16.gmra.mrb[60].mxu1 %v4281_v24 }
 0x3af   :  { %5875 = vmatpush3.bf16.msra.mxu1 %v6708_v11 }
 0x449   :  { %v5774_v22 = vpop.f32.mrb[32].mxu1 }
 0x44a   :  { %v5775_v39 = vpop.f32.mrb[33].mxu1 }
 0x44b   :  { %v5776_v15 = vadd.f32 %v5775_v39, %v5774_v22  ;;  %v5777_v6 = vpop.f32.mrb[34].mxu1 }
 0x44c   :  { %v5778_v19 = vpop.f32.mrb[35].mxu1 }
 0x44d   :  { %v4453_v58 = vadd.f32 %v5776_v15, %v8020_v54  ;;  %v5779_v12 = vadd.f32 %v5778_v19, %v5777_v6 }
 0x44f   :  { %v4531_v50 = vmul.f32 0.70710677, %v4453_v58  ;;  %v4456_v59 = vadd.f32 %v5779_v12, %v8020_v54  ;;  %v4515_v55 = vmul.f32 0.5, %v4453_v58 }
 0x451   :  { %6907 = verf.f32 %v4531_v50  ;;  %v4532_v21 = vmul.f32 0.70710677, %v4456_v59  ;;  %v5780_v0 = vpop.f32.mrb[36].mxu1  ;;  %v4516_v31 = vmul.f32 0.5, %v4456_v59 }
 0x452   :  { %v5781_v35 = vpop.f32.mrb[37].mxu1 }
 0x453   :  { %6909 = verf.f32 %v4532_v21  ;;  %v5782_v20 = vadd.f32 %v5781_v35, %v5780_v0  ;;  %v5783_v25 = vpop.f32.mrb[38].mxu1 }
 0x454   :  { %v5784_v38 = vpop.f32.mrb[39].mxu1 }
 0x455   :  { %v4461_v45 = vadd.f32 %v5782_v20, %v8020_v54  ;;  %v5785_v28 = vadd.f32 %v5784_v38, %v5783_v25 }
 0x457   :  { %v4533_v4 = vmul.f32 0.70710677, %v4461_v45  ;;  %v4464_v8 = vadd.f32 %v5785_v28, %v8020_v54  ;;  %v4517_v34 = vmul.f32 0.5, %v4461_v45 }
 0x459   :  { %6911 = verf.f32 %v4533_v4  ;;  %v4534_v61 = vmul.f32 0.70710677, %v4464_v8  ;;  %v5786_v60 = vpop.f32.mrb[40].mxu1  ;;  %v4518_v30 = vmul.f32 0.5, %v4464_v8 }
 0x45a   :  { %v5787_v51 = vpop.f32.mrb[41].mxu1 }
 0x45b   :  { %v6908_v14 = vpop.eup %6907  ;;  %6913 = verf.f32 %v4534_v61  ;;  %v5788_v16 = vadd.f32 %v5787_v51, %v5786_v60  ;;  %v5789_v26 = vpop.f32.mrb[42].mxu1 }
 0x45c   :  { %v4563_v52 = vadd.f32 1.0, %v6908_v14  ;;  %v5790_v37 = vpop.f32.mrb[43].mxu1 }
 0x45d   :  { %v6910_v44 = vpop.eup %6909  ;;  %v4469_v17 = vadd.f32 %v5788_v16, %v8020_v54  ;;  %v5791_v49 = vadd.f32 %v5790_v37, %v5789_v26 }
 0x45e   :  { %v4564_v41 = vadd.f32 1.0, %v6910_v44  ;;  %v4579_v56 = vmul.f32 %v4563_v52, %v4515_v55 }
 0x45f   :  { %v4535_v33 = vmul.f32 0.70710677, %v4469_v17  ;;  %v4472_v32 = vadd.f32 %v5791_v49, %v8020_v54  ;;  %v4519_v58 = vmul.f32 0.5, %v4469_v17 }
 0x460   :  { %v4580_v18 = vmul.f32 %v4564_v41, %v4516_v31 }
 0x461   :  { %6915 = verf.f32 %v4535_v33  ;;  %v4536_v48 = vmul.f32 0.70710677, %v4472_v32  ;;  %v5792_v42 = vpop.f32.mrb[44].mxu1  ;;  %v4520_v12 = vmul.f32 0.5, %v4472_v32 }
 0x462   :  { %v4595_v1 = vpack.c.bf16 %v4580_v18, %v4579_v56  ;;  %v5793_v53 = vpop.f32.mrb[45].mxu1 }
 0x463   :  { %v6912_v57 = vpop.eup %6911  ;;  %6917 = verf.f32 %v4536_v48  ;;  %v5794_v63 = vadd.f32 %v5793_v53, %v5792_v42  ;;  %v5795_v13 = vpop.f32.mrb[46].mxu1 }
 0x464   :  { %v4565_v40 = vadd.f32 1.0, %v6912_v57  ;;  %5876 = vmatprep.mubr.bf16.mxu1 %v4595_v1  ;;  %v5796_v7 = vpop.f32.mrb[47].mxu1 }
 0x465   :  { %v6914_v3 = vpop.eup %6913  ;;  %v4477_v23 = vadd.f32 %v5794_v63, %v8020_v54  ;;  %v5797_v10 = vadd.f32 %v5796_v7, %v5795_v13 }
 0x466   :  { %v4566_v43 = vadd.f32 1.0, %v6914_v3  ;;  %v4581_v36 = vmul.f32 %v4565_v40, %v4517_v34 }
 0x467   :  { %v4537_v24 = vmul.f32 0.70710677, %v4477_v23  ;;  %v4480_v47 = vadd.f32 %v5797_v10, %v8020_v54  ;;  %v4521_v16 = vmul.f32 0.5, %v4477_v23 }
 0x468   :  { %v4582_v2 = vmul.f32 %v4566_v43, %v4518_v30 }
 0x469   :  { %6919 = verf.f32 %v4537_v24  ;;  %v4538_v27 = vmul.f32 0.70710677, %v4480_v47  ;;  %v5798_v62 = vpop.f32.mrb[48].mxu1  ;;  %v4522_v26 = vmul.f32 0.5, %v4480_v47 }
 0x46a   :  { %v4596_v29 = vpack.c.bf16 %v4582_v2, %v4581_v36  ;;  %v5799_v9 = vpop.f32.mrb[49].mxu1 }
 0x46b   :  { %v6916_v5 = vpop.eup %6915  ;;  %6921 = verf.f32 %v4538_v27  ;;  %v5800_v46 = vadd.f32 %v5799_v9, %v5798_v62  ;;  %v5801_v11 = vpop.f32.mrb[50].mxu1 }
 0x46c   :  { %5877 = vmatmul.mubr.bf16.vlgmr.msra.gmra.mrb[64].mxu1 %v4596_v29  ;;  %v4567_v22 = vadd.f32 1.0, %v6916_v5  ;;  %v5802_v39 = vpop.f32.mrb[51].mxu1 }
 0x46d   :  { %v6918_v15 = vpop.eup %6917  ;;  %v4485_v6 = vadd.f32 %v5800_v46, %v8020_v54  ;;  %v5803_v19 = vadd.f32 %v5802_v39, %v5801_v11 }
 0x46e   :  { %v4568_v50 = vadd.f32 1.0, %v6918_v15  ;;  %v4583_v0 = vmul.f32 %v4567_v22, %v4519_v58 }
 0x46f   :  { %v4539_v59 = vmul.f32 0.70710677, %v4485_v6  ;;  %v4488_v21 = vadd.f32 %v5803_v19, %v8020_v54  ;;  %v4523_v63 = vmul.f32 0.5, %v4485_v6 }
 0x470   :  { %v4584_v35 = vmul.f32 %v4568_v50, %v4520_v12 }
 0x471   :  { %6923 = verf.f32 %v4539_v59  ;;  %v4540_v20 = vmul.f32 0.70710677, %v4488_v21  ;;  %v5804_v25 = vpop.f32.mrb[52].mxu1  ;;  %v4524_v13 = vmul.f32 0.5, %v4488_v21 }
 0x472   :  { %v5805_v38 = vpop.f32.mrb[53].mxu1  ;;  %v4597_v45 = vpack.c.bf16 %v4584_v35, %v4583_v0 }
 0x473   :  { %v6920_v28 = vpop.eup %6919  ;;  %6925 = verf.f32 %v4540_v20  ;;  %v5806_v4 = vadd.f32 %v5805_v38, %v5804_v25  ;;  %v5807_v8 = vpop.f32.mrb[54].mxu1 }
 0x474   :  { %v4569_v61 = vadd.f32 1.0, %v6920_v28  ;;  %v5808_v60 = vpop.f32.mrb[55].mxu1  ;;  %5880 = vmatprep.mubr.bf16.mxu1 %v4597_v45 }
 0x475   :  { %v6922_v14 = vpop.eup %6921  ;;  %v4493_v51 = vadd.f32 %v5806_v4, %v8020_v54  ;;  %v5809_v52 = vadd.f32 %v5808_v60, %v5807_v8 }
 0x476   :  { %v4570_v44 = vadd.f32 1.0, %v6922_v14  ;;  %v4585_v31 = vmul.f32 %v4569_v61, %v4521_v16 }
 0x477   :  { %v4541_v55 = vmul.f32 0.70710677, %v4493_v51  ;;  %v4496_v37 = vadd.f32 %v5809_v52, %v8020_v54  ;;  %v4525_v11 = vmul.f32 0.5, %v4493_v51 }
 0x478   :  { %v4586_v41 = vmul.f32 %v4570_v44, %v4522_v26  ;;  %v6709_v26 = vld [vmem:[%s8205_s9] sm:$0xff]   ;;  %v6710_v44 = vld [vmem:[%s8205_s9 + $0x8] sm:$0xff]  }
 0x479   :  { %6927 = verf.f32 %v4541_v55  ;;  %v4542_v17 = vmul.f32 0.70710677, %v4496_v37  ;;  %v5810_v49 = vpop.f32.mrb[56].mxu1  ;;  %v4526_v22 = vmul.f32 0.5, %v4496_v37  ;;  %5892 = vmatprep.subr.bf16.mxu1 %v6709_v26  ;;  %v6711_v55 = vld [vmem:[%s8205_s9 + $0x10] sm:$0xff]   ;;  %v6712_v37 = vld [vmem:[%s8205_s9 + $0x18] sm:$0xff]  }
 0x47a   :  { %v5811_v33 = vpop.f32.mrb[57].mxu1  ;;  %v4598_v32 = vpack.c.bf16 %v4586_v41, %v4585_v31  ;;  %5893 = vmatpush3.bf16.msra.mxu1 %v6709_v26  ;;  %v8053_v31 = vld [vmem:[%s8204_s8] ss:$0 sm:$0xff] }
 0x47b   :  { %v6924_v56 = vpop.eup %6923  ;;  %6929 = verf.f32 %v4542_v17  ;;  %v5812_v18 = vadd.f32 %v5811_v33, %v5810_v49  ;;  %v5813_v48 = vpop.f32.mrb[58].mxu1  ;;  %5894 = vmatprep.subr.bf16.mxu1 %v6710_v44 }
 0x47c   :  { %v4571_v42 = vadd.f32 1.0, %v6924_v56  ;;  %v5814_v1 = vpop.f32.mrb[59].mxu1  ;;  %5881 = vmatmul.mubr.bf16.gmra.mrb[68].mxu1 %v4598_v32 }
 0x47d   :  { %v6926_v57 = vpop.eup %6925  ;;  %v4501_v53 = vadd.f32 %v5812_v18, %v8020_v54  ;;  %v5815_v40 = vadd.f32 %v5814_v1, %v5813_v48 }
 0x47e   :  { %v4572_v3 = vadd.f32 1.0, %v6926_v57  ;;  %v4587_v30 = vmul.f32 %v4571_v42, %v4523_v63  ;;  %5895 = vmatpush3.bf16.msra.mxu1 %v6710_v44 }
 0x47f   :  { %v4543_v34 = vmul.f32 0.70710677, %v4501_v53  ;;  %v4504_v7 = vadd.f32 %v5815_v40, %v8020_v54  ;;  %v4527_v35 = vmul.f32 0.5, %v4501_v53  ;;  %5896 = vmatprep.subr.bf16.mxu1 %v6711_v55 }
 0x480   :  { %v4588_v43 = vmul.f32 %v4572_v3, %v4524_v13 }
 0x481   :  { %6931 = verf.f32 %v4543_v34  ;;  %v4544_v23 = vmul.f32 0.70710677, %v4504_v7  ;;  %v5816_v10 = vpop.f32.mrb[60].mxu1  ;;  %v4528_v20 = vmul.f32 0.5, %v4504_v7 }
 0x482   :  { %v5817_v36 = vpop.f32.mrb[61].mxu1  ;;  %v4599_v2 = vpack.c.bf16 %v4588_v43, %v4587_v30  ;;  %5897 = vmatpush3.bf16.msra.mxu1 %v6711_v55 }
 0x483   :  { %v6928_v24 = vpop.eup %6927  ;;  %6933 = verf.f32 %v4544_v23  ;;  %v5818_v47 = vadd.f32 %v5817_v36, %v5816_v10  ;;  %v5819_v29 = vpop.f32.mrb[62].mxu1  ;;  %5898 = vmatprep.subr.bf16.mxu1 %v6712_v37 }
 0x484   :  { %v4573_v27 = vadd.f32 1.0, %v6928_v24  ;;  %v5820_v62 = vpop.f32.mrb[63].mxu1  ;;  %5884 = vmatprep.mubr.bf16.mxu1 %v4599_v2 }
 0x485   :  { %v6930_v9 = vpop.eup %6929  ;;  %v4509_v5 = vadd.f32 %v5818_v47, %v8020_v54  ;;  %v5821_v46 = vadd.f32 %v5820_v62, %v5819_v29 }
 0x486   :  { %v4574_v39 = vadd.f32 1.0, %v6930_v9  ;;  %v4589_v19 = vmul.f32 %v4573_v27, %v4525_v11  ;;  %5899 = vmatpush3.bf16.msra.mxu1 %v6712_v37 }
 0x487   :  { %v4545_v15 = vmul.f32 0.70710677, %v4509_v5  ;;  %v4512_v6 = vadd.f32 %v5821_v46, %v8020_v54  ;;  %v4529_v61 = vmul.f32 0.5, %v4509_v5 }
 0x488   :  { %v4590_v58 = vmul.f32 %v4574_v39, %v4526_v22 }
 0x489   :  { %6935 = verf.f32 %v4545_v15  ;;  %v4546_v12 = vmul.f32 0.70710677, %v4512_v6  ;;  %v4530_v60 = vmul.f32 0.5, %v4512_v6 }
 0x48a   :  { %v4600_v50 = vpack.c.bf16 %v4590_v58, %v4589_v19 }
 0x48b   :  { %v6932_v59 = vpop.eup %6931  ;;  %6937 = verf.f32 %v4546_v12 }
 0x48c   :  { %v4575_v21 = vadd.f32 1.0, %v6932_v59  ;;  %5885 = vmatmul.mubr.bf16.gmra.mrb[72].mxu1 %v4600_v50 }
 0x48d   :  { %v6934_v0 = vpop.eup %6933 }
 0x48e   :  { %v4576_v25 = vadd.f32 1.0, %v6934_v0  ;;  %v4591_v38 = vmul.f32 %v4575_v21, %v4527_v35 }
 0x490   :  { %v4592_v45 = vmul.f32 %v4576_v25, %v4528_v20 }
 0x492   :  { %v4601_v28 = vpack.c.bf16 %v4592_v45, %v4591_v38 }
 0x493   :  { %v6936_v4 = vpop.eup %6935 }
 0x494   :  { %v4577_v8 = vadd.f32 1.0, %v6936_v4  ;;  %5888 = vmatprep.mubr.bf16.mxu1 %v4601_v28 }
 0x495   :  { %v6938_v54 = vpop.eup %6937 }
 0x496   :  { %v4578_v14 = vadd.f32 1.0, %v6938_v54  ;;  %v4593_v51 = vmul.f32 %v4577_v8, %v4529_v61 }
 0x498   :  { %v4594_v52 = vmul.f32 %v4578_v14, %v4530_v60 }
 0x49a   :  { %v4602_v16 = vpack.c.bf16 %v4594_v52, %v4593_v51 }
 0x49c   :  { %5889 = vmatmul.mubr.bf16.gmra.mrb[76].mxu1 %v4602_v16 }
 0x53f   :  { %v5878_v41 = vpop.f32.mrb[64].mxu1 }
 0x540   :  { %v4717_v17 = vadd.f32 %v5878_v41, %v8053_v31  ;;  %v4708_v49 = vpop.f32.mrb[65].mxu1 }
 0x541   :  { %v4709_v33 = vadd.f32 %v8053_v31, %v4708_v49  ;;  %v5879_v32 = vpop.f32.mrb[66].mxu1 }
 0x542   :  { %v4789_v56 = vmul.f32 0.70710677, %v4717_v17  ;;  %v4720_v18 = vadd.f32 %v5879_v32, %v8053_v31  ;;  %v4711_v48 = vpop.f32.mrb[67].mxu1  ;;  %v4773_v43 = vmul.f32 0.5, %v4717_v17 }
 0x543   :  { %v4787_v42 = vmul.f32 0.70710677, %v4709_v33  ;;  %v4712_v1 = vadd.f32 %v8053_v31, %v4711_v48  ;;  %v4771_v24 = vmul.f32 0.5, %v4709_v33 }
 0x544   :  { %6939 = verf.f32 %v4789_v56  ;;  %v4790_v57 = vmul.f32 0.70710677, %v4720_v18  ;;  %v4774_v23 = vmul.f32 0.5, %v4720_v18 }
 0x545   :  { %6941 = verf.f32 %v4787_v42  ;;  %v4788_v53 = vmul.f32 0.70710677, %v4712_v1  ;;  %v4772_v47 = vmul.f32 0.5, %v4712_v1 }
 0x546   :  { %6943 = verf.f32 %v4790_v57 }
 0x547   :  { %6945 = verf.f32 %v4788_v53 }
 0x54e   :  { %v6940_v40 = vpop.eup %6939 }
 0x54f   :  { %v6942_v63 = vpop.eup %6941  ;;  %v4821_v13 = vadd.f32 1.0, %v6940_v40  ;;  %v5882_v7 = vpop.f32.mrb[68].mxu1 }
 0x550   :  { %v6944_v3 = vpop.eup %6943  ;;  %v4819_v34 = vadd.f32 1.0, %v6942_v63  ;;  %v4733_v36 = vadd.f32 %v5882_v7, %v8053_v31  ;;  %v4724_v2 = vpop.f32.mrb[69].mxu1 }
 0x551   :  { %v6946_v30 = vpop.eup %6945  ;;  %v4822_v10 = vadd.f32 1.0, %v6944_v3  ;;  %v4725_v27 = vadd.f32 %v8053_v31, %v4724_v2  ;;  %v5883_v62 = vpop.f32.mrb[70].mxu1  ;;  %v4837_v9 = vmul.f32 %v4821_v13, %v4773_v43 }
 0x552   :  { %v4820_v29 = vadd.f32 1.0, %v6946_v30  ;;  %v4793_v46 = vmul.f32 0.70710677, %v4733_v36  ;;  %v4736_v11 = vadd.f32 %v5883_v62, %v8053_v31  ;;  %v4727_v22 = vpop.f32.mrb[71].mxu1  ;;  %v4835_v39 = vmul.f32 %v4819_v34, %v4771_v24 }
 0x553   :  { %v4838_v5 = vmul.f32 %v4822_v10, %v4774_v23  ;;  %v4791_v6 = vmul.f32 0.70710677, %v4725_v27  ;;  %v4728_v19 = vadd.f32 %v8053_v31, %v4727_v22  ;;  %v4777_v8 = vmul.f32 0.5, %v4733_v36 }
 0x554   :  { %v4836_v15 = vmul.f32 %v4820_v29, %v4772_v47  ;;  %6947 = verf.f32 %v4793_v46  ;;  %v4794_v12 = vmul.f32 0.70710677, %v4736_v11  ;;  %v4778_v54 = vmul.f32 0.5, %v4736_v11 }
 0x555   :  { %v4852_v58 = vpack.c.bf16 %v4838_v5, %v4837_v9  ;;  %6949 = verf.f32 %v4791_v6  ;;  %v4792_v59 = vmul.f32 0.70710677, %v4728_v19  ;;  %v4775_v51 = vmul.f32 0.5, %v4725_v27 }
 0x556   :  { %v4851_v50 = vpack.c.bf16 %v4836_v15, %v4835_v39  ;;  %6951 = verf.f32 %v4794_v12  ;;  %v4776_v52 = vmul.f32 0.5, %v4728_v19 }
 0x557   :  { %6953 = verf.f32 %v4792_v59 }
 0x558   :  { %5900 = vmatprep.mubr.msk.bf16.mxu1 %vm4898_vm0, %v4851_v50 }
 0x559   :  { %5901 = vmatmul.mubr.msk.bf16.vlgmr.msra.gmra.mrb[80].mxu1 %vm4898_vm0, %v4852_v58 }
 0x55e   :  { %v6948_v21 = vpop.eup %6947 }
 0x55f   :  { %v6950_v0 = vpop.eup %6949  ;;  %v4825_v35 = vadd.f32 1.0, %v6948_v21  ;;  %v5886_v20 = vpop.f32.mrb[72].mxu1 }
 0x560   :  { %v6952_v25 = vpop.eup %6951  ;;  %v4823_v38 = vadd.f32 1.0, %v6950_v0  ;;  %v4749_v45 = vadd.f32 %v5886_v20, %v8053_v31  ;;  %v4740_v28 = vpop.f32.mrb[73].mxu1 }
 0x561   :  { %v6954_v4 = vpop.eup %6953  ;;  %v4826_v61 = vadd.f32 1.0, %v6952_v25  ;;  %v4741_v60 = vadd.f32 %v8053_v31, %v4740_v28  ;;  %v5887_v14 = vpop.f32.mrb[74].mxu1  ;;  %v4841_v55 = vmul.f32 %v4825_v35, %v4777_v8 }
 0x562   :  { %v4824_v16 = vadd.f32 1.0, %v6954_v4  ;;  %v4797_v26 = vmul.f32 0.70710677, %v4749_v45  ;;  %v4743_v44 = vpop.f32.mrb[75].mxu1  ;;  %v4752_v17 = vadd.f32 %v5887_v14, %v8053_v31  ;;  %v4839_v49 = vmul.f32 %v4823_v38, %v4775_v51  ;;  %v6713_v51 = vld [vmem:[%s8207_s11] sm:$0xff]  }
 0x563   :  { %v4842_v37 = vmul.f32 %v4826_v61, %v4778_v54  ;;  %v4795_v41 = vmul.f32 0.70710677, %v4741_v60  ;;  %v4744_v32 = vadd.f32 %v8053_v31, %v4743_v44  ;;  %v4781_v34 = vmul.f32 0.5, %v4749_v45  ;;  %5916 = vmatprep.subr.bf16.mxu0 %v6713_v51  ;;  %5936 = vmatprep.subr.bf16.mxu1 %v6713_v51 }
 0x564   :  { %v4840_v33 = vmul.f32 %v4824_v16, %v4776_v52  ;;  %6955 = verf.f32 %v4797_v26  ;;  %v4798_v18 = vmul.f32 0.70710677, %v4752_v17  ;;  %v4779_v10 = vmul.f32 0.5, %v4741_v60  ;;  %5917 = vmatpush3.bf16.msra.mxu0 %v6713_v51  ;;  %5938 = vmatpush3.bf16.msra.mxu1 %v6713_v51  ;;  %v6714_v52 = vld [vmem:[%s8207_s11 + $0x8] sm:$0xff]   ;;  %v8088_v16 = vld [vmem:[%s8206_s10] ss:$0 sm:$0xff] }
 0x565   :  { %v4854_v56 = vpack.c.bf16 %v4842_v37, %v4841_v55  ;;  %6957 = verf.f32 %v4795_v41  ;;  %v4796_v42 = vmul.f32 0.70710677, %v4744_v32  ;;  %v4782_v36 = vmul.f32 0.5, %v4752_v17  ;;  %5918 = vmatprep.subr.bf16.mxu0 %v6714_v52  ;;  %5937 = vmatprep.subr.bf16.mxu1 %v6714_v52 }
 0x566   :  { %v4853_v48 = vpack.c.bf16 %v4840_v33, %v4839_v49  ;;  %6959 = verf.f32 %v4798_v18  ;;  %v4780_v29 = vmul.f32 0.5, %v4744_v32 }
 0x567   :  { %6961 = verf.f32 %v4796_v42 }
 0x568   :  { %5904 = vmatprep.mubr.msk.bf16.mxu1 %vm4898_vm0, %v4853_v48  ;;  %5919 = vmatpush3.bf16.msra.mxu0 %v6714_v52 }
 0x569   :  { %5905 = vmatmul.mubr.msk.bf16.gmra.mrb[84].mxu1 %vm4898_vm0, %v4854_v56 }
 0x56a   :  { %5939 = vmatpush3.bf16.msra.mxu1 %v6714_v52 }
 0x56e   :  { %v6956_v1 = vpop.eup %6955 }
 0x56f   :  { %v6958_v57 = vpop.eup %6957  ;;  %v5890_v53 = vpop.f32.mrb[76].mxu1  ;;  %v4829_v40 = vadd.f32 1.0, %v6956_v1 }
 0x570   :  { %v4765_v63 = vadd.f32 %v5890_v53, %v8053_v31  ;;  %v4756_v13 = vpop.f32.mrb[77].mxu1  ;;  %v6960_v3 = vpop.eup %6959  ;;  %v4827_v7 = vadd.f32 1.0, %v6958_v57 }
 0x571   :  { %v4757_v30 = vadd.f32 %v8053_v31, %v4756_v13  ;;  %v5891_v43 = vpop.f32.mrb[78].mxu1  ;;  %v6962_v23 = vpop.eup %6961  ;;  %v4830_v2 = vadd.f32 1.0, %v6960_v3  ;;  %v4845_v5 = vmul.f32 %v4829_v40, %v4781_v34 }
 0x572   :  { %v4801_v24 = vmul.f32 0.70710677, %v4765_v63  ;;  %v4759_v47 = vpop.f32.mrb[79].mxu1  ;;  %v4828_v27 = vadd.f32 1.0, %v6962_v23  ;;  %v4768_v9 = vadd.f32 %v5891_v43, %v8053_v31  ;;  %v4843_v22 = vmul.f32 %v4827_v7, %v4779_v10 }
 0x573   :  { %v4799_v62 = vmul.f32 0.70710677, %v4757_v30  ;;  %v4846_v46 = vmul.f32 %v4830_v2, %v4782_v36  ;;  %v4760_v11 = vadd.f32 %v8053_v31, %v4759_v47  ;;  %v4785_v31 = vmul.f32 0.5, %v4765_v63 }
 0x574   :  { %6963 = verf.f32 %v4801_v24  ;;  %v4844_v39 = vmul.f32 %v4828_v27, %v4780_v29  ;;  %v4802_v15 = vmul.f32 0.70710677, %v4768_v9  ;;  %v4786_v20 = vmul.f32 0.5, %v4768_v9 }
 0x575   :  { %6965 = verf.f32 %v4799_v62  ;;  %v4856_v6 = vpack.c.bf16 %v4846_v46, %v4845_v5  ;;  %v4800_v19 = vmul.f32 0.70710677, %v4760_v11  ;;  %v4783_v38 = vmul.f32 0.5, %v4757_v30 }
 0x576   :  { %v4855_v58 = vpack.c.bf16 %v4844_v39, %v4843_v22  ;;  %6967 = verf.f32 %v4802_v15  ;;  %v4784_v45 = vmul.f32 0.5, %v4760_v11 }
 0x577   :  { %6969 = verf.f32 %v4800_v19 }
 0x578   :  { %5908 = vmatprep.mubr.msk.bf16.mxu1 %vm4898_vm0, %v4855_v58 }
 0x579   :  { %5909 = vmatmul.mubr.msk.bf16.gmra.mrb[88].mxu1 %vm4898_vm0, %v4856_v6 }
 0x57e   :  { %v6964_v12 = vpop.eup %6963 }
 0x57f   :  { %v6966_v50 = vpop.eup %6965  ;;  %v4833_v59 = vadd.f32 1.0, %v6964_v12 }
 0x580   :  { %v6968_v21 = vpop.eup %6967  ;;  %v4831_v0 = vadd.f32 1.0, %v6966_v50 }
 0x581   :  { %v6970_v35 = vpop.eup %6969  ;;  %v4834_v25 = vadd.f32 1.0, %v6968_v21  ;;  %v4849_v4 = vmul.f32 %v4833_v59, %v4785_v31 }
 0x582   :  { %v4832_v28 = vadd.f32 1.0, %v6970_v35  ;;  %v4847_v54 = vmul.f32 %v4831_v0, %v4783_v38 }
 0x583   :  { %v4850_v8 = vmul.f32 %v4834_v25, %v4786_v20 }
 0x584   :  { %v4848_v61 = vmul.f32 %v4832_v28, %v4784_v45 }
 0x585   :  { %v4858_v60 = vpack.c.bf16 %v4850_v8, %v4849_v4 }
 0x586   :  { %v4857_v14 = vpack.c.bf16 %v4848_v61, %v4847_v54 }
 0x588   :  { %5912 = vmatprep.mubr.msk.bf16.mxu1 %vm4898_vm0, %v4857_v14 }
 0x589   :  { %5913 = vmatmul.mubr.msk.bf16.gmra.mrb[92].mxu1 %vm4898_vm0, %v4858_v60 }
 0x62c   :  { %v5902_v26 = vpop.f32.mrb[80].mxu1 }
 0x62d   :  { %v4966_v44 = vadd.f32 %v5902_v26, %v8088_v16  ;;  %v4957_v55 = vpop.f32.mrb[81].mxu1 }
 0x62e   :  { %v4958_v37 = vadd.f32 %v8088_v16, %v4957_v55  ;;  %v5903_v41 = vpop.f32.mrb[82].mxu1 }
 0x62f   :  { %v5038_v17 = vmul.f32 0.70710677, %v4966_v44  ;;  %v4969_v49 = vadd.f32 %v5903_v41, %v8088_v16  ;;  %v4960_v33 = vpop.f32.mrb[83].mxu1  ;;  %v5022_v3 = vmul.f32 0.5, %v4966_v44 }
 0x630   :  { %v5036_v32 = vmul.f32 0.70710677, %v4958_v37  ;;  %v4961_v56 = vadd.f32 %v8088_v16, %v4960_v33  ;;  %v5020_v23 = vmul.f32 0.5, %v4958_v37 }
 0x631   :  { %6971 = verf.f32 %v5038_v17  ;;  %v5039_v18 = vmul.f32 0.70710677, %v4969_v49  ;;  %v5023_v34 = vmul.f32 0.5, %v4969_v49 }
 0x632   :  { %6973 = verf.f32 %v5036_v32  ;;  %v5037_v48 = vmul.f32 0.70710677, %v4961_v56  ;;  %v5021_v10 = vmul.f32 0.5, %v4961_v56 }
 0x633   :  { %6975 = verf.f32 %v5039_v18 }
 0x634   :  { %6977 = verf.f32 %v5037_v48 }
 0x63b   :  { %v6972_v42 = vpop.eup %6971 }
 0x63c   :  { %v6974_v1 = vpop.eup %6973  ;;  %v5070_v57 = vadd.f32 1.0, %v6972_v42  ;;  %v5906_v63 = vpop.f32.mrb[84].mxu1 }
 0x63d   :  { %v6976_v53 = vpop.eup %6975  ;;  %v5068_v40 = vadd.f32 1.0, %v6974_v1  ;;  %v4982_v30 = vadd.f32 %v5906_v63, %v8088_v16  ;;  %v4973_v43 = vpop.f32.mrb[85].mxu1 }
 0x63e   :  { %v6978_v13 = vpop.eup %6977  ;;  %v5071_v7 = vadd.f32 1.0, %v6976_v53  ;;  %v4974_v2 = vadd.f32 %v8088_v16, %v4973_v43  ;;  %v5907_v24 = vpop.f32.mrb[86].mxu1  ;;  %v5086_v47 = vmul.f32 %v5070_v57, %v5022_v3 }
 0x63f   :  { %v5069_v36 = vadd.f32 1.0, %v6978_v13  ;;  %v5042_v27 = vmul.f32 0.70710677, %v4982_v30  ;;  %v4985_v62 = vadd.f32 %v5907_v24, %v8088_v16  ;;  %v4976_v9 = vpop.f32.mrb[87].mxu1  ;;  %v5084_v5 = vmul.f32 %v5068_v40, %v5020_v23 }
 0x640   :  { %v5087_v29 = vmul.f32 %v5071_v7, %v5023_v34  ;;  %v5040_v11 = vmul.f32 0.70710677, %v4974_v2  ;;  %v4977_v22 = vadd.f32 %v8088_v16, %v4976_v9  ;;  %v5026_v31 = vmul.f32 0.5, %v4982_v30 }
 0x641   :  { %v5085_v46 = vmul.f32 %v5069_v36, %v5021_v10  ;;  %6979 = verf.f32 %v5042_v27  ;;  %v5043_v15 = vmul.f32 0.70710677, %v4985_v62  ;;  %v5027_v20 = vmul.f32 0.5, %v4985_v62 }
 0x642   :  { %v5101_v39 = vpack.c.bf16 %v5087_v29, %v5086_v47  ;;  %6981 = verf.f32 %v5040_v11  ;;  %v5041_v19 = vmul.f32 0.70710677, %v4977_v22  ;;  %v5024_v28 = vmul.f32 0.5, %v4974_v2 }
 0x643   :  { %v5100_v6 = vpack.c.bf16 %v5085_v46, %v5084_v5  ;;  %6983 = verf.f32 %v5043_v15  ;;  %v5025_v4 = vmul.f32 0.5, %v4977_v22 }
 0x644   :  { %6985 = verf.f32 %v5041_v19 }
 0x645   :  { %5920 = vmatprep.mubr.msk.bf16.mxu0 %vm5131_vm1, %v5100_v6 }
 0x646   :  { %5921 = vmatmul.mubr.msk.bf16.vlgmr.msra.gmra.mrb[64].mxu0 %vm5131_vm1, %v5101_v39 }
 0x64b   :  { %v6980_v58 = vpop.eup %6979 }
 0x64c   :  { %v6982_v12 = vpop.eup %6981  ;;  %v5074_v50 = vadd.f32 1.0, %v6980_v58  ;;  %v5910_v0 = vpop.f32.mrb[88].mxu1 }
 0x64d   :  { %v6984_v59 = vpop.eup %6983  ;;  %v5072_v21 = vadd.f32 1.0, %v6982_v12  ;;  %v4998_v38 = vadd.f32 %v5910_v0, %v8088_v16  ;;  %v4989_v45 = vpop.f32.mrb[89].mxu1 }
 0x64e   :  { %v6986_v35 = vpop.eup %6985  ;;  %v5075_v25 = vadd.f32 1.0, %v6984_v59  ;;  %v4990_v54 = vadd.f32 %v8088_v16, %v4989_v45  ;;  %v5911_v61 = vpop.f32.mrb[90].mxu1  ;;  %v5090_v60 = vmul.f32 %v5074_v50, %v5026_v31 }
 0x64f   :  { %v5073_v8 = vadd.f32 1.0, %v6986_v35  ;;  %v5046_v51 = vmul.f32 0.70710677, %v4998_v38  ;;  %v5001_v52 = vadd.f32 %v5911_v61, %v8088_v16  ;;  %v4992_v26 = vpop.f32.mrb[91].mxu1  ;;  %v5088_v44 = vmul.f32 %v5072_v21, %v5024_v28 }
 0x650   :  { %v5091_v14 = vmul.f32 %v5075_v25, %v5027_v20  ;;  %v5044_v37 = vmul.f32 0.70710677, %v4990_v54  ;;  %v4993_v41 = vadd.f32 %v8088_v16, %v4992_v26  ;;  %v5030_v13 = vmul.f32 0.5, %v4998_v38 }
 0x651   :  { %v5089_v55 = vmul.f32 %v5073_v8, %v5025_v4  ;;  %6987 = verf.f32 %v5046_v51  ;;  %v5047_v49 = vmul.f32 0.70710677, %v5001_v52  ;;  %v5031_v3 = vmul.f32 0.5, %v5001_v52  ;;  %v8114_v8 = vld [vmem:[#allocation3] ss:$0 sm:$0xff] }
 0x652   :  { %v5103_v17 = vpack.c.bf16 %v5091_v14, %v5090_v60  ;;  %6989 = verf.f32 %v5044_v37  ;;  %v5045_v32 = vmul.f32 0.70710677, %v4993_v41  ;;  %v5028_v43 = vmul.f32 0.5, %v4990_v54 }
 0x653   :  { %v5102_v33 = vpack.c.bf16 %v5089_v55, %v5088_v44  ;;  %6991 = verf.f32 %v5047_v49  ;;  %v5029_v23 = vmul.f32 0.5, %v4993_v41 }
 0x654   :  { %6993 = verf.f32 %v5045_v32 }
 0x655   :  { %5924 = vmatprep.mubr.msk.bf16.mxu0 %vm5131_vm1, %v5102_v33 }
 0x656   :  { %5925 = vmatmul.mubr.msk.bf16.gmra.mrb[68].mxu0 %vm5131_vm1, %v5103_v17 }
 0x65b   :  { %v6988_v56 = vpop.eup %6987 }
 0x65c   :  { %v6990_v18 = vpop.eup %6989  ;;  %v5078_v48 = vadd.f32 1.0, %v6988_v56  ;;  %v5914_v42 = vpop.f32.mrb[92].mxu1 }
 0x65d   :  { %v6992_v1 = vpop.eup %6991  ;;  %v5076_v57 = vadd.f32 1.0, %v6990_v18  ;;  %v5014_v53 = vadd.f32 %v5914_v42, %v8088_v16  ;;  %v5005_v40 = vpop.f32.mrb[93].mxu1 }
 0x65e   :  { %v6994_v63 = vpop.eup %6993  ;;  %v5079_v34 = vadd.f32 1.0, %v6992_v1  ;;  %v5006_v7 = vadd.f32 %v8088_v16, %v5005_v40  ;;  %v5915_v30 = vpop.f32.mrb[94].mxu1  ;;  %v5094_v24 = vmul.f32 %v5078_v48, %v5030_v13 }
 0x65f   :  { %v5077_v10 = vadd.f32 1.0, %v6994_v63  ;;  %v5050_v36 = vmul.f32 0.70710677, %v5014_v53  ;;  %v5008_v2 = vpop.f32.mrb[95].mxu1  ;;  %v5017_v27 = vadd.f32 %v5915_v30, %v8088_v16  ;;  %v5092_v62 = vmul.f32 %v5076_v57, %v5028_v43 }
 0x660   :  { %v5095_v47 = vmul.f32 %v5079_v34, %v5031_v3  ;;  %v5048_v29 = vmul.f32 0.70710677, %v5006_v7  ;;  %v5009_v5 = vadd.f32 %v8088_v16, %v5008_v2  ;;  %v5034_v59 = vmul.f32 0.5, %v5014_v53 }
 0x661   :  { %v5093_v9 = vmul.f32 %v5077_v10, %v5029_v23  ;;  %6995 = verf.f32 %v5050_v36  ;;  %v5051_v11 = vmul.f32 0.70710677, %v5017_v27  ;;  %v5035_v21 = vmul.f32 0.5, %v5017_v27 }
 0x662   :  { %v5105_v46 = vpack.c.bf16 %v5095_v47, %v5094_v24  ;;  %6997 = verf.f32 %v5048_v29  ;;  %v5049_v39 = vmul.f32 0.70710677, %v5009_v5  ;;  %v5032_v0 = vmul.f32 0.5, %v5006_v7 }
 0x663   :  { %v5104_v22 = vpack.c.bf16 %v5093_v9, %v5092_v62  ;;  %6999 = verf.f32 %v5051_v11  ;;  %v5033_v35 = vmul.f32 0.5, %v5009_v5 }
 0x664   :  { %7001 = verf.f32 %v5049_v39 }
 0x665   :  { %5928 = vmatprep.mubr.msk.bf16.mxu1 %vm5131_vm1, %v5104_v22 }
 0x666   :  { %5929 = vmatmul.mubr.msk.bf16.vlgmr.msra.gmra.mrb[96].mxu1 %vm5131_vm1, %v5105_v46 }
 0x66b   :  { %v6996_v15 = vpop.eup %6995 }
 0x66c   :  { %v6998_v6 = vpop.eup %6997  ;;  %v5082_v19 = vadd.f32 1.0, %v6996_v15 }
 0x66d   :  { %v7000_v58 = vpop.eup %6999  ;;  %v5080_v12 = vadd.f32 1.0, %v6998_v6 }
 0x66e   :  { %v7002_v50 = vpop.eup %7001  ;;  %v5083_v16 = vadd.f32 1.0, %v7000_v58  ;;  %v5098_v20 = vmul.f32 %v5082_v19, %v5034_v59 }
 0x66f   :  { %v5081_v31 = vadd.f32 1.0, %v7002_v50  ;;  %v5096_v38 = vmul.f32 %v5080_v12, %v5032_v0 }
 0x670   :  { %v5099_v25 = vmul.f32 %v5083_v16, %v5035_v21 }
 0x671   :  { %v5097_v45 = vmul.f32 %v5081_v31, %v5033_v35 }
 0x672   :  { %v5107_v28 = vpack.c.bf16 %v5099_v25, %v5098_v20 }
 0x673   :  { %v5106_v4 = vpack.c.bf16 %v5097_v45, %v5096_v38 }
 0x675   :  { %5932 = vmatprep.mubr.msk.bf16.mxu1 %vm5131_vm1, %v5106_v4 }
 0x676   :  { %5933 = vmatmul.mubr.msk.bf16.gmra.mrb[100].mxu1 %vm5131_vm1, %v5107_v28 }
 0x719   :  { %v5922_v54 = vpop.f32.mrb[64].mxu0 }
 0x71a   :  { %v5199_v61 = vadd.f32 %v5922_v54, %v8114_v8  ;;  %v5190_v60 = vpop.f32.mrb[65].mxu0 }
 0x71b   :  { %v5191_v14 = vadd.f32 %v8114_v8, %v5190_v60  ;;  %v5923_v51 = vpop.f32.mrb[66].mxu0 }
 0x71c   :  { %v5744_v52 = vmul.f32 -1.442695, %v5199_v61  ;;  %v5202_v26 = vadd.f32 %v5923_v51, %v8114_v8  ;;  %v5193_v44 = vpop.f32.mrb[67].mxu0 }
 0x71d   :  { %v5742_v55 = vmul.f32 -1.442695, %v5191_v14  ;;  %v5194_v37 = vadd.f32 %v8114_v8, %v5193_v44 }
 0x71e   :  { %7003 = vpow2.f32 %v5744_v52  ;;  %v5745_v41 = vmul.f32 -1.442695, %v5202_v26 }
 0x71f   :  { %7005 = vpow2.f32 %v5742_v55  ;;  %v5743_v17 = vmul.f32 -1.442695, %v5194_v37 }
 0x720   :  { %7007 = vpow2.f32 %v5745_v41 }
 0x721   :  { %7009 = vpow2.f32 %v5743_v17 }
 0x728   :  { %v7004_v49 = vpop.eup %7003 }
 0x729   :  { %v7006_v33 = vpop.eup %7005  ;;  %v5303_v32 = vadd.f32 1.0, %v7004_v49  ;;  %v5926_v48 = vpop.f32.mrb[68].mxu0 }
 0x72a   :  { %v7008_v56 = vpop.eup %7007  ;;  %v5301_v18 = vadd.f32 1.0, %v7006_v33  ;;  %v5215_v57 = vadd.f32 %v5926_v48, %v8114_v8  ;;  %v5206_v53 = vpop.f32.mrb[69].mxu0 }
 0x72b   :  { %v7010_v42 = vpop.eup %7009  ;;  %7011 = vrcp.f32 %v5303_v32  ;;  %v5304_v1 = vadd.f32 1.0, %v7008_v56  ;;  %v5207_v63 = vadd.f32 %v8114_v8, %v5206_v53  ;;  %v5927_v13 = vpop.f32.mrb[70].mxu0 }
 0x72c   :  { %7013 = vrcp.f32 %v5301_v18  ;;  %v5302_v40 = vadd.f32 1.0, %v7010_v42  ;;  %v5748_v3 = vmul.f32 -1.442695, %v5215_v57  ;;  %v5218_v34 = vadd.f32 %v5927_v13, %v8114_v8  ;;  %v5209_v7 = vpop.f32.mrb[71].mxu0 }
 0x72d   :  { %7015 = vrcp.f32 %v5304_v1  ;;  %v5746_v30 = vmul.f32 -1.442695, %v5207_v63  ;;  %v5210_v43 = vadd.f32 %v8114_v8, %v5209_v7 }
 0x72e   :  { %7017 = vrcp.f32 %v5302_v40  ;;  %v5749_v23 = vmul.f32 -1.442695, %v5218_v34 }
 0x72f   :  { %7019 = vpow2.f32 %v5748_v3  ;;  %v5747_v10 = vmul.f32 -1.442695, %v5210_v43 }
 0x730   :  { %7021 = vpow2.f32 %v5746_v30 }
 0x731   :  { %7023 = vpow2.f32 %v5749_v23 }
 0x732   :  { %7025 = vpow2.f32 %v5747_v10 }
 0x735   :  { %v7012_v36 = vpop.eup %7011 }
 0x736   :  { %v7014_v2 = vpop.eup %7013  ;;  %5352 = vst.msk [vmem:[%s8209_s13 + $0x10] sm:$0xff] %vm5349_vm2, %v7012_v36 }
 0x737   :  { %v7016_v24 = vpop.eup %7015  ;;  %5350 = vst.msk [vmem:[%s8209_s13] sm:$0xff] %vm5349_vm2, %v7014_v2 }
 0x738   :  { %v7018_v47 = vpop.eup %7017  ;;  %5353 = vst.msk [vmem:[%s8209_s13 + $0x18] sm:$0xff] %vm5349_vm2, %v7016_v24 }
 0x739   :  { %v7020_v29 = vpop.eup %7019  ;;  %5351 = vst.msk [vmem:[%s8209_s13 + $0x8] sm:$0xff] %vm5349_vm2, %v7018_v47  ;;  %v5930_v46 = vpop.f32.mrb[96].mxu1 }
 0x73a   :  { %v7022_v27 = vpop.eup %7021  ;;  %v5307_v62 = vadd.f32 1.0, %v7020_v29  ;;  %v5231_v39 = vadd.f32 %v5930_v46, %v8114_v8  ;;  %v5222_v15 = vpop.f32.mrb[97].mxu1 }
 0x73b   :  { %v7024_v9 = vpop.eup %7023  ;;  %v5305_v5 = vadd.f32 1.0, %v7022_v27  ;;  %v5223_v19 = vadd.f32 %v8114_v8, %v5222_v15  ;;  %v5931_v58 = vpop.f32.mrb[98].mxu1 }
 0x73c   :  { %v7026_v11 = vpop.eup %7025  ;;  %7027 = vrcp.f32 %v5307_v62  ;;  %v5308_v22 = vadd.f32 1.0, %v7024_v9  ;;  %v5752_v12 = vmul.f32 -1.442695, %v5231_v39  ;;  %v5234_v50 = vadd.f32 %v5931_v58, %v8114_v8  ;;  %v5225_v59 = vpop.f32.mrb[99].mxu1 }
 0x73d   :  { %7029 = vrcp.f32 %v5305_v5  ;;  %v5306_v6 = vadd.f32 1.0, %v7026_v11  ;;  %v5750_v21 = vmul.f32 -1.442695, %v5223_v19  ;;  %v5226_v16 = vadd.f32 %v8114_v8, %v5225_v59 }
 0x73e   :  { %7031 = vrcp.f32 %v5308_v22  ;;  %v5753_v0 = vmul.f32 -1.442695, %v5234_v50 }
 0x73f   :  { %7033 = vrcp.f32 %v5306_v6  ;;  %v5751_v35 = vmul.f32 -1.442695, %v5226_v16 }
 0x740   :  { %7035 = vpow2.f32 %v5752_v12 }
 0x741   :  { %7037 = vpow2.f32 %v5750_v21 }
 0x742   :  { %7039 = vpow2.f32 %v5753_v0 }
 0x743   :  { %7041 = vpow2.f32 %v5751_v35 }
 0x746   :  { %v7028_v31 = vpop.eup %7027 }
 0x747   :  { %v7030_v20 = vpop.eup %7029  ;;  %5356 = vst.msk [vmem:[%s8209_s13 + $0x30] sm:$0xff] %vm5349_vm2, %v7028_v31 }
 0x748   :  { %v7032_v25 = vpop.eup %7031  ;;  %5354 = vst.msk [vmem:[%s8209_s13 + $0x20] sm:$0xff] %vm5349_vm2, %v7030_v20 }
 0x749   :  { %v7034_v38 = vpop.eup %7033  ;;  %5357 = vst.msk [vmem:[%s8209_s13 + $0x38] sm:$0xff] %vm5349_vm2, %v7032_v25  ;;  %v5934_v60 = vpop.f32.mrb[100].mxu1 }
 0x74a   :  { %v7036_v45 = vpop.eup %7035  ;;  %5355 = vst.msk [vmem:[%s8209_s13 + $0x28] sm:$0xff] %vm5349_vm2, %v7034_v38  ;;  %v5247_v52 = vadd.f32 %v5934_v60, %v8114_v8  ;;  %v5238_v26 = vpop.f32.mrb[101].mxu1 }
 0x74b   :  { %v7038_v28 = vpop.eup %7037  ;;  %v5311_v4 = vadd.f32 1.0, %v7036_v45  ;;  %v5239_v55 = vadd.f32 %v8114_v8, %v5238_v26  ;;  %v5935_v37 = vpop.f32.mrb[102].mxu1 }
 0x74c   :  { %v7040_v54 = vpop.eup %7039  ;;  %v5309_v61 = vadd.f32 1.0, %v7038_v28  ;;  %v5756_v41 = vmul.f32 -1.442695, %v5247_v52  ;;  %v5250_v17 = vadd.f32 %v5935_v37, %v8114_v8  ;;  %v5241_v49 = vpop.f32.mrb[103].mxu1 }
 0x74d   :  { %v7042_v14 = vpop.eup %7041  ;;  %7043 = vrcp.f32 %v5311_v4  ;;  %v5312_v51 = vadd.f32 1.0, %v7040_v54  ;;  %v5754_v33 = vmul.f32 -1.442695, %v5239_v55  ;;  %v5242_v32 = vadd.f32 %v8114_v8, %v5241_v49 }
 0x74e   :  { %7045 = vrcp.f32 %v5309_v61  ;;  %v5310_v44 = vadd.f32 1.0, %v7042_v14  ;;  %v5757_v56 = vmul.f32 -1.442695, %v5250_v17 }
 0x74f   :  { %7047 = vrcp.f32 %v5312_v51  ;;  %v5755_v18 = vmul.f32 -1.442695, %v5242_v32 }
 0x750   :  { %7049 = vrcp.f32 %v5310_v44 }
 0x751   :  { %7051 = vpow2.f32 %v5756_v41 }
 0x752   :  { %7053 = vpow2.f32 %v5754_v33 }
 0x753   :  { %7055 = vpow2.f32 %v5757_v56 }
 0x754   :  { %7057 = vpow2.f32 %v5755_v18 }
 0x757   :  { %v7044_v48 = vpop.eup %7043 }
 0x758   :  { %v7046_v42 = vpop.eup %7045  ;;  %5360 = vst.msk [vmem:[%s8209_s13 + $0x50] sm:$0xff] %vm5349_vm2, %v7044_v48 }
 0x759   :  { %v7048_v1 = vpop.eup %7047  ;;  %5358 = vst.msk [vmem:[%s8209_s13 + $0x40] sm:$0xff] %vm5349_vm2, %v7046_v42 }
 0x75a   :  { %v7050_v8 = vpop.eup %7049  ;;  %5361 = vst.msk [vmem:[%s8209_s13 + $0x58] sm:$0xff] %vm5349_vm2, %v7048_v1 }
 0x75b   :  { %v7052_v57 = vpop.eup %7051  ;;  %5359 = vst.msk [vmem:[%s8209_s13 + $0x48] sm:$0xff] %vm5349_vm2, %v7050_v8 }
 0x75c   :  { %v7054_v53 = vpop.eup %7053  ;;  %v5315_v40 = vadd.f32 1.0, %v7052_v57 }
 0x75d   :  { %v7056_v63 = vpop.eup %7055  ;;  %v5313_v13 = vadd.f32 1.0, %v7054_v53 }
 0x75e   :  { %v7058_v3 = vpop.eup %7057  ;;  %7059 = vrcp.f32 %v5315_v40  ;;  %v5316_v34 = vadd.f32 1.0, %v7056_v63 }
 0x75f   :  { %7061 = vrcp.f32 %v5313_v13  ;;  %v5314_v7 = vadd.f32 1.0, %v7058_v3 }
 0x760   :  { %7063 = vrcp.f32 %v5316_v34 }
 0x761   :  { %7065 = vrcp.f32 %v5314_v7 }
 0x768   :  { %v7060_v30 = vpop.eup %7059 }
 0x769   :  { %v7062_v43 = vpop.eup %7061  ;;  %5364 = vst.msk [vmem:[%s8209_s13 + $0x70] sm:$0xff] %vm5349_vm2, %v7060_v30 }
 0x76a   :  { %v7064_v23 = vpop.eup %7063  ;;  %5362 = vst.msk [vmem:[%s8209_s13 + $0x60] sm:$0xff] %vm5349_vm2, %v7062_v43 }
 0x76b   :  { %v7066_v10 = vpop.eup %7065  ;;  %5365 = vst.msk [vmem:[%s8209_s13 + $0x78] sm:$0xff] %vm5349_vm2, %v7064_v23 }
 0x76c   :  { %5363 = vst.msk [vmem:[%s8209_s13 + $0x68] sm:$0xff] %vm5349_vm2, %v7066_v10 }
 0x76d   :  { %5370 = vsyncpa [#allocation5], 1 }
 0x76e   :  { %5371 = vsyncpa [#allocation7], 1 }

</bundles_post_ra>
